<compile_context>
chip_gen: v7x
topology: tpu7x:2x2x1
jax: 0.10.0
libtpu: 0.0.40
codegen_flags: <defaults>
</compile_context>

<pallas_src>
import jax
import jax.numpy as jnp
from jax.experimental import pallas as pl
from jax.experimental.pallas import tpu as pltpu

# ----------------------------- config -----------------------------
BATCH = 2
IN_CH = 3
IMG = 128
CHANNELS = 32            # EfficientDet(channels=...)
NUM_CLASSES = 8
NUM_ANCHORS = 9          # TODO(synk): Anchors class not provided; 3 scales x 3 ratios assumed.
CLS_HIDDEN = 256         # ClassificationModel default hidden_channels
REG_HIDDEN = CHANNELS    # RegressionModel(hidden_channels=channels)
OUT_STRIDES = (8, 16, 32)  # feats[1..3] of a 5-level pyramid == out_ids [4,5,6] - 3

K_PAD = 8                          # folded-backbone contraction dim (3 -> 8)
LANE = 128                         # lane-dense padded output width
BOX_OUT = NUM_ANCHORS * 4          # 36
CLS_OUT = NUM_ANCHORS * NUM_CLASSES  # 72


# ----------------------------- Pallas kernel -----------------------------
def _fused_heads_kernel(x_ref,
                        wb1_ref, bb1_ref, wb2_ref, bb2_ref, wb3_ref, bb3_ref,
                        wc1_ref, bc1_ref, wc2_ref, bc2_ref, wc3_ref, bc3_ref,
                        box_ref, cls_ref):
    """Fused box + cls heads over one row block of pooled pixels.

    Each head: 1x1 conv -> ReLU -> 1x1 conv -> ReLU -> 1x1 conv [-> sigmoid].
    # TODO(synk): SENextBottleneck2d definition is not in the reference snippet;
    # each bottleneck is approximated here by a pointwise conv + ReLU.
    """
    x = x_ref[...]  # (tm, K_PAD) bf16, backbone projection already folded in.

    # ---- box tower: K_PAD -> 32 -> 32 -> 36 (padded to 128 lanes) ----
    hb = jnp.dot(x, wb1_ref[...], preferred_element_type=jnp.float32) + bb1_ref[...]
    hb = jnp.maximum(hb, 0.0)
    hb = jnp.dot(hb.astype(jnp.bfloat16), wb2_ref[...],
                 preferred_element_type=jnp.float32) + bb2_ref[...]
    hb = jnp.maximum(hb, 0.0)
    box = jnp.dot(hb.astype(jnp.bfloat16), wb3_ref[...],
                  preferred_element_type=jnp.float32) + bb3_ref[...]
    box_ref[...] = box.astype(box_ref.dtype)

    # ---- cls tower: K_PAD -> 256 -> 256 -> 72 (padded to 128 lanes) ----
    hc = jnp.dot(x, wc1_ref[...], preferred_element_type=jnp.float32) + bc1_ref[...]
    hc = jnp.maximum(hc, 0.0)
    hc = jnp.dot(hc.astype(jnp.bfloat16), wc2_ref[...],
                 preferred_element_type=jnp.float32) + bc2_ref[...]
    hc = jnp.maximum(hc, 0.0)
    cls = jnp.dot(hc.astype(jnp.bfloat16), wc3_ref[...],
                  preferred_element_type=jnp.float32) + bc3_ref[...]
    cls_ref[...] = jax.nn.sigmoid(cls).astype(cls_ref.dtype)


def fused_heads(x_rows, packed_params, tm):
    """x_rows: (M, K_PAD) bf16 pooled pixels (all levels, all images concatenated)."""
    M = x_rows.shape[0]
    assert M % tm == 0 and tm % 8 == 0
    (wb1, bb1, wb2, bb2, wb3, bb3, wc1, bc1, wc2, bc2, wc3, bc3) = packed_params

    def full(arr):  # whole-array block, resident across the grid
        return pl.BlockSpec(arr.shape, lambda i: (0, 0))

    box, cls = pl.pallas_call(
        _fused_heads_kernel,
        out_shape=(jax.ShapeDtypeStruct((M, LANE), jnp.float32),
                   jax.ShapeDtypeStruct((M, LANE), jnp.float32)),
        grid_spec=pltpu.PrefetchScalarGridSpec(
            num_scalar_prefetch=0,
            grid=(M // tm,),
            in_specs=[
                pl.BlockSpec((tm, K_PAD), lambda i: (i, 0)),
                full(wb1), full(bb1), full(wb2), full(bb2), full(wb3), full(bb3),
                full(wc1), full(bc1), full(wc2), full(bc2), full(wc3), full(bc3),
            ],
            out_specs=[pl.BlockSpec((tm, LANE), lambda i: (i, 0)),
                       pl.BlockSpec((tm, LANE), lambda i: (i, 0))],
        ),
        compiler_params=pltpu.CompilerParams(
            dimension_semantics=("parallel",)),
    )(x_rows, wb1, bb1, wb2, bb2, wb3, bb3, wc1, bc1, wc2, bc2, wc3, bc3)
    return box, cls


# ----------------------------- glue (plain JAX) -----------------------------
def make_anchors(h, w, num_anchors=NUM_ANCHORS):
    """TODO(synk): Anchors class not provided; standard grid anchors (cx,cy,w,h) in [0,1]."""
    scales = jnp.array([2.0 ** (i / 3.0) for i in range(3)], jnp.float32)
    ratios = jnp.array([0.5, 1.0, 2.0], jnp.float32)
    base = 4.0 / float(w)
    ws = (base * scales[:, None] * jnp.sqrt(ratios)[None, :]).reshape(-1)  # (9,)
    hs = (base * scales[:, None] / jnp.sqrt(ratios)[None, :]).reshape(-1)
    cy = (jnp.arange(h, dtype=jnp.float32) + 0.5) / h
    cx = (jnp.arange(w, dtype=jnp.float32) + 0.5) / w
    cyg, cxg = jnp.meshgrid(cy, cx, indexing="ij")
    cxg = jnp.broadcast_to(cxg[:, :, None], (h, w, num_anchors)).reshape(-1)
    cyg = jnp.broadcast_to(cyg[:, :, None], (h, w, num_anchors)).reshape(-1)
    wsg = jnp.broadcast_to(ws[None, None, :], (h, w, num_anchors)).reshape(-1)
    hsg = jnp.broadcast_to(hs[None, None, :], (h, w, num_anchors)).reshape(-1)
    return jnp.stack([cxg, cyg, wsg, hsg], axis=-1)  # (h*w*A, 4)


def _pick_tile(M):
    # Prefer 2 parallel grid steps (v7x megacore) while keeping sublane alignment.
    if M % 16 == 0:
        return M // 2
    assert M % 8 == 0
    return M


def efficientdet_forward(images_nchw, packed_params):
    x = jnp.transpose(images_nchw, (0, 2, 3, 1))  # NCHW -> NHWC
    n, h, w, c = x.shape

    # Toy backbone: non-overlapping mean pooling per consumed stride only.
    # The 3->channels projection is folded into the heads' first layer on the host.
    # TODO(synk): BiFPN definition not provided in the reference snippet; identity neck.
    level_rows, level_shapes = [], []
    for stride in OUT_STRIDES:
        fh, fw = h // stride, w // stride
        p = x.reshape(n, fh, stride, fw, stride, c).mean(axis=(2, 4))
        level_rows.append(p.reshape(n * fh * fw, c))
        level_shapes.append((fh, fw))

    rows = jnp.concatenate(level_rows, axis=0)                       # (M, 3)
    rows = jnp.pad(rows, ((0, 0), (0, K_PAD - c))).astype(jnp.bfloat16)
    M = rows.shape[0]

    box_all, cls_all = fused_heads(rows, packed_params, _pick_tile(M))

    anchor_levels, box_levels, label_levels = [], [], []
    off = 0
    for fh, fw in level_shapes:
        m = n * fh * fw
        anchor_levels.append(make_anchors(fh, fw))
        box_levels.append(
            box_all[off:off + m, :BOX_OUT].reshape(n, fh * fw * NUM_ANCHORS, 4))
        label_levels.append(
            cls_all[off:off + m, :CLS_OUT].reshape(n, fh * fw * NUM_ANCHORS, NUM_CLASSES))
        off += m
    return anchor_levels, box_levels, label_levels


# ----------------------------- params -----------------------------
def init_linear(key, cin, cout, scale=0.05):
    w = jax.random.normal(key, (cin, cout), jnp.float32) * scale
    b = jnp.zeros((1, cout), jnp.float32)
    return w, b


def init_head(key, cin, ch, cout):
    k1, k2, k3 = jax.random.split(key, 3)
    w1, b1 = init_linear(k1, cin, ch)
    w2, b2 = init_linear(k2, ch, ch)
    w3, b3 = init_linear(k3, ch, cout)
    return (w1, b1, w2, b2, w3, b3)


def init_params(key):
    kb, kr, kc = jax.random.split(key, 3)
    backbone = init_linear(kb, IN_CH, CHANNELS)
    box = init_head(kr, CHANNELS, REG_HIDDEN, BOX_OUT)
    cls = init_head(kc, CHANNELS, CLS_HIDDEN, CLS_OUT)
    return {"backbone": backbone, "box": box, "cls": cls}


def fold_and_pack_params(params):
    """Fold the backbone 1x1 projection into each head's first layer, pad the
    final layers to 128 output lanes, and cast matmul operands to bf16."""
    w_bb, b_bb = params["backbone"]                     # (3, C), (1, C)

    def fold(head):
        w1, b1, w2, b2, w3, b3 = head
        w1f = w_bb @ w1                                 # (3, hidden)
        b1f = b_bb @ w1 + b1                            # (1, hidden)
        w1f = jnp.pad(w1f, ((0, K_PAD - w1f.shape[0]), (0, 0)))
        w3p = jnp.pad(w3, ((0, 0), (0, LANE - w3.shape[1])))
        b3p = jnp.pad(b3, ((0, 0), (0, LANE - b3.shape[1])))
        return (w1f.astype(jnp.bfloat16), b1f,
                w2.astype(jnp.bfloat16), b2,
                w3p.astype(jnp.bfloat16), b3p)

    return (*fold(params["box"]), *fold(params["cls"]))


# ----------------------------- main -----------------------------
if __name__ == "__main__":
    key = jax.random.PRNGKey(0)
    k_img, k_par = jax.random.split(key)
    images = jax.random.normal(k_img, (BATCH, IN_CH, IMG, IMG), jnp.float32)
    params = init_params(k_par)
    packed = fold_and_pack_params(params)

    fwd = jax.jit(efficientdet_forward)
    anchors, boxes, labels = fwd(images, packed)
    jax.block_until_ready((anchors, boxes, labels))

    # sanity checks on shapes / values
    expected_sizes = [16, 8, 4]  # feature map sizes for out_ids [4,5,6]-3
    for lvl, s in enumerate(expected_sizes):
        assert anchors[lvl].shape == (s * s * NUM_ANCHORS, 4)
        assert boxes[lvl].shape == (BATCH, s * s * NUM_ANCHORS, 4)
        assert labels[lvl].shape == (BATCH, s * s * NUM_ANCHORS, NUM_CLASSES)
        assert bool(jnp.all(jnp.isfinite(boxes[lvl])))
        assert bool(jnp.all((labels[lvl] >= 0.0) & (labels[lvl] <= 1.0)))

    print("KERNEL_OK")
</pallas_src>

<mosaic_0001>
module attributes {stable_mosaic.version = 11 : i64} {
  func.func @_fused_heads_kernel(%arg0: i32, %arg1: memref<336x8xbf16, #tpu.memory_space<vmem>>, %arg2: memref<8x32xbf16, #tpu.memory_space<vmem>>, %arg3: memref<1x32xf32, #tpu.memory_space<vmem>>, %arg4: memref<32x32xbf16, #tpu.memory_space<vmem>>, %arg5: memref<1x32xf32, #tpu.memory_space<vmem>>, %arg6: memref<32x128xbf16, #tpu.memory_space<vmem>>, %arg7: memref<1x128xf32, #tpu.memory_space<vmem>>, %arg8: memref<8x256xbf16, #tpu.memory_space<vmem>>, %arg9: memref<1x256xf32, #tpu.memory_space<vmem>>, %arg10: memref<256x256xbf16, #tpu.memory_space<vmem>>, %arg11: memref<1x256xf32, #tpu.memory_space<vmem>>, %arg12: memref<256x128xbf16, #tpu.memory_space<vmem>>, %arg13: memref<1x128xf32, #tpu.memory_space<vmem>>, %arg14: memref<336x128xf32, #tpu.memory_space<vmem>>, %arg15: memref<336x128xf32, #tpu.memory_space<vmem>>) attributes {dimension_semantics = [#tpu.dimension_semantics<parallel>], iteration_bounds = array<i64: 2>, scalar_prefetch = 0 : i64, scratch_operands = 0 : i64, tpu.core_type = #tpu.core_type<tc>, window_params = [{transform_indices = @transform_0, window_bounds = array<i64: 336, 8>}, {pipeline_mode = #tpu.pipeline_mode<synchronous>, transform_indices = @transform_1, window_bounds = array<i64: 8, 32>}, {pipeline_mode = #tpu.pipeline_mode<synchronous>, transform_indices = @transform_2, window_bounds = array<i64: 1, 32>}, {pipeline_mode = #tpu.pipeline_mode<synchronous>, transform_indices = @transform_3, window_bounds = array<i64: 32, 32>}, {pipeline_mode = #tpu.pipeline_mode<synchronous>, transform_indices = @transform_4, window_bounds = array<i64: 1, 32>}, {pipeline_mode = #tpu.pipeline_mode<synchronous>, transform_indices = @transform_5, window_bounds = array<i64: 32, 128>}, {pipeline_mode = #tpu.pipeline_mode<synchronous>, transform_indices = @transform_6, window_bounds = array<i64: 1, 128>}, {pipeline_mode = #tpu.pipeline_mode<synchronous>, transform_indices = @transform_7, window_bounds = array<i64: 8, 256>}, {pipeline_mode = #tpu.pipeline_mode<synchronous>, transform_indices = @transform_8, window_bounds = array<i64: 1, 256>}, {pipeline_mode = #tpu.pipeline_mode<synchronous>, transform_indices = @transform_9, window_bounds = array<i64: 256, 256>}, {pipeline_mode = #tpu.pipeline_mode<synchronous>, transform_indices = @transform_10, window_bounds = array<i64: 1, 256>}, {pipeline_mode = #tpu.pipeline_mode<synchronous>, transform_indices = @transform_11, window_bounds = array<i64: 256, 128>}, {pipeline_mode = #tpu.pipeline_mode<synchronous>, transform_indices = @transform_12, window_bounds = array<i64: 1, 128>}, {transform_indices = @transform_13, window_bounds = array<i64: 336, 128>}, {transform_indices = @transform_14, window_bounds = array<i64: 336, 128>}]} {
    %c0 = arith.constant 0 : index
    %c0_0 = arith.constant 0 : index
    %0 = vector.load %arg1[%c0, %c0_0] : memref<336x8xbf16, #tpu.memory_space<vmem>>, vector<336x8xbf16>
    %c0_1 = arith.constant 0 : index
    %c0_2 = arith.constant 0 : index
    %1 = vector.load %arg2[%c0_1, %c0_2] : memref<8x32xbf16, #tpu.memory_space<vmem>>, vector<8x32xbf16>
    %cst = arith.constant dense<0.000000e+00> : vector<336x32xf32>
    %2 = tpu.matmul %0, %1, %cst {dimension_numbers = #tpu.dot_dimension_numbers<[1], [0], [0], [1], [0, 0, 1, 1], [], []>} : vector<336x8xbf16>, vector<8x32xbf16>, vector<336x32xf32> -> vector<336x32xf32>
    %c0_3 = arith.constant 0 : index
    %c0_4 = arith.constant 0 : index
    %3 = vector.load %arg3[%c0_3, %c0_4] : memref<1x32xf32, #tpu.memory_space<vmem>>, vector<1x32xf32>
    %4 = vector.broadcast %3 : vector<1x32xf32> to vector<336x32xf32>
    %5 = arith.addf %2, %4 : vector<336x32xf32>
    %cst_5 = arith.constant 0.000000e+00 : f32
    %6 = vector.broadcast %cst_5 : f32 to vector<336x32xf32>
    %7 = arith.maximumf %5, %6 : vector<336x32xf32>
    %8 = arith.truncf %7 : vector<336x32xf32> to vector<336x32xbf16>
    %c0_6 = arith.constant 0 : index
    %c0_7 = arith.constant 0 : index
    %9 = vector.load %arg4[%c0_6, %c0_7] : memref<32x32xbf16, #tpu.memory_space<vmem>>, vector<32x32xbf16>
    %cst_8 = arith.constant dense<0.000000e+00> : vector<336x32xf32>
    %10 = tpu.matmul %8, %9, %cst_8 {dimension_numbers = #tpu.dot_dimension_numbers<[1], [0], [0], [1], [0, 0, 1, 1], [], []>} : vector<336x32xbf16>, vector<32x32xbf16>, vector<336x32xf32> -> vector<336x32xf32>
    %c0_9 = arith.constant 0 : index
    %c0_10 = arith.constant 0 : index
    %11 = vector.load %arg5[%c0_9, %c0_10] : memref<1x32xf32, #tpu.memory_space<vmem>>, vector<1x32xf32>
    %12 = vector.broadcast %11 : vector<1x32xf32> to vector<336x32xf32>
    %13 = arith.addf %10, %12 : vector<336x32xf32>
    %cst_11 = arith.constant 0.000000e+00 : f32
    %14 = vector.broadcast %cst_11 : f32 to vector<336x32xf32>
    %15 = arith.maximumf %13, %14 : vector<336x32xf32>
    %16 = arith.truncf %15 : vector<336x32xf32> to vector<336x32xbf16>
    %c0_12 = arith.constant 0 : index
    %c0_13 = arith.constant 0 : index
    %17 = vector.load %arg6[%c0_12, %c0_13] : memref<32x128xbf16, #tpu.memory_space<vmem>>, vector<32x128xbf16>
    %cst_14 = arith.constant dense<0.000000e+00> : vector<336x128xf32>
    %18 = tpu.matmul %16, %17, %cst_14 {dimension_numbers = #tpu.dot_dimension_numbers<[1], [0], [0], [1], [0, 0, 1, 1], [], []>} : vector<336x32xbf16>, vector<32x128xbf16>, vector<336x128xf32> -> vector<336x128xf32>
    %c0_15 = arith.constant 0 : index
    %c0_16 = arith.constant 0 : index
    %19 = vector.load %arg7[%c0_15, %c0_16] : memref<1x128xf32, #tpu.memory_space<vmem>>, vector<1x128xf32>
    %20 = vector.broadcast %19 : vector<1x128xf32> to vector<336x128xf32>
    %21 = arith.addf %18, %20 : vector<336x128xf32>
    %c0_17 = arith.constant 0 : index
    %c0_18 = arith.constant 0 : index
    %22 = vector.load %arg14[%c0_17, %c0_18] : memref<336x128xf32, #tpu.memory_space<vmem>>, vector<336x128xf32>
    tpu.vector_store %arg14[%c0_17, %c0_18], %21 {strides = array<i32>} : memref<336x128xf32, #tpu.memory_space<vmem>>, vector<336x128xf32>,
    %c0_19 = arith.constant 0 : index
    %c0_20 = arith.constant 0 : index
    %23 = vector.load %arg8[%c0_19, %c0_20] : memref<8x256xbf16, #tpu.memory_space<vmem>>, vector<8x256xbf16>
    %cst_21 = arith.constant dense<0.000000e+00> : vector<336x256xf32>
    %24 = tpu.matmul %0, %23, %cst_21 {dimension_numbers = #tpu.dot_dimension_numbers<[1], [0], [0], [1], [0, 0, 1, 1], [], []>} : vector<336x8xbf16>, vector<8x256xbf16>, vector<336x256xf32> -> vector<336x256xf32>
    %c0_22 = arith.constant 0 : index
    %c0_23 = arith.constant 0 : index
    %25 = vector.load %arg9[%c0_22, %c0_23] : memref<1x256xf32, #tpu.memory_space<vmem>>, vector<1x256xf32>
    %26 = vector.broadcast %25 : vector<1x256xf32> to vector<336x256xf32>
    %27 = arith.addf %24, %26 : vector<336x256xf32>
    %cst_24 = arith.constant 0.000000e+00 : f32
    %28 = vector.broadcast %cst_24 : f32 to vector<336x256xf32>
    %29 = arith.maximumf %27, %28 : vector<336x256xf32>
    %30 = arith.truncf %29 : vector<336x256xf32> to vector<336x256xbf16>
    %c0_25 = arith.constant 0 : index
    %c0_26 = arith.constant 0 : index
    %31 = vector.load %arg10[%c0_25, %c0_26] : memref<256x256xbf16, #tpu.memory_space<vmem>>, vector<256x256xbf16>
    %cst_27 = arith.constant dense<0.000000e+00> : vector<336x256xf32>
    %32 = tpu.matmul %30, %31, %cst_27 {dimension_numbers = #tpu.dot_dimension_numbers<[1], [0], [0], [1], [0, 0, 1, 1], [], []>} : vector<336x256xbf16>, vector<256x256xbf16>, vector<336x256xf32> -> vector<336x256xf32>
    %c0_28 = arith.constant 0 : index
    %c0_29 = arith.constant 0 : index
    %33 = vector.load %arg11[%c0_28, %c0_29] : memref<1x256xf32, #tpu.memory_space<vmem>>, vector<1x256xf32>
    %34 = vector.broadcast %33 : vector<1x256xf32> to vector<336x256xf32>
    %35 = arith.addf %32, %34 : vector<336x256xf32>
    %cst_30 = arith.constant 0.000000e+00 : f32
    %36 = vector.broadcast %cst_30 : f32 to vector<336x256xf32>
    %37 = arith.maximumf %35, %36 : vector<336x256xf32>
    %38 = arith.truncf %37 : vector<336x256xf32> to vector<336x256xbf16>
    %c0_31 = arith.constant 0 : index
    %c0_32 = arith.constant 0 : index
    %39 = vector.load %arg12[%c0_31, %c0_32] : memref<256x128xbf16, #tpu.memory_space<vmem>>, vector<256x128xbf16>
    %cst_33 = arith.constant dense<0.000000e+00> : vector<336x128xf32>
    %40 = tpu.matmul %38, %39, %cst_33 {dimension_numbers = #tpu.dot_dimension_numbers<[1], [0], [0], [1], [0, 0, 1, 1], [], []>} : vector<336x256xbf16>, vector<256x128xbf16>, vector<336x128xf32> -> vector<336x128xf32>
    %c0_34 = arith.constant 0 : index
    %c0_35 = arith.constant 0 : index
    %41 = vector.load %arg13[%c0_34, %c0_35] : memref<1x128xf32, #tpu.memory_space<vmem>>, vector<1x128xf32>
    %42 = vector.broadcast %41 : vector<1x128xf32> to vector<336x128xf32>
    %43 = arith.addf %40, %42 : vector<336x128xf32>
    %44 = arith.negf %43 : vector<336x128xf32>
    %45 = math.exp %44 : vector<336x128xf32>
    %cst_36 = arith.constant 1.000000e+00 : f32
    %46 = vector.broadcast %cst_36 : f32 to vector<336x128xf32>
    %47 = arith.addf %46, %45 : vector<336x128xf32>
    %48 = arith.divf %46, %47 : vector<336x128xf32>
    %c0_37 = arith.constant 0 : index
    %c0_38 = arith.constant 0 : index
    %49 = vector.load %arg15[%c0_37, %c0_38] : memref<336x128xf32, #tpu.memory_space<vmem>>, vector<336x128xf32>
    tpu.vector_store %arg15[%c0_37, %c0_38], %48 {strides = array<i32>} : memref<336x128xf32, #tpu.memory_space<vmem>>, vector<336x128xf32>,
    return
  }
  func.func @transform_0(%arg0: i32) -> (i32, i32) {
    %c0_i32 = arith.constant 0 : i32
    %c0_i32_0 = arith.constant 0 : i32
    return %arg0, %c0_i32 : i32, i32
  }
  func.func @transform_1(%arg0: i32) -> (i32, i32) {
    %c0_i32 = arith.constant 0 : i32
    %c0_i32_0 = arith.constant 0 : i32
    %c0_i32_1 = arith.constant 0 : i32
    return %c0_i32, %c0_i32_0 : i32, i32
  }
  func.func @transform_2(%arg0: i32) -> (i32, i32) {
    %c0_i32 = arith.constant 0 : i32
    %c0_i32_0 = arith.constant 0 : i32
    %c0_i32_1 = arith.constant 0 : i32
    return %c0_i32, %c0_i32_0 : i32, i32
  }
  func.func @transform_3(%arg0: i32) -> (i32, i32) {
    %c0_i32 = arith.constant 0 : i32
    %c0_i32_0 = arith.constant 0 : i32
    %c0_i32_1 = arith.constant 0 : i32
    return %c0_i32, %c0_i32_0 : i32, i32
  }
  func.func @transform_4(%arg0: i32) -> (i32, i32) {
    %c0_i32 = arith.constant 0 : i32
    %c0_i32_0 = arith.constant 0 : i32
    %c0_i32_1 = arith.constant 0 : i32
    return %c0_i32, %c0_i32_0 : i32, i32
  }
  func.func @transform_5(%arg0: i32) -> (i32, i32) {
    %c0_i32 = arith.constant 0 : i32
    %c0_i32_0 = arith.constant 0 : i32
    %c0_i32_1 = arith.constant 0 : i32
    return %c0_i32, %c0_i32_0 : i32, i32
  }
  func.func @transform_6(%arg0: i32) -> (i32, i32) {
    %c0_i32 = arith.constant 0 : i32
    %c0_i32_0 = arith.constant 0 : i32
    %c0_i32_1 = arith.constant 0 : i32
    return %c0_i32, %c0_i32_0 : i32, i32
  }
  func.func @transform_7(%arg0: i32) -> (i32, i32) {
    %c0_i32 = arith.constant 0 : i32
    %c0_i32_0 = arith.constant 0 : i32
    %c0_i32_1 = arith.constant 0 : i32
    return %c0_i32, %c0_i32_0 : i32, i32
  }
  func.func @transform_8(%arg0: i32) -> (i32, i32) {
    %c0_i32 = arith.constant 0 : i32
    %c0_i32_0 = arith.constant 0 : i32
    %c0_i32_1 = arith.constant 0 : i32
    return %c0_i32, %c0_i32_0 : i32, i32
  }
  func.func @transform_9(%arg0: i32) -> (i32, i32) {
    %c0_i32 = arith.constant 0 : i32
    %c0_i32_0 = arith.constant 0 : i32
    %c0_i32_1 = arith.constant 0 : i32
    return %c0_i32, %c0_i32_0 : i32, i32
  }
  func.func @transform_10(%arg0: i32) -> (i32, i32) {
    %c0_i32 = arith.constant 0 : i32
    %c0_i32_0 = arith.constant 0 : i32
    %c0_i32_1 = arith.constant 0 : i32
    return %c0_i32, %c0_i32_0 : i32, i32
  }
  func.func @transform_11(%arg0: i32) -> (i32, i32) {
    %c0_i32 = arith.constant 0 : i32
    %c0_i32_0 = arith.constant 0 : i32
    %c0_i32_1 = arith.constant 0 : i32
    return %c0_i32, %c0_i32_0 : i32, i32
  }
  func.func @transform_12(%arg0: i32) -> (i32, i32) {
    %c0_i32 = arith.constant 0 : i32
    %c0_i32_0 = arith.constant 0 : i32
    %c0_i32_1 = arith.constant 0 : i32
    return %c0_i32, %c0_i32_0 : i32, i32
  }
  func.func @transform_13(%arg0: i32) -> (i32, i32) {
    %c0_i32 = arith.constant 0 : i32
    %c0_i32_0 = arith.constant 0 : i32
    return %arg0, %c0_i32 : i32, i32
  }
  func.func @transform_14(%arg0: i32) -> (i32, i32) {
    %c0_i32 = arith.constant 0 : i32
    %c0_i32_0 = arith.constant 0 : i32
    return %arg0, %c0_i32 : i32, i32
  }
}

</mosaic_0001>

<bundles_post_ra>
// kernel: efficientdet_forward.1
= control target key start
LH: loop header
LB: loop body
LE: loop exit
PB: predicated region body
PF: predicated region fallthrough
CT: control target
= control target key end

     0   :  { %s4242_s29 = smov 0   ;;  %s5261_s0 = inlined_call_operand.vmem [shape: bf16[672,8], index: 0, kind: input, shape index: {}]   ;;  %s5262_s1 = inlined_call_operand.vmem [shape: bf16[8,32], index: 1, kind: input, shape index: {}]   ;;  %s5263_s2 = inlined_call_operand.vmem [shape: f32[1,32], index: 2, kind: input, shape index: {}]   ;;  %s5264_s3 = inlined_call_operand.vmem [shape: bf16[32,32], index: 3, kind: input, shape index: {}]   ;;  %s5265_s4 = inlined_call_operand.vmem [shape: f32[1,32], index: 4, kind: input, shape index: {}]   ;;  %s5266_s5 = inlined_call_operand.vmem [shape: bf16[32,128], index: 5, kind: input, shape index: {}]   ;;  %s5267_s6 = inlined_call_operand.vmem [shape: f32[1,128], index: 6, kind: input, shape index: {}]   ;;  %s5268_s7 = inlined_call_operand.vmem [shape: bf16[8,256], index: 7, kind: input, shape index: {}]   ;;  %s5269_s8 = inlined_call_operand.vmem [shape: f32[1,256], index: 8, kind: input, shape index: {}]   ;;  %s5270_s9 = inlined_call_operand.vmem [shape: bf16[256,256], index: 9, kind: input, shape index: {}]   ;;  %s5271_s10 = inlined_call_operand.vmem [shape: f32[1,256], index: 10, kind: input, shape index: {}]   ;;  %s5272_s11 = inlined_call_operand.vmem [shape: bf16[256,128], index: 11, kind: input, shape index: {}]   ;;  %s5273_s12 = inlined_call_operand.vmem [shape: f32[1,128], index: 12, kind: input, shape index: {}]   ;;  %s5274_s13 = inlined_call_operand.vmem [shape: f32[672,128], index: 13, kind: output, shape index: {0}]   ;;  %s5275_s14 = inlined_call_operand.vmem [shape: f32[672,128], index: 14, kind: output, shape index: {1}]  }
   0x1 LB: > { %s3339_s30 = sadd.s32 4294967295, %s4162_s29   ;;  %p3343_p0 = scmp.ge.s32.totalorder %s4162_s29, 1  ;;  %s4162_s29 = sphi %s4242_s29, %s25_s29  }
   0x2   : > { %p416_p1 = scmp.lt.s32.totalorder %s4162_s29, 3 }
   0x4   : > { %p417_p2 = pnand %p3343_p0, %p416_p1 }
   0x5   : > { %v528_v0 = vld [vmem:[%s5262_s1] sm:$0xf] (!%p417_p2)  ;;  %vm705_vm0 = vcmask (!%p417_p2), 1043456   ;;  %s467_s17 = smul.u32 (!%p417_p2), 42, %s3339_s30  ;;  %v4164_v1 = vmov (!%p417_p2), 0.0   ;;  %vm4165_vm1 = vmmov (!%p417_p2), 0  }
   0x6   : > { %420 = sbr.rel (%p417_p2) target bundleno = 1252 (0x4e4), region = 72  ;;  %3623 = vmatprep.subr.bf16.mxu0 (!%p417_p2), %v4164_v1  ;;  %v707_v2 = vsel (!%p417_p2), %vm705_vm0, %v528_v0, 0  ;;  %3625 = vmatprep.mubr.msk.bf16.mxu0 (!%p417_p2), %vm4165_vm1, %v4164_v1  ;;  %vm641_vm2 = vcmask (!%p417_p2), 64512   ;;  %v3917_v14 = vld [vmem:[%s5264_s3] sm:$0xff] (!%p417_p2)   ;;  %v3918_v16 = vld [vmem:[%s5264_s3 + $0x8] sm:$0xff] (!%p417_p2)   ;;  %vm996_vm3 = vcmask (!%p417_p2), 261120  }
   0x7   : > { %3624 = vmatpush3.bf16.msra.mxu0 (!%p417_p2), %v707_v2  ;;  %p468_p3 = scmp.lt.s32.totalorder (!%p417_p2), %s467_s17, 83  ;;  %3709 = vmatprep.subr.bf16.mxu1 (!%p417_p2), %v4164_v1  ;;  %v1653_v18 = vld [vmem:[%s5268_s7] sm:$0xff] (!%p417_p2)  ;;  %v3922_v59 = vld [vmem:[%s5266_s5 + $0x8] sm:$0xff] (!%p417_p2)  }
   0x8   : > { %3713 = vmatprep.mubr.msk.bf16.mxu1 (!%p417_p2), %vm4165_vm1, %v4164_v1  ;;  %3797 = vmatprep.subr.bf16.mxu0 (!%p417_p2), %v4164_v1  ;;  %v3439_v19 = vcombine.high (!%p417_p2), %v1653_v18, %v1653_v18  ;;  %v3921_v26 = vld [vmem:[%s5266_s5] sm:$0xff] (!%p417_p2)   ;;  %v3438_v36 = vcombine.low (!%p417_p2), %v1653_v18, %v1653_v18 }
   0x9   : > { %3710 = vmatpush3.bf16.msra.mxu1 (!%p417_p2), %v3917_v14  ;;  %v4431_v29 = vld [vmem:[%s5263_s2] ss:$0 sm:$0xff] (!%p417_p2) }
   0xa   : > { %3711 = vmatprep.subr.bf16.mxu1 (!%p417_p2), %v4164_v1  ;;  %v1672_v40 = vsel (!%p417_p2), %vm705_vm0, %v3438_v36, 0 }
   0xd   : > { %s5277_s17 = smov (!%p468_p3, %s467_s17), 83  ;;  %3712 = vmatpush3.bf16.msra.mxu1 %v3918_v16 }
   0xe   : > { %s3344_s18 = sshll.u32 %s5277_s17, 2  ;;  %3440 = vmatprep.subr.msk.bf16.mxu1 %vm705_vm0, %v3439_v19  ;;  %s3345_s16 = sshll.u32 %s5277_s17, 3 }
   0xf   : > { %s4267_s21 = scalar_lea.vmem %s5261_s0, %s3344_s18  ;;  %s4906_s23 = scalar_lea.vmem %s5274_s13, %s3345_s16 }
  0x10   : > { %v4270_v3 = vld [vmem:[%s4267_s21] sm:$0xff]   ;;  %v4277_v4 = vld [vmem:[%s4267_s21 + $0x8] sm:$0xff]   ;;  %v4284_v5 = vld [vmem:[%s4267_s21 + $0x10] sm:$0xff]   ;;  %s5179_s26 = scalar_lea.vmem %s5275_s14, %s3345_s16 }
  0x11   : > { %3626 = vmatmul.mubr.msk.bf16.vlgmr.msra.gmra.mrb[0].mxu0 %vm641_vm2, %v4270_v3  ;;  %v4291_v6 = vld [vmem:[%s4267_s21 + $0x18] sm:$0xff]   ;;  %v4298_v7 = vld [vmem:[%s4267_s21 + $0x20] sm:$0xff]   ;;  %v4305_v8 = vld [vmem:[%s4267_s21 + $0x28] sm:$0xff]  }
  0x12   : > { %3629 = vmatprep.mubr.msk.bf16.mxu0 %vm4165_vm1, %v4164_v1  ;;  %v4312_v9 = vld [vmem:[%s4267_s21 + $0x30] sm:$0xff]   ;;  %v4319_v10 = vld [vmem:[%s4267_s21 + $0x38] sm:$0xff]   ;;  %v4326_v11 = vld [vmem:[%s4267_s21 + $0x40] sm:$0xff]   ;;  %3798 = vmatpush3.bf16.msra.mxu0 %v3921_v26 }
  0x13   : > { %v4333_v12 = vld [vmem:[%s4267_s21 + $0x48] sm:$0xff]   ;;  %v4340_v13 = vld [vmem:[%s4267_s21 + $0x50] sm:$0xff]   ;;  %v4350_v15 = vld [vmem:[%s4267_s21 + $0x58] sm:$0xff]   ;;  %3799 = vmatprep.subr.bf16.mxu0 %v4164_v1 }
  0x14   : > { %v4361_v17 = vld [vmem:[%s4267_s21 + $0x60] sm:$0xff]   ;;  %v4372_v20 = vld [vmem:[%s4267_s21 + $0x68] sm:$0xff]   ;;  %v4379_v21 = vld [vmem:[%s4267_s21 + $0x70] sm:$0xff]  }
  0x15   : > { %v4386_v22 = vld [vmem:[%s4267_s21 + $0x78] sm:$0xff]   ;;  %v4393_v23 = vld [vmem:[%s4267_s21 + $0x80] sm:$0xff]   ;;  %v4400_v24 = vld [vmem:[%s4267_s21 + $0x88] sm:$0xff]  }
  0x16   : > { %v4407_v25 = vld [vmem:[%s4267_s21 + $0x90] sm:$0xff]   ;;  %v4417_v27 = vld [vmem:[%s4267_s21 + $0x98] sm:$0xff]   ;;  %v3916_v28 = vld [vmem:[%s4267_s21 + $0xa0] sm:$0xff]   ;;  %3800 = vmatpush3.bf16.msra.mxu0 %v3922_v59 }
  0x19   : > { %3630 = vmatmul.mubr.msk.bf16.gmra.mrb[4].mxu0 %vm641_vm2, %v4277_v4 }
  0x1a   : > { %3633 = vmatprep.mubr.msk.bf16.mxu0 %vm4165_vm1, %v4164_v1 }
  0x21   : > { %3634 = vmatmul.mubr.msk.bf16.gmra.mrb[8].mxu0 %vm641_vm2, %v4284_v5 }
  0x22   : > { %3637 = vmatprep.mubr.msk.bf16.mxu0 %vm4165_vm1, %v4164_v1 }
  0x29   : > { %3638 = vmatmul.mubr.msk.bf16.gmra.mrb[12].mxu0 %vm641_vm2, %v4291_v6 }
  0x2a   : > { %3641 = vmatprep.mubr.msk.bf16.mxu0 %vm4165_vm1, %v4164_v1 }
  0x31   : > { %3642 = vmatmul.mubr.msk.bf16.gmra.mrb[16].mxu0 %vm641_vm2, %v4298_v7 }
  0x32   : > { %3645 = vmatprep.mubr.msk.bf16.mxu0 %vm4165_vm1, %v4164_v1 }
  0x39   : > { %3646 = vmatmul.mubr.msk.bf16.gmra.mrb[20].mxu0 %vm641_vm2, %v4305_v8 }
  0x3a   : > { %3649 = vmatprep.mubr.msk.bf16.mxu0 %vm4165_vm1, %v4164_v1 }
  0x41   : > { %3650 = vmatmul.mubr.msk.bf16.gmra.mrb[24].mxu0 %vm641_vm2, %v4312_v9 }
  0x42   : > { %3653 = vmatprep.mubr.msk.bf16.mxu0 %vm4165_vm1, %v4164_v1 }
  0x49   : > { %3654 = vmatmul.mubr.msk.bf16.gmra.mrb[28].mxu0 %vm641_vm2, %v4319_v10 }
  0x4a   : > { %3657 = vmatprep.mubr.msk.bf16.mxu0 %vm4165_vm1, %v4164_v1 }
  0x51   : > { %3658 = vmatmul.mubr.msk.bf16.gmra.mrb[32].mxu0 %vm641_vm2, %v4326_v11 }
  0x52   : > { %3661 = vmatprep.mubr.msk.bf16.mxu0 %vm4165_vm1, %v4164_v1 }
  0x59   : > { %3662 = vmatmul.mubr.msk.bf16.gmra.mrb[36].mxu0 %vm641_vm2, %v4333_v12 }
  0x5a   : > { %3665 = vmatprep.mubr.msk.bf16.mxu0 %vm4165_vm1, %v4164_v1 }
  0x61   : > { %3666 = vmatmul.mubr.msk.bf16.gmra.mrb[40].mxu0 %vm641_vm2, %v4340_v13 }
  0x62   : > { %3669 = vmatprep.mubr.msk.bf16.mxu0 %vm4165_vm1, %v4164_v1 }
  0x69   : > { %3670 = vmatmul.mubr.msk.bf16.gmra.mrb[44].mxu0 %vm641_vm2, %v4350_v15 }
  0x6a   : > { %3673 = vmatprep.mubr.msk.bf16.mxu0 %vm4165_vm1, %v4164_v1 }
  0x71   : > { %3674 = vmatmul.mubr.msk.bf16.gmra.mrb[48].mxu0 %vm641_vm2, %v4361_v17 }
  0x72   : > { %3677 = vmatprep.mubr.msk.bf16.mxu0 %vm4165_vm1, %v4164_v1 }
  0x79   : > { %3678 = vmatmul.mubr.msk.bf16.gmra.mrb[52].mxu0 %vm641_vm2, %v4372_v20 }
  0x7a   : > { %3681 = vmatprep.mubr.msk.bf16.mxu0 %vm4165_vm1, %v4164_v1 }
  0x81   : > { %3682 = vmatmul.mubr.msk.bf16.gmra.mrb[56].mxu0 %vm641_vm2, %v4379_v21 }
  0x82   : > { %3685 = vmatprep.mubr.msk.bf16.mxu0 %vm4165_vm1, %v4164_v1 }
  0x89   : > { %3686 = vmatmul.mubr.msk.bf16.gmra.mrb[60].mxu0 %vm641_vm2, %v4386_v22 }
  0x8a   : > { %3689 = vmatprep.mubr.msk.bf16.mxu0 %vm4165_vm1, %v4164_v1 }
  0x91   : > { %3690 = vmatmul.mubr.msk.bf16.gmra.mrb[64].mxu0 %vm641_vm2, %v4393_v23 }
  0x92   : > { %3693 = vmatprep.mubr.msk.bf16.mxu0 %vm4165_vm1, %v4164_v1 }
  0x99   : > { %3694 = vmatmul.mubr.msk.bf16.gmra.mrb[68].mxu0 %vm641_vm2, %v4400_v24 }
  0x9a   : > { %3697 = vmatprep.mubr.msk.bf16.mxu0 %vm4165_vm1, %v4164_v1 }
  0xa1   : > { %3698 = vmatmul.mubr.msk.bf16.gmra.mrb[72].mxu0 %vm641_vm2, %v4407_v25 }
  0xa2   : > { %3701 = vmatprep.mubr.msk.bf16.mxu0 %vm4165_vm1, %v4164_v1 }
  0xa9   : > { %3702 = vmatmul.mubr.msk.bf16.gmra.mrb[76].mxu0 %vm641_vm2, %v4417_v27 }
  0xaa   : > { %3705 = vmatprep.mubr.msk.bf16.mxu0 %vm4165_vm1, %v4164_v1 }
  0xb1   : > { %3706 = vmatmul.mubr.msk.bf16.gmra.mrb[80].mxu0 %vm641_vm2, %v3916_v28 }
  0xb2   : > { %3801 = vmatprep.mubr.msk.bf16.mxu0 %vm4165_vm1, %v4164_v1 }
  0xe4   : > { %v743_v30 = vpop.f32.mrb[0].mxu0 }
  0xe5   : > { %v744_v31 = vadd.f32 %v4431_v29, %v743_v30  ;;  %v3627_v32 = vpop.f32.mrb[1].mxu0 }
  0xe6   : > { %v746_v33 = vpop.f32.mrb[2].mxu0 }
  0xe7   : > { %v747_v34 = vadd.f32 %v4431_v29, %v746_v33  ;;  %v3628_v35 = vpop.f32.mrb[3].mxu0  ;;  %v910_v37 = vmax.f32 %v744_v31, 0.0 }
  0xe9   : > { %v911_v38 = vmax.f32 %v747_v34, 0.0 }
  0xeb   : > { %v952_v39 = vpack.c.bf16 %v911_v38, %v910_v37 }
  0xec   : > { %v751_v41 = vpop.f32.mrb[4].mxu0 }
  0xed   : > { %v752_v42 = vadd.f32 %v4431_v29, %v751_v41  ;;  %v3631_v43 = vpop.f32.mrb[5].mxu0  ;;  %3714 = vmatmul.mubr.msk.bf16.vlgmr.msra.gmra.mrb[0].mxu1 %vm996_vm3, %v952_v39 }
  0xee   : > { %1678 = vmatpush1.bf16.msra.mxu1 %v1672_v40  ;;  %v754_v44 = vpop.f32.mrb[6].mxu0  ;;  %3717 = vmatprep.mubr.msk.bf16.mxu1 %vm4165_vm1, %v4164_v1  ;;  %v4166_v40 = vmov 0  }
  0xef   : > { %v755_v45 = vadd.f32 %v4431_v29, %v754_v44  ;;  %v3632_v46 = vpop.f32.mrb[7].mxu0  ;;  %v912_v47 = vmax.f32 %v752_v42, 0.0  ;;  %2754 = vmatprep.subr.bf16.mxu1 %v4166_v40 }
  0xf1   : > { %v913_v48 = vmax.f32 %v755_v45, 0.0 }
  0xf3   : > { %v953_v49 = vpack.c.bf16 %v913_v48, %v912_v47 }
  0xf4   : > { %v759_v50 = vpop.f32.mrb[8].mxu0 }
  0xf5   : > { %v760_v51 = vadd.f32 %v4431_v29, %v759_v50  ;;  %v3635_v52 = vpop.f32.mrb[9].mxu0  ;;  %3718 = vmatmul.mubr.msk.bf16.gmra.mrb[4].mxu1 %vm996_vm3, %v953_v49 }
  0xf6   : > { %v762_v53 = vpop.f32.mrb[10].mxu0  ;;  %3721 = vmatprep.mubr.msk.bf16.mxu1 %vm4165_vm1, %v4164_v1 }
  0xf7   : > { %v763_v54 = vadd.f32 %v4431_v29, %v762_v53  ;;  %v3636_v55 = vpop.f32.mrb[11].mxu0  ;;  %v914_v56 = vmax.f32 %v760_v51, 0.0 }
  0xf9   : > { %v915_v57 = vmax.f32 %v763_v54, 0.0 }
  0xfb   : > { %v954_v58 = vpack.c.bf16 %v915_v57, %v914_v56 }
  0xfc   : > { %v767_v60 = vpop.f32.mrb[12].mxu0 }
  0xfd   : > { %v768_v61 = vadd.f32 %v4431_v29, %v767_v60  ;;  %v3639_v62 = vpop.f32.mrb[13].mxu0  ;;  %3722 = vmatmul.mubr.msk.bf16.gmra.mrb[8].mxu1 %vm996_vm3, %v954_v58 }
  0xfe   : > { %v770_v63 = vpop.f32.mrb[14].mxu0  ;;  %3725 = vmatprep.mubr.msk.bf16.mxu1 %vm4165_vm1, %v4164_v1 }
  0xff   : > { %v771_v0 = vadd.f32 %v4431_v29, %v770_v63  ;;  %v3640_v2 = vpop.f32.mrb[15].mxu0  ;;  %v916_v14 = vmax.f32 %v768_v61, 0.0 }
 0x101   : > { %v917_v16 = vmax.f32 %v771_v0, 0.0 }
 0x103   : > { %v955_v18 = vpack.c.bf16 %v917_v16, %v916_v14 }
 0x104   : > { %v775_v19 = vpop.f32.mrb[16].mxu0 }
 0x105   : > { %v776_v26 = vadd.f32 %v4431_v29, %v775_v19  ;;  %v3643_v28 = vpop.f32.mrb[17].mxu0  ;;  %3726 = vmatmul.mubr.msk.bf16.gmra.mrb[12].mxu1 %vm996_vm3, %v955_v18 }
 0x106   : > { %v778_v30 = vpop.f32.mrb[18].mxu0  ;;  %3729 = vmatprep.mubr.msk.bf16.mxu1 %vm4165_vm1, %v4164_v1 }
 0x107   : > { %v779_v31 = vadd.f32 %v4431_v29, %v778_v30  ;;  %v3644_v32 = vpop.f32.mrb[19].mxu0  ;;  %v918_v33 = vmax.f32 %v776_v26, 0.0 }
 0x109   : > { %v919_v34 = vmax.f32 %v779_v31, 0.0 }
 0x10b   : > { %v956_v35 = vpack.c.bf16 %v919_v34, %v918_v33 }
 0x10c   : > { %v783_v36 = vpop.f32.mrb[20].mxu0 }
 0x10d   : > { %v784_v37 = vadd.f32 %v4431_v29, %v783_v36  ;;  %v3647_v38 = vpop.f32.mrb[21].mxu0  ;;  %3730 = vmatmul.mubr.msk.bf16.gmra.mrb[16].mxu1 %vm996_vm3, %v956_v35 }
 0x10e   : > { %v786_v39 = vpop.f32.mrb[22].mxu0  ;;  %3733 = vmatprep.mubr.msk.bf16.mxu1 %vm4165_vm1, %v4164_v1 }
 0x10f   : > { %v787_v41 = vadd.f32 %v4431_v29, %v786_v39  ;;  %v3648_v42 = vpop.f32.mrb[23].mxu0  ;;  %v920_v43 = vmax.f32 %v784_v37, 0.0 }
 0x111   : > { %v921_v44 = vmax.f32 %v787_v41, 0.0 }
 0x113   : > { %v957_v45 = vpack.c.bf16 %v921_v44, %v920_v43 }
 0x114   : > { %v791_v46 = vpop.f32.mrb[24].mxu0 }
 0x115   : > { %v792_v47 = vadd.f32 %v4431_v29, %v791_v46  ;;  %v3651_v48 = vpop.f32.mrb[25].mxu0  ;;  %3734 = vmatmul.mubr.msk.bf16.gmra.mrb[20].mxu1 %vm996_vm3, %v957_v45 }
 0x116   : > { %v794_v49 = vpop.f32.mrb[26].mxu0  ;;  %3737 = vmatprep.mubr.msk.bf16.mxu1 %vm4165_vm1, %v4164_v1 }
 0x117   : > { %v795_v50 = vadd.f32 %v4431_v29, %v794_v49  ;;  %v3652_v51 = vpop.f32.mrb[27].mxu0  ;;  %v922_v52 = vmax.f32 %v792_v47, 0.0 }
 0x119   : > { %v923_v53 = vmax.f32 %v795_v50, 0.0 }
 0x11b   : > { %v958_v54 = vpack.c.bf16 %v923_v53, %v922_v52 }
 0x11c   : > { %v799_v55 = vpop.f32.mrb[28].mxu0 }
 0x11d   : > { %v800_v56 = vadd.f32 %v4431_v29, %v799_v55  ;;  %v3655_v57 = vpop.f32.mrb[29].mxu0  ;;  %3738 = vmatmul.mubr.msk.bf16.gmra.mrb[24].mxu1 %vm996_vm3, %v958_v54 }
 0x11e   : > { %v802_v58 = vpop.f32.mrb[30].mxu0  ;;  %3741 = vmatprep.mubr.msk.bf16.mxu1 %vm4165_vm1, %v4164_v1 }
 0x11f   : > { %v803_v59 = vadd.f32 %v4431_v29, %v802_v58  ;;  %v3656_v60 = vpop.f32.mrb[31].mxu0  ;;  %v924_v61 = vmax.f32 %v800_v56, 0.0 }
 0x121   : > { %v925_v62 = vmax.f32 %v803_v59, 0.0 }
 0x123   : > { %v959_v63 = vpack.c.bf16 %v925_v62, %v924_v61 }
 0x124   : > { %v807_v0 = vpop.f32.mrb[32].mxu0 }
 0x125   : > { %v808_v2 = vadd.f32 %v4431_v29, %v807_v0  ;;  %v3659_v14 = vpop.f32.mrb[33].mxu0  ;;  %3742 = vmatmul.mubr.msk.bf16.gmra.mrb[28].mxu1 %vm996_vm3, %v959_v63 }
 0x126   : > { %v810_v16 = vpop.f32.mrb[34].mxu0  ;;  %3745 = vmatprep.mubr.msk.bf16.mxu1 %vm4165_vm1, %v4164_v1 }
 0x127   : > { %v811_v18 = vadd.f32 %v4431_v29, %v810_v16  ;;  %v3660_v19 = vpop.f32.mrb[35].mxu0  ;;  %v926_v26 = vmax.f32 %v808_v2, 0.0 }
 0x129   : > { %v927_v28 = vmax.f32 %v811_v18, 0.0 }
 0x12b   : > { %v960_v30 = vpack.c.bf16 %v927_v28, %v926_v26 }
 0x12c   : > { %v815_v31 = vpop.f32.mrb[36].mxu0 }
 0x12d   : > { %v816_v32 = vadd.f32 %v4431_v29, %v815_v31  ;;  %v3663_v33 = vpop.f32.mrb[37].mxu0  ;;  %3746 = vmatmul.mubr.msk.bf16.gmra.mrb[32].mxu1 %vm996_vm3, %v960_v30 }
 0x12e   : > { %v818_v34 = vpop.f32.mrb[38].mxu0  ;;  %3749 = vmatprep.mubr.msk.bf16.mxu1 %vm4165_vm1, %v4164_v1 }
 0x12f   : > { %v819_v35 = vadd.f32 %v4431_v29, %v818_v34  ;;  %v3664_v36 = vpop.f32.mrb[39].mxu0  ;;  %v928_v37 = vmax.f32 %v816_v32, 0.0  ;;  %v3925_v32 = vld [vmem:[%s5270_s9 + $0x4] ss:$8 sps:$4 sm:$0xff]  }
 0x130   : > { %2250 = vmatprep.subr.bf16.mxu0 %v3925_v32 }
 0x131   : > { %v929_v38 = vmax.f32 %v819_v35, 0.0 }
 0x133   : > { %v961_v39 = vpack.c.bf16 %v929_v38, %v928_v37 }
 0x134   : > { %v823_v41 = vpop.f32.mrb[40].mxu0 }
 0x135   : > { %v824_v42 = vadd.f32 %v4431_v29, %v823_v41  ;;  %v3667_v43 = vpop.f32.mrb[41].mxu0  ;;  %3750 = vmatmul.mubr.msk.bf16.gmra.mrb[36].mxu1 %vm996_vm3, %v961_v39 }
 0x136   : > { %v826_v44 = vpop.f32.mrb[42].mxu0  ;;  %3753 = vmatprep.mubr.msk.bf16.mxu1 %vm4165_vm1, %v4164_v1 }
 0x137   : > { %v827_v45 = vadd.f32 %v4431_v29, %v826_v44  ;;  %v3668_v46 = vpop.f32.mrb[43].mxu0  ;;  %v930_v47 = vmax.f32 %v824_v42, 0.0 }
 0x139   : > { %v931_v48 = vmax.f32 %v827_v45, 0.0 }
 0x13b   : > { %v962_v49 = vpack.c.bf16 %v931_v48, %v930_v47 }
 0x13c   : > { %v831_v50 = vpop.f32.mrb[44].mxu0 }
 0x13d   : > { %v832_v51 = vadd.f32 %v4431_v29, %v831_v50  ;;  %v3671_v52 = vpop.f32.mrb[45].mxu0  ;;  %3754 = vmatmul.mubr.msk.bf16.gmra.mrb[40].mxu1 %vm996_vm3, %v962_v49 }
 0x13e   : > { %v834_v53 = vpop.f32.mrb[46].mxu0  ;;  %3757 = vmatprep.mubr.msk.bf16.mxu1 %vm4165_vm1, %v4164_v1 }
 0x13f   : > { %v835_v54 = vadd.f32 %v4431_v29, %v834_v53  ;;  %v3672_v55 = vpop.f32.mrb[47].mxu0  ;;  %v932_v56 = vmax.f32 %v832_v51, 0.0 }
 0x141   : > { %v933_v57 = vmax.f32 %v835_v54, 0.0 }
 0x143   : > { %v963_v58 = vpack.c.bf16 %v933_v57, %v932_v56 }
 0x144   : > { %v839_v59 = vpop.f32.mrb[48].mxu0 }
 0x145   : > { %v840_v60 = vadd.f32 %v4431_v29, %v839_v59  ;;  %v3675_v61 = vpop.f32.mrb[49].mxu0  ;;  %3758 = vmatmul.mubr.msk.bf16.gmra.mrb[44].mxu1 %vm996_vm3, %v963_v58 }
 0x146   : > { %v842_v62 = vpop.f32.mrb[50].mxu0  ;;  %3761 = vmatprep.mubr.msk.bf16.mxu1 %vm4165_vm1, %v4164_v1 }
 0x147   : > { %v843_v63 = vadd.f32 %v4431_v29, %v842_v62  ;;  %v3676_v0 = vpop.f32.mrb[51].mxu0  ;;  %v934_v2 = vmax.f32 %v840_v60, 0.0 }
 0x149   : > { %v935_v14 = vmax.f32 %v843_v63, 0.0 }
 0x14b   : > { %v964_v16 = vpack.c.bf16 %v935_v14, %v934_v2 }
 0x14c   : > { %v847_v18 = vpop.f32.mrb[52].mxu0 }
 0x14d   : > { %v848_v19 = vadd.f32 %v4431_v29, %v847_v18  ;;  %v3679_v26 = vpop.f32.mrb[53].mxu0  ;;  %3762 = vmatmul.mubr.msk.bf16.gmra.mrb[48].mxu1 %vm996_vm3, %v964_v16 }
 0x14e   : > { %v850_v28 = vpop.f32.mrb[54].mxu0  ;;  %3765 = vmatprep.mubr.msk.bf16.mxu1 %vm4165_vm1, %v4164_v1 }
 0x14f   : > { %v851_v30 = vadd.f32 %v4431_v29, %v850_v28  ;;  %v3680_v31 = vpop.f32.mrb[55].mxu0  ;;  %v936_v33 = vmax.f32 %v848_v19, 0.0 }
 0x151   : > { %v937_v34 = vmax.f32 %v851_v30, 0.0 }
 0x153   : > { %v965_v35 = vpack.c.bf16 %v937_v34, %v936_v33 }
 0x154   : > { %v855_v36 = vpop.f32.mrb[56].mxu0 }
 0x155   : > { %v856_v37 = vadd.f32 %v4431_v29, %v855_v36  ;;  %v3683_v38 = vpop.f32.mrb[57].mxu0  ;;  %3766 = vmatmul.mubr.msk.bf16.gmra.mrb[52].mxu1 %vm996_vm3, %v965_v35 }
 0x156   : > { %v858_v39 = vpop.f32.mrb[58].mxu0  ;;  %3769 = vmatprep.mubr.msk.bf16.mxu1 %vm4165_vm1, %v4164_v1 }
 0x157   : > { %v859_v41 = vadd.f32 %v4431_v29, %v858_v39  ;;  %v3684_v42 = vpop.f32.mrb[59].mxu0  ;;  %v938_v43 = vmax.f32 %v856_v37, 0.0 }
 0x159   : > { %v939_v44 = vmax.f32 %v859_v41, 0.0 }
 0x15b   : > { %v966_v45 = vpack.c.bf16 %v939_v44, %v938_v43 }
 0x15c   : > { %v863_v46 = vpop.f32.mrb[60].mxu0 }
 0x15d   : > { %v864_v47 = vadd.f32 %v4431_v29, %v863_v46  ;;  %v3687_v48 = vpop.f32.mrb[61].mxu0  ;;  %3770 = vmatmul.mubr.msk.bf16.gmra.mrb[56].mxu1 %vm996_vm3, %v966_v45 }
 0x15e   : > { %v866_v49 = vpop.f32.mrb[62].mxu0  ;;  %3773 = vmatprep.mubr.msk.bf16.mxu1 %vm4165_vm1, %v4164_v1 }
 0x15f   : > { %v867_v50 = vadd.f32 %v4431_v29, %v866_v49  ;;  %v3688_v51 = vpop.f32.mrb[63].mxu0  ;;  %v940_v52 = vmax.f32 %v864_v47, 0.0 }
 0x161   : > { %v941_v53 = vmax.f32 %v867_v50, 0.0 }
 0x163   : > { %v967_v54 = vpack.c.bf16 %v941_v53, %v940_v52 }
 0x164   : > { %v871_v55 = vpop.f32.mrb[64].mxu0 }
 0x165   : > { %v872_v56 = vadd.f32 %v4431_v29, %v871_v55  ;;  %v3691_v57 = vpop.f32.mrb[65].mxu0  ;;  %3774 = vmatmul.mubr.msk.bf16.gmra.mrb[60].mxu1 %vm996_vm3, %v967_v54 }
 0x166   : > { %v874_v58 = vpop.f32.mrb[66].mxu0  ;;  %3777 = vmatprep.mubr.msk.bf16.mxu1 %vm4165_vm1, %v4164_v1 }
 0x167   : > { %v875_v59 = vadd.f32 %v4431_v29, %v874_v58  ;;  %v3692_v60 = vpop.f32.mrb[67].mxu0  ;;  %v942_v61 = vmax.f32 %v872_v56, 0.0 }
 0x169   : > { %v943_v62 = vmax.f32 %v875_v59, 0.0 }
 0x16b   : > { %v968_v63 = vpack.c.bf16 %v943_v62, %v942_v61 }
 0x16c   : > { %v879_v0 = vpop.f32.mrb[68].mxu0 }
 0x16d   : > { %v880_v2 = vadd.f32 %v4431_v29, %v879_v0  ;;  %v3695_v14 = vpop.f32.mrb[69].mxu0  ;;  %3778 = vmatmul.mubr.msk.bf16.gmra.mrb[64].mxu1 %vm996_vm3, %v968_v63  ;;  %v3928_v63 = vld [vmem:[%s5270_s9 + $0x14] ss:$8 sps:$4 sm:$0xff]  }
 0x16e   : > { %v882_v16 = vpop.f32.mrb[70].mxu0  ;;  %3781 = vmatprep.mubr.msk.bf16.mxu1 %vm4165_vm1, %v4164_v1 }
 0x16f   : > { %v883_v18 = vadd.f32 %v4431_v29, %v882_v16  ;;  %v3696_v19 = vpop.f32.mrb[71].mxu0  ;;  %v944_v26 = vmax.f32 %v880_v2, 0.0 }
 0x171   : > { %v945_v28 = vmax.f32 %v883_v18, 0.0 }
 0x173   : > { %v969_v30 = vpack.c.bf16 %v945_v28, %v944_v26  ;;  %v3931_v26 = vld [vmem:[%s5270_s9 + $0x24] ss:$8 sps:$4 sm:$0xff]  }
 0x174   : > { %v887_v31 = vpop.f32.mrb[72].mxu0 }
 0x175   : > { %v888_v32 = vadd.f32 %v4431_v29, %v887_v31  ;;  %v3699_v33 = vpop.f32.mrb[73].mxu0  ;;  %3782 = vmatmul.mubr.msk.bf16.gmra.mrb[68].mxu1 %vm996_vm3, %v969_v30  ;;  %v3929_v31 = vld [vmem:[%s5270_s9 + $0x20] ss:$8 sps:$4 sm:$0xff]  }
 0x176   : > { %v890_v34 = vpop.f32.mrb[74].mxu0  ;;  %3785 = vmatprep.mubr.msk.bf16.mxu1 %vm4165_vm1, %v4164_v1  ;;  %v3934_v33 = vld [vmem:[%s5270_s9 + $0x34] ss:$8 sps:$4 sm:$0xff]  }
 0x177   : > { %v891_v35 = vadd.f32 %v4431_v29, %v890_v34  ;;  %v3700_v36 = vpop.f32.mrb[75].mxu0  ;;  %v946_v37 = vmax.f32 %v888_v32, 0.0 }
 0x179   : > { %v947_v38 = vmax.f32 %v891_v35, 0.0 }
 0x17b   : > { %v970_v39 = vpack.c.bf16 %v947_v38, %v946_v37  ;;  %v3932_v37 = vld [vmem:[%s5270_s9 + $0x30] ss:$8 sps:$4 sm:$0xff]  }
 0x17c   : > { %v895_v41 = vpop.f32.mrb[76].mxu0 }
 0x17d   : > { %v896_v42 = vadd.f32 %v4431_v29, %v895_v41  ;;  %v3703_v43 = vpop.f32.mrb[77].mxu0  ;;  %3786 = vmatmul.mubr.msk.bf16.gmra.mrb[72].mxu1 %vm996_vm3, %v970_v39  ;;  %v3937_v41 = vld [vmem:[%s5270_s9 + $0x44] ss:$8 sps:$4 sm:$0xff]  }
 0x17e   : > { %v898_v44 = vpop.f32.mrb[78].mxu0  ;;  %3789 = vmatprep.mubr.msk.bf16.mxu1 %vm4165_vm1, %v4164_v1 }
 0x17f   : > { %v899_v45 = vadd.f32 %v4431_v29, %v898_v44  ;;  %v3704_v46 = vpop.f32.mrb[79].mxu0  ;;  %v948_v47 = vmax.f32 %v896_v42, 0.0  ;;  %v3935_v44 = vld [vmem:[%s5270_s9 + $0x40] ss:$8 sps:$4 sm:$0xff]  }
 0x180   : > { %v3940_v46 = vld [vmem:[%s5270_s9 + $0x54] ss:$8 sps:$4 sm:$0xff]  }
 0x181   : > { %v949_v48 = vmax.f32 %v899_v45, 0.0 }
 0x183   : > { %v971_v49 = vpack.c.bf16 %v949_v48, %v948_v47 }
 0x184   : > { %v903_v50 = vpop.f32.mrb[80].mxu0 }
 0x185   : > { %v904_v51 = vadd.f32 %v4431_v29, %v903_v50  ;;  %v3707_v52 = vpop.f32.mrb[81].mxu0  ;;  %3790 = vmatmul.mubr.msk.bf16.gmra.mrb[76].mxu1 %vm996_vm3, %v971_v49  ;;  %v3938_v50 = vld [vmem:[%s5270_s9 + $0x50] ss:$8 sps:$4 sm:$0xff]  }
 0x186   : > { %v906_v53 = vpop.f32.mrb[82].mxu0  ;;  %3793 = vmatprep.mubr.msk.bf16.mxu1 %vm4165_vm1, %v4164_v1 }
 0x187   : > { %v907_v54 = vadd.f32 %v4431_v29, %v906_v53  ;;  %v3708_v55 = vpop.f32.mrb[83].mxu0  ;;  %v950_v56 = vmax.f32 %v904_v51, 0.0  ;;  %v3943_v53 = vld [vmem:[%s5270_s9 + $0x64] ss:$8 sps:$4 sm:$0xff]  }
 0x189   : > { %v951_v57 = vmax.f32 %v907_v54, 0.0 }
 0x18b   : > { %v972_v58 = vpack.c.bf16 %v951_v57, %v950_v56  ;;  %v3941_v56 = vld [vmem:[%s5270_s9 + $0x60] ss:$8 sps:$4 sm:$0xff]  }
 0x18d   : > { %3794 = vmatmul.mubr.msk.bf16.gmra.mrb[80].mxu1 %vm996_vm3, %v972_v58  ;;  %v3946_v58 = vld [vmem:[%s5270_s9 + $0x74] ss:$8 sps:$4 sm:$0xff]  }
 0x18e   : > { %1709 = vmatprep.mubr.bf16.mxu1 %v4166_v40 }
 0x195   : > { %3441 = vmatmul.mubr.msk.bf16.vlgmr.msra.gmra.mrb[84].mxu1 %vm641_vm2, %v4270_v3  ;;  %v4565_v3 = vld [vmem:[%s5265_s4] ss:$0 sm:$0xff] }
 0x196   : > { %1719 = vmatprep.mubr.bf16.mxu1 %v4166_v40 }
 0x19d   : > { %3442 = vmatmul.mubr.msk.bf16.gmra.mrb[88].mxu1 %vm641_vm2, %v4277_v4 }
 0x19e   : > { %1729 = vmatprep.mubr.bf16.mxu1 %v4166_v40 }
 0x1a5   : > { %3443 = vmatmul.mubr.msk.bf16.gmra.mrb[92].mxu1 %vm641_vm2, %v4284_v5 }
 0x1a6   : > { %1739 = vmatprep.mubr.bf16.mxu1 %v4166_v40 }
 0x1ad   : > { %3444 = vmatmul.mubr.msk.bf16.gmra.mrb[96].mxu1 %vm641_vm2, %v4291_v6 }
 0x1ae   : > { %1749 = vmatprep.mubr.bf16.mxu1 %v4166_v40 }
 0x1b5   : > { %3445 = vmatmul.mubr.msk.bf16.gmra.mrb[100].mxu1 %vm641_vm2, %v4298_v7 }
 0x1b6   : > { %1759 = vmatprep.mubr.bf16.mxu1 %v4166_v40 }
 0x1bd   : > { %3446 = vmatmul.mubr.msk.bf16.gmra.mrb[104].mxu1 %vm641_vm2, %v4305_v8  ;;  %v3923_v8 = vld [vmem:[%s5270_s9] ss:$8 sps:$4 sm:$0xff]  }
 0x1be   : > { %1769 = vmatprep.mubr.bf16.mxu1 %v4166_v40 }
 0x1c0   : > { %v1094_v4 = vpop.f32.mrb[0].mxu1 }
 0x1c1   : > { %v1095_v5 = vadd.f32 %v4565_v3, %v1094_v4  ;;  %v3715_v6 = vpop.f32.mrb[1].mxu1 }
 0x1c2   : > { %v1097_v29 = vpop.f32.mrb[2].mxu1 }
 0x1c3   : > { %v1098_v59 = vadd.f32 %v4565_v3, %v1097_v29  ;;  %v3716_v7 = vpop.f32.mrb[3].mxu1  ;;  %v1261_v60 = vmax.f32 %v1095_v5, 0.0  ;;  %v3944_v29 = vld [vmem:[%s5270_s9 + $0x70] ss:$8 sps:$4 sm:$0xff]  }
 0x1c5   : > { %v1262_v61 = vmax.f32 %v1098_v59, 0.0  ;;  %3447 = vmatmul.mubr.msk.bf16.gmra.mrb[108].mxu1 %vm641_vm2, %v4312_v9  ;;  %v3926_v9 = vld [vmem:[%s5270_s9 + $0x10] ss:$8 sps:$4 sm:$0xff]  }
 0x1c6   : > { %1779 = vmatprep.mubr.bf16.mxu1 %v4166_v40 }
 0x1c7   : > { %v1303_v62 = vpack.c.bf16 %v1262_v61, %v1261_v60  ;;  %v3949_v60 = vld [vmem:[%s5270_s9 + $0x84] ss:$8 sps:$4 sm:$0xff]  }
 0x1c8   : > { %v1102_v0 = vpop.f32.mrb[4].mxu1 }
 0x1c9   : > { %v1103_v2 = vadd.f32 %v4565_v3, %v1102_v0  ;;  %v3719_v14 = vpop.f32.mrb[5].mxu1  ;;  %3802 = vmatmul.mubr.msk.bf16.vlgmr.msra.gmra.mrb[84].mxu0 %vm996_vm3, %v1303_v62  ;;  %v3947_v62 = vld [vmem:[%s5270_s9 + $0x80] ss:$8 sps:$4 sm:$0xff]   ;;  %v3952_v0 = vld [vmem:[%s5270_s9 + $0x94] ss:$8 sps:$4 sm:$0xff]  }
 0x1ca   : > { %v1105_v16 = vpop.f32.mrb[6].mxu1  ;;  %2251 = vmatpush1.bf16.msra.mxu0 %v3923_v8  ;;  %3805 = vmatprep.mubr.msk.bf16.mxu0 %vm4165_vm1, %v4164_v1 }
 0x1cb   : > { %v1106_v18 = vadd.f32 %v4565_v3, %v1105_v16  ;;  %v3720_v19 = vpop.f32.mrb[7].mxu1  ;;  %2252 = vmatprep.subr.bf16.mxu0 %v3928_v63  ;;  %v1263_v28 = vmax.f32 %v1103_v2, 0.0 }
 0x1cd   : > { %v1264_v30 = vmax.f32 %v1106_v18, 0.0  ;;  %3448 = vmatmul.mubr.msk.bf16.gmra.mrb[112].mxu1 %vm641_vm2, %v4319_v10 }
 0x1ce   : > { %1789 = vmatprep.mubr.bf16.mxu1 %v4166_v40  ;;  %2253 = vmatpush1.bf16.msra.mxu0 %v3926_v9  ;;  %v3950_v9 = vld [vmem:[%s5270_s9 + $0x90] ss:$8 sps:$4 sm:$0xff]  }
 0x1cf   : > { %v1304_v32 = vpack.c.bf16 %v1264_v30, %v1263_v28  ;;  %2254 = vmatprep.subr.bf16.mxu0 %v3931_v26  ;;  %v3955_v26 = vld [vmem:[%s5270_s9 + $0xa4] ss:$8 sps:$4 sm:$0xff]  }
 0x1d0   : > { %v1110_v34 = vpop.f32.mrb[8].mxu1 }
 0x1d1   : > { %v1111_v35 = vadd.f32 %v4565_v3, %v1110_v34  ;;  %v3723_v36 = vpop.f32.mrb[9].mxu1  ;;  %3806 = vmatmul.mubr.msk.bf16.gmra.mrb[88].mxu0 %vm996_vm3, %v1304_v32 }
 0x1d2   : > { %v1113_v10 = vpop.f32.mrb[10].mxu1  ;;  %3809 = vmatprep.mubr.msk.bf16.mxu0 %vm4165_vm1, %v4164_v1  ;;  %2255 = vmatpush1.bf16.msra.mxu0 %v3929_v31  ;;  %v3953_v31 = vld [vmem:[%s5270_s9 + $0xa0] ss:$8 sps:$4 sm:$0xff]  }
 0x1d3   : > { %v1114_v38 = vadd.f32 %v4565_v3, %v1113_v10  ;;  %v3724_v39 = vpop.f32.mrb[11].mxu1  ;;  %2256 = vmatprep.subr.bf16.mxu0 %v3934_v33  ;;  %v1265_v42 = vmax.f32 %v1111_v35, 0.0  ;;  %v3958_v33 = vld [vmem:[%s5270_s9 + $0xb4] ss:$8 sps:$4 sm:$0xff]   ;;  %v3956_v10 = vld [vmem:[%s5270_s9 + $0xb0] ss:$8 sps:$4 sm:$0xff]  }
 0x1d4   : > { %v3961_v39 = vld [vmem:[%s5270_s9 + $0xc4] ss:$8 sps:$4 sm:$0xff]  }
 0x1d5   : > { %v1266_v43 = vmax.f32 %v1114_v38, 0.0  ;;  %3449 = vmatmul.mubr.msk.bf16.gmra.mrb[116].mxu1 %vm641_vm2, %v4326_v11 }
 0x1d6   : > { %1799 = vmatprep.mubr.bf16.mxu1 %v4166_v40  ;;  %2257 = vmatpush1.bf16.msra.mxu0 %v3932_v37 }
 0x1d7   : > { %v1305_v45 = vpack.c.bf16 %v1266_v43, %v1265_v42  ;;  %2258 = vmatprep.subr.bf16.mxu0 %v3937_v41  ;;  %v3959_v43 = vld [vmem:[%s5270_s9 + $0xc0] ss:$8 sps:$4 sm:$0xff]  }
 0x1d8   : > { %v1118_v47 = vpop.f32.mrb[12].mxu1 }
 0x1d9   : > { %v1119_v48 = vadd.f32 %v4565_v3, %v1118_v47  ;;  %v3727_v49 = vpop.f32.mrb[13].mxu1  ;;  %3810 = vmatmul.mubr.msk.bf16.gmra.mrb[92].mxu0 %vm996_vm3, %v1305_v45  ;;  %v3964_v45 = vld [vmem:[%s5270_s9 + $0xd4] ss:$8 sps:$4 sm:$0xff]  }
 0x1da   : > { %v1121_v11 = vpop.f32.mrb[14].mxu1  ;;  %3813 = vmatprep.mubr.msk.bf16.mxu0 %vm4165_vm1, %v4164_v1  ;;  %2259 = vmatpush1.bf16.msra.mxu0 %v3935_v44  ;;  %v3962_v49 = vld [vmem:[%s5270_s9 + $0xd0] ss:$8 sps:$4 sm:$0xff]  }
 0x1db   : > { %v1122_v51 = vadd.f32 %v4565_v3, %v1121_v11  ;;  %v3728_v52 = vpop.f32.mrb[15].mxu1  ;;  %2260 = vmatprep.subr.bf16.mxu0 %v3940_v46  ;;  %v1267_v54 = vmax.f32 %v1119_v48, 0.0 }
 0x1dd   : > { %v1268_v55 = vmax.f32 %v1122_v51, 0.0  ;;  %3450 = vmatmul.mubr.msk.bf16.gmra.mrb[120].mxu1 %vm641_vm2, %v4333_v12  ;;  %v3967_v51 = vld [vmem:[%s5270_s9 + $0xe4] ss:$8 sps:$4 sm:$0xff]  }
 0x1de   : > { %1809 = vmatprep.mubr.bf16.mxu1 %v4166_v40  ;;  %2261 = vmatpush1.bf16.msra.mxu0 %v3938_v50 }
 0x1df   : > { %v1306_v57 = vpack.c.bf16 %v1268_v55, %v1267_v54  ;;  %2262 = vmatprep.subr.bf16.mxu0 %v3943_v53  ;;  %v3965_v54 = vld [vmem:[%s5270_s9 + $0xe0] ss:$8 sps:$4 sm:$0xff]  }
 0x1e0   : > { %v1126_v4 = vpop.f32.mrb[16].mxu1 }
 0x1e1   : > { %v1127_v5 = vadd.f32 %v4565_v3, %v1126_v4  ;;  %v3731_v6 = vpop.f32.mrb[17].mxu1  ;;  %3814 = vmatmul.mubr.msk.bf16.gmra.mrb[96].mxu0 %vm996_vm3, %v1306_v57 }
 0x1e2   : > { %v1129_v12 = vpop.f32.mrb[18].mxu1  ;;  %3817 = vmatprep.mubr.msk.bf16.mxu0 %vm4165_vm1, %v4164_v1  ;;  %2263 = vmatpush1.bf16.msra.mxu0 %v3941_v56  ;;  %v3970_v56 = vld [vmem:[%s5270_s9 + $0xf4] ss:$8 sps:$4 sm:$0xff]  }
 0x1e3   : > { %v1130_v59 = vadd.f32 %v4565_v3, %v1129_v12  ;;  %v3732_v7 = vpop.f32.mrb[19].mxu1  ;;  %2264 = vmatprep.subr.bf16.mxu0 %v3946_v58  ;;  %v1269_v61 = vmax.f32 %v1127_v5, 0.0  ;;  %v3968_v5 = vld [vmem:[%s5270_s9 + $0xf0] ss:$8 sps:$4 sm:$0xff]  }
 0x1e5   : > { %v1270_v8 = vmax.f32 %v1130_v59, 0.0  ;;  %3451 = vmatmul.mubr.msk.bf16.gmra.mrb[124].mxu1 %vm641_vm2, %v4340_v13 }
 0x1e6   : > { %1819 = vmatprep.mubr.bf16.mxu1 %v4166_v40  ;;  %2265 = vmatpush1.bf16.msra.mxu0 %v3944_v29 }
 0x1e7   : > { %v1307_v63 = vpack.c.bf16 %v1270_v8, %v1269_v61  ;;  %2266 = vmatprep.subr.bf16.mxu0 %v3949_v60 }
 0x1e8   : > { %v1134_v2 = vpop.f32.mrb[20].mxu1 }
 0x1e9   : > { %v1135_v14 = vadd.f32 %v4565_v3, %v1134_v2  ;;  %v3735_v16 = vpop.f32.mrb[21].mxu1  ;;  %3818 = vmatmul.mubr.msk.bf16.gmra.mrb[100].mxu0 %vm996_vm3, %v1307_v63 }
 0x1ea   : > { %v1137_v13 = vpop.f32.mrb[22].mxu1  ;;  %3821 = vmatprep.mubr.msk.bf16.mxu0 %vm4165_vm1, %v4164_v1  ;;  %2267 = vmatpush1.bf16.msra.mxu0 %v3947_v62 }
 0x1eb   : > { %v1138_v18 = vadd.f32 %v4565_v3, %v1137_v13  ;;  %v3736_v19 = vpop.f32.mrb[23].mxu1  ;;  %2268 = vmatprep.subr.bf16.mxu0 %v3952_v0  ;;  %v1271_v28 = vmax.f32 %v1135_v14, 0.0 }
 0x1ed   : > { %v1272_v30 = vmax.f32 %v1138_v18, 0.0  ;;  %3452 = vmatmul.mubr.msk.bf16.gmra.mrb[128].mxu1 %vm641_vm2, %v4350_v15 }
 0x1ee   : > { %1829 = vmatprep.mubr.bf16.mxu1 %v4166_v40  ;;  %2269 = vmatpush1.bf16.msra.mxu0 %v3950_v9 }
 0x1ef   : > { %v1308_v32 = vpack.c.bf16 %v1272_v30, %v1271_v28  ;;  %2270 = vmatprep.subr.bf16.mxu0 %v3955_v26 }
 0x1f0   : > { %v1142_v34 = vpop.f32.mrb[24].mxu1 }
 0x1f1   : > { %v1143_v35 = vadd.f32 %v4565_v3, %v1142_v34  ;;  %v3739_v36 = vpop.f32.mrb[25].mxu1  ;;  %3822 = vmatmul.mubr.msk.bf16.gmra.mrb[104].mxu0 %vm996_vm3, %v1308_v32 }
 0x1f2   : > { %v1145_v15 = vpop.f32.mrb[26].mxu1  ;;  %3825 = vmatprep.mubr.msk.bf16.mxu0 %vm4165_vm1, %v4164_v1  ;;  %2271 = vmatpush1.bf16.msra.mxu0 %v3953_v31 }
 0x1f3   : > { %v1146_v37 = vadd.f32 %v4565_v3, %v1145_v15  ;;  %v3740_v38 = vpop.f32.mrb[27].mxu1  ;;  %2272 = vmatprep.subr.bf16.mxu0 %v3958_v33  ;;  %v1273_v41 = vmax.f32 %v1143_v35, 0.0 }
 0x1f5   : > { %v1274_v42 = vmax.f32 %v1146_v37, 0.0  ;;  %3453 = vmatmul.mubr.msk.bf16.gmra.mrb[132].mxu1 %vm641_vm2, %v4361_v17 }
 0x1f6   : > { %1839 = vmatprep.mubr.bf16.mxu1 %v4166_v40  ;;  %2273 = vmatpush1.bf16.msra.mxu0 %v3956_v10 }
 0x1f7   : > { %v1309_v44 = vpack.c.bf16 %v1274_v42, %v1273_v41  ;;  %2274 = vmatprep.subr.bf16.mxu0 %v3961_v39 }
 0x1f8   : > { %v1150_v46 = vpop.f32.mrb[28].mxu1 }
 0x1f9   : > { %v1151_v47 = vadd.f32 %v4565_v3, %v1150_v46  ;;  %v3743_v48 = vpop.f32.mrb[29].mxu1  ;;  %3826 = vmatmul.mubr.msk.bf16.gmra.mrb[108].mxu0 %vm996_vm3, %v1309_v44 }
 0x1fa   : > { %v1153_v17 = vpop.f32.mrb[30].mxu1  ;;  %3829 = vmatprep.mubr.msk.bf16.mxu0 %vm4165_vm1, %v4164_v1  ;;  %2275 = vmatpush1.bf16.msra.mxu0 %v3959_v43 }
 0x1fb   : > { %v1154_v11 = vadd.f32 %v4565_v3, %v1153_v17  ;;  %v3744_v50 = vpop.f32.mrb[31].mxu1  ;;  %2276 = vmatprep.subr.bf16.mxu0 %v3964_v45  ;;  %v1275_v52 = vmax.f32 %v1151_v47, 0.0 }
 0x1fd   : > { %v1276_v53 = vmax.f32 %v1154_v11, 0.0  ;;  %3454 = vmatmul.mubr.msk.bf16.gmra.mrb[136].mxu1 %vm641_vm2, %v4372_v20 }
 0x1fe   : > { %1849 = vmatprep.mubr.bf16.mxu1 %v4166_v40  ;;  %2277 = vmatpush1.bf16.msra.mxu0 %v3962_v49 }
 0x1ff   : > { %v1310_v55 = vpack.c.bf16 %v1276_v53, %v1275_v52  ;;  %2278 = vmatprep.subr.bf16.mxu0 %v3967_v51 }
 0x200   : > { %v1158_v57 = vpop.f32.mrb[32].mxu1 }
 0x201   : > { %v1159_v58 = vadd.f32 %v4565_v3, %v1158_v57  ;;  %v3747_v4 = vpop.f32.mrb[33].mxu1  ;;  %3830 = vmatmul.mubr.msk.bf16.gmra.mrb[112].mxu0 %vm996_vm3, %v1310_v55 }
 0x202   : > { %v1161_v20 = vpop.f32.mrb[34].mxu1  ;;  %3833 = vmatprep.mubr.msk.bf16.mxu0 %vm4165_vm1, %v4164_v1  ;;  %2279 = vmatpush1.bf16.msra.mxu0 %v3965_v54 }
 0x203   : > { %v1162_v6 = vadd.f32 %v4565_v3, %v1161_v20  ;;  %v3748_v12 = vpop.f32.mrb[35].mxu1  ;;  %2280 = vmatprep.subr.bf16.mxu0 %v3970_v56  ;;  %v1277_v29 = vmax.f32 %v1159_v58, 0.0  ;;  %v4155_v20 = vld [vmem:[%s4267_s21 + $0xa0] sm:$0xff]  }
 0x204   : > { %v3972_v12 = vld [vmem:[%s5272_s11 + $0x8] sm:$0xff]  }
 0x205   : > { %v1278_v59 = vmax.f32 %v1162_v6, 0.0  ;;  %3455 = vmatmul.mubr.msk.bf16.gmra.mrb[140].mxu1 %vm641_vm2, %v4379_v21 }
 0x206   : > { %1859 = vmatprep.mubr.bf16.mxu1 %v4166_v40  ;;  %2281 = vmatpush1.bf16.msra.mxu0 %v3968_v5 }
 0x207   : > { %v1311_v7 = vpack.c.bf16 %v1278_v59, %v1277_v29 }
 0x208   : > { %v1166_v60 = vpop.f32.mrb[36].mxu1 }
 0x209   : > { %v1167_v61 = vadd.f32 %v4565_v3, %v1166_v60  ;;  %v3751_v8 = vpop.f32.mrb[37].mxu1  ;;  %3834 = vmatmul.mubr.msk.bf16.gmra.mrb[116].mxu0 %vm996_vm3, %v1311_v7 }
 0x20a   : > { %v1169_v62 = vpop.f32.mrb[38].mxu1  ;;  %3837 = vmatprep.mubr.msk.bf16.mxu0 %vm4165_vm1, %v4164_v1 }
 0x20b   : > { %v1170_v63 = vadd.f32 %v4565_v3, %v1169_v62  ;;  %v3752_v0 = vpop.f32.mrb[39].mxu1  ;;  %v1279_v2 = vmax.f32 %v1167_v61, 0.0 }
 0x20d   : > { %v1280_v14 = vmax.f32 %v1170_v63, 0.0  ;;  %3456 = vmatmul.mubr.msk.bf16.gmra.mrb[144].mxu1 %vm641_vm2, %v4386_v22 }
 0x20e   : > { %1869 = vmatprep.mubr.bf16.mxu1 %v4166_v40 }
 0x20f   : > { %v1312_v21 = vpack.c.bf16 %v1280_v14, %v1279_v2 }
 0x210   : > { %v1174_v16 = vpop.f32.mrb[40].mxu1 }
 0x211   : > { %v1175_v13 = vadd.f32 %v4565_v3, %v1174_v16  ;;  %v3755_v9 = vpop.f32.mrb[41].mxu1  ;;  %3838 = vmatmul.mubr.msk.bf16.gmra.mrb[120].mxu0 %vm996_vm3, %v1312_v21  ;;  %v3973_v21 = vld [vmem:[%s5272_s11 + $0x10] sm:$0xff]  }
 0x212   : > { %v1177_v18 = vpop.f32.mrb[42].mxu1  ;;  %3841 = vmatprep.mubr.msk.bf16.mxu0 %vm4165_vm1, %v4164_v1 }
 0x213   : > { %v1178_v19 = vadd.f32 %v4565_v3, %v1177_v18  ;;  %v3756_v26 = vpop.f32.mrb[43].mxu1  ;;  %v1281_v28 = vmax.f32 %v1175_v13, 0.0 }
 0x215   : > { %v1282_v30 = vmax.f32 %v1178_v19, 0.0  ;;  %3457 = vmatmul.mubr.msk.bf16.gmra.mrb[148].mxu1 %vm641_vm2, %v4393_v23 }
 0x216   : > { %1879 = vmatprep.mubr.bf16.mxu1 %v4166_v40 }
 0x217   : > { %v1313_v22 = vpack.c.bf16 %v1282_v30, %v1281_v28 }
 0x218   : > { %v1182_v31 = vpop.f32.mrb[44].mxu1 }
 0x219   : > { %v1183_v32 = vadd.f32 %v4565_v3, %v1182_v31  ;;  %v3759_v33 = vpop.f32.mrb[45].mxu1  ;;  %3842 = vmatmul.mubr.msk.bf16.gmra.mrb[124].mxu0 %vm996_vm3, %v1313_v22 }
 0x21a   : > { %v1185_v34 = vpop.f32.mrb[46].mxu1  ;;  %3845 = vmatprep.mubr.msk.bf16.mxu0 %vm4165_vm1, %v4164_v1 }
 0x21b   : > { %v1186_v35 = vadd.f32 %v4565_v3, %v1185_v34  ;;  %v3760_v36 = vpop.f32.mrb[47].mxu1  ;;  %v1283_v15 = vmax.f32 %v1183_v32, 0.0  ;;  %v3974_v34 = vld [vmem:[%s5272_s11 + $0x18] sm:$0xff]  }
 0x21d   : > { %v1284_v10 = vmax.f32 %v1186_v35, 0.0  ;;  %3458 = vmatmul.mubr.msk.bf16.gmra.mrb[152].mxu1 %vm641_vm2, %v4400_v24 }
 0x21e   : > { %1889 = vmatprep.mubr.bf16.mxu1 %v4166_v40 }
 0x21f   : > { %v1314_v23 = vpack.c.bf16 %v1284_v10, %v1283_v15 }
 0x220   : > { %v1190_v37 = vpop.f32.mrb[48].mxu1 }
 0x221   : > { %v1191_v38 = vadd.f32 %v4565_v3, %v1190_v37  ;;  %v3763_v39 = vpop.f32.mrb[49].mxu1  ;;  %3846 = vmatmul.mubr.msk.bf16.gmra.mrb[128].mxu0 %vm996_vm3, %v1314_v23 }
 0x222   : > { %v1193_v41 = vpop.f32.mrb[50].mxu1  ;;  %3849 = vmatprep.mubr.msk.bf16.mxu0 %vm4165_vm1, %v4164_v1 }
 0x223   : > { %v1194_v42 = vadd.f32 %v4565_v3, %v1193_v41  ;;  %v3764_v43 = vpop.f32.mrb[51].mxu1  ;;  %v1285_v44 = vmax.f32 %v1191_v38, 0.0 }
 0x225   : > { %v1286_v45 = vmax.f32 %v1194_v42, 0.0  ;;  %3459 = vmatmul.mubr.msk.bf16.gmra.mrb[156].mxu1 %vm641_vm2, %v4407_v25  ;;  %v3971_v25 = vld [vmem:[%s5272_s11] sm:$0xff]  }
 0x226   : > { %1899 = vmatprep.mubr.bf16.mxu1 %v4166_v40  ;;  %2755 = vmatpush1.bf16.msra.mxu1 %v3971_v25 }
 0x227   : > { %v1315_v24 = vpack.c.bf16 %v1286_v45, %v1285_v44  ;;  %2756 = vmatprep.subr.bf16.mxu1 %v4166_v40 }
 0x228   : > { %v1198_v46 = vpop.f32.mrb[52].mxu1 }
 0x229   : > { %v1199_v47 = vadd.f32 %v4565_v3, %v1198_v46  ;;  %v3767_v48 = vpop.f32.mrb[53].mxu1  ;;  %3850 = vmatmul.mubr.msk.bf16.gmra.mrb[132].mxu0 %vm996_vm3, %v1315_v24  ;;  %v3975_v24 = vld [vmem:[%s5272_s11 + $0x20] sm:$0xff]  }
 0x22a   : > { %v1201_v17 = vpop.f32.mrb[54].mxu1  ;;  %3853 = vmatprep.mubr.msk.bf16.mxu0 %vm4165_vm1, %v4164_v1  ;;  %2757 = vmatpush1.bf16.msra.mxu1 %v3972_v12  ;;  %v1656_v48 = vlaneseq }
 0x22b   : > { %v1202_v49 = vadd.f32 %v4565_v3, %v1201_v17  ;;  %v3768_v11 = vpop.f32.mrb[55].mxu1  ;;  %v1287_v50 = vmax.f32 %v1199_v47, 0.0  ;;  %2758 = vmatprep.subr.bf16.mxu1 %v4166_v40 }
 0x22d   : > { %v1288_v51 = vmax.f32 %v1202_v49, 0.0  ;;  %3460 = vmatmul.mubr.msk.bf16.gmra.mrb[160].mxu1 %vm641_vm2, %v4417_v27 }
 0x22e   : > { %1909 = vmatprep.mubr.bf16.mxu1 %v4166_v40  ;;  %2759 = vmatpush1.bf16.msra.mxu1 %v3973_v21 }
 0x22f   : > { %v1316_v52 = vpack.c.bf16 %v1288_v51, %v1287_v50  ;;  %2760 = vmatprep.subr.bf16.mxu1 %v4166_v40  ;;  %v4822_v51 = vshrl.u32 %v1656_v48, 7 }
 0x230   : > { %v1206_v53 = vpop.f32.mrb[56].mxu1 }
 0x231   : > { %v1207_v54 = vadd.f32 %v4565_v3, %v1206_v53  ;;  %v3771_v55 = vpop.f32.mrb[57].mxu1  ;;  %3854 = vmatmul.mubr.msk.bf16.gmra.mrb[136].mxu0 %vm996_vm3, %v1316_v52 }
 0x232   : > { %v1209_v56 = vpop.f32.mrb[58].mxu1  ;;  %3857 = vmatprep.mubr.msk.bf16.mxu0 %vm4165_vm1, %v4164_v1  ;;  %2761 = vmatpush1.bf16.msra.mxu1 %v3974_v34 }
 0x233   : > { %v1210_v57 = vadd.f32 %v4565_v3, %v1209_v56  ;;  %v3772_v58 = vpop.f32.mrb[59].mxu1  ;;  %v1289_v27 = vmax.f32 %v1207_v54, 0.0  ;;  %2762 = vmatprep.subr.bf16.mxu1 %v4166_v40  ;;  %v1658_v56 = vsub.s32 0, %v4822_v51 }
 0x235   : > { %v1290_v4 = vmax.f32 %v1210_v57, 0.0  ;;  %3461 = vmatmul.mubr.msk.bf16.gmra.mrb[164].mxu1 %vm641_vm2, %v4155_v20  ;;  %v3976_v57 = vld [vmem:[%s5272_s11 + $0x28] sm:$0xff]  }
 0x236   : > { %2763 = vmatpush1.bf16.msra.mxu1 %v3975_v24 }
 0x237   : > { %v1317_v5 = vpack.c.bf16 %v1290_v4, %v1289_v27  ;;  %2764 = vmatprep.subr.bf16.mxu1 %v4166_v40  ;;  %v1654_v27 = vld [vmem:[%s5269_s8] sm:$0x3]  ;;  %v1662_v4 = vsub.s32 1, %v4822_v51 }
 0x238   : > { %v1214_v6 = vpop.f32.mrb[60].mxu1 }
 0x239   : > { %v1215_v29 = vadd.f32 %v4565_v3, %v1214_v6  ;;  %v3775_v59 = vpop.f32.mrb[61].mxu1  ;;  %3858 = vmatmul.mubr.msk.bf16.gmra.mrb[140].mxu0 %vm996_vm3, %v1317_v5 }
 0x23a   : > { %v1217_v7 = vpop.f32.mrb[62].mxu1  ;;  %3861 = vmatprep.mubr.msk.bf16.mxu0 %vm4165_vm1, %v4164_v1  ;;  %2765 = vmatpush1.bf16.msra.mxu1 %v3976_v57 }
 0x23b   : > { %v1218_v60 = vadd.f32 %v4565_v3, %v1217_v7  ;;  %v3776_v61 = vpop.f32.mrb[63].mxu1  ;;  %v1291_v8 = vmax.f32 %v1215_v29, 0.0  ;;  %2766 = vmatprep.subr.bf16.mxu1 %v4166_v40  ;;  %v4840_v29 = vrot.slane %v1654_v27, %v1658_v56 }
 0x23d   : > { %v1292_v62 = vmax.f32 %v1218_v60, 0.0 }
 0x23f   : > { %v1318_v63 = vpack.c.bf16 %v1292_v62, %v1291_v8 }
 0x240   : > { %v1222_v0 = vpop.f32.mrb[64].mxu1 }
 0x241   : > { %v1223_v2 = vadd.f32 %v4565_v3, %v1222_v0  ;;  %v3779_v14 = vpop.f32.mrb[65].mxu1  ;;  %3862 = vmatmul.mubr.msk.bf16.gmra.mrb[144].mxu0 %vm996_vm3, %v1318_v63  ;;  %v3977_v0 = vld [vmem:[%s5272_s11 + $0x30] sm:$0xff]  }
 0x242   : > { %v1225_v16 = vpop.f32.mrb[66].mxu1  ;;  %3865 = vmatprep.mubr.msk.bf16.mxu0 %vm4165_vm1, %v4164_v1  ;;  %2767 = vmatpush1.bf16.msra.mxu1 %v3977_v0 }
 0x243   : > { %v1226_v13 = vadd.f32 %v4565_v3, %v1225_v16  ;;  %v3780_v9 = vpop.f32.mrb[67].mxu1  ;;  %v1293_v18 = vmax.f32 %v1223_v2, 0.0  ;;  %2768 = vmatprep.subr.bf16.mxu1 %v4166_v40 }
 0x245   : > { %v1294_v19 = vmax.f32 %v1226_v13, 0.0 }
 0x247   : > { %v1319_v26 = vpack.c.bf16 %v1294_v19, %v1293_v18 }
 0x248   : > { %v1230_v28 = vpop.f32.mrb[68].mxu1 }
 0x249   : > { %v1231_v30 = vadd.f32 %v4565_v3, %v1230_v28  ;;  %v3783_v22 = vpop.f32.mrb[69].mxu1  ;;  %3866 = vmatmul.mubr.msk.bf16.gmra.mrb[148].mxu0 %vm996_vm3, %v1319_v26 }
 0x24a   : > { %v1233_v31 = vpop.f32.mrb[70].mxu1  ;;  %3869 = vmatprep.mubr.msk.bf16.mxu0 %vm4165_vm1, %v4164_v1 }
 0x24b   : > { %v1234_v32 = vadd.f32 %v4565_v3, %v1233_v31  ;;  %v3784_v33 = vpop.f32.mrb[71].mxu1  ;;  %v1295_v35 = vmax.f32 %v1231_v30, 0.0 }
 0x24d   : > { %v1296_v36 = vmax.f32 %v1234_v32, 0.0 }
 0x24f   : > { %v1320_v15 = vpack.c.bf16 %v1296_v36, %v1295_v35 }
 0x250   : > { %v1238_v10 = vpop.f32.mrb[72].mxu1 }
 0x251   : > { %v1239_v23 = vadd.f32 %v4565_v3, %v1238_v10  ;;  %v3787_v37 = vpop.f32.mrb[73].mxu1  ;;  %3870 = vmatmul.mubr.msk.bf16.gmra.mrb[152].mxu0 %vm996_vm3, %v1320_v15 }
 0x252   : > { %v1241_v38 = vpop.f32.mrb[74].mxu1  ;;  %3873 = vmatprep.mubr.msk.bf16.mxu0 %vm4165_vm1, %v4164_v1 }
 0x253   : > { %v1242_v39 = vadd.f32 %v4565_v3, %v1241_v38  ;;  %v3788_v41 = vpop.f32.mrb[75].mxu1  ;;  %v1297_v42 = vmax.f32 %v1239_v23, 0.0  ;;  %v3978_v38 = vld [vmem:[%s5272_s11 + $0x38] sm:$0xff]  }
 0x254   : > { %2769 = vmatpush1.bf16.msra.mxu1 %v3978_v38 }
 0x255   : > { %v1298_v43 = vmax.f32 %v1242_v39, 0.0  ;;  %2770 = vmatprep.subr.bf16.mxu1 %v4166_v40 }
 0x257   : > { %v1321_v44 = vpack.c.bf16 %v1298_v43, %v1297_v42 }
 0x258   : > { %v1246_v45 = vpop.f32.mrb[76].mxu1 }
 0x259   : > { %v1247_v46 = vadd.f32 %v4565_v3, %v1246_v45  ;;  %v3791_v47 = vpop.f32.mrb[77].mxu1  ;;  %3874 = vmatmul.mubr.msk.bf16.gmra.mrb[156].mxu0 %vm996_vm3, %v1321_v44 }
 0x25a   : > { %v1249_v17 = vpop.f32.mrb[78].mxu1  ;;  %3877 = vmatprep.mubr.msk.bf16.mxu0 %vm4165_vm1, %v4164_v1 }
 0x25b   : > { %v1250_v49 = vadd.f32 %v4565_v3, %v1249_v17  ;;  %v3792_v11 = vpop.f32.mrb[79].mxu1  ;;  %v1299_v25 = vmax.f32 %v1247_v46, 0.0 }
 0x25d   : > { %v1300_v50 = vmax.f32 %v1250_v49, 0.0 }
 0x25f   : > { %v1322_v52 = vpack.c.bf16 %v1300_v50, %v1299_v25  ;;  %v3979_v50 = vld [vmem:[%s5272_s11 + $0x40] sm:$0xff]  }
 0x260   : > { %v1254_v53 = vpop.f32.mrb[80].mxu1  ;;  %2771 = vmatpush1.bf16.msra.mxu1 %v3979_v50 }
 0x261   : > { %v1255_v54 = vadd.f32 %v4565_v3, %v1254_v53  ;;  %v3795_v55 = vpop.f32.mrb[81].mxu1  ;;  %3878 = vmatmul.mubr.msk.bf16.gmra.mrb[160].mxu0 %vm996_vm3, %v1322_v52  ;;  %2772 = vmatprep.subr.bf16.mxu1 %v4166_v40 }
 0x262   : > { %v1257_v58 = vpop.f32.mrb[82].mxu1  ;;  %3881 = vmatprep.mubr.msk.bf16.mxu0 %vm4165_vm1, %v4164_v1  ;;  %v4844_v1 = vrot.slane %v1654_v27, %v1662_v4 }
 0x263   : > { %v1258_v20 = vadd.f32 %v4565_v3, %v1257_v58  ;;  %v3796_v5 = vpop.f32.mrb[83].mxu1  ;;  %v1301_v6 = vmax.f32 %v1255_v54, 0.0 }
 0x265   : > { %v1302_v12 = vmax.f32 %v1258_v20, 0.0 }
 0x267   : > { %v1323_v59 = vpack.c.bf16 %v1302_v12, %v1301_v6 }
 0x268   : > { %v1711_v7 = vpop.f32.mrb[84].mxu1 }
 0x269   : > { %v1712_v60 = vadd.f32 %v1711_v7, %v4840_v29  ;;  %3882 = vmatmul.mubr.msk.bf16.gmra.mrb[164].mxu0 %vm996_vm3, %v1323_v59  ;;  %v1713_v3 = vpop.f32.mrb[85].mxu1 }
 0x26a   : > { %v1714_v61 = vadd.f32 %v1713_v3, %v4844_v1  ;;  %v1715_v8 = vpop.f32.mrb[86].mxu1 }
 0x26b   : > { %v1716_v62 = vadd.f32 %v1715_v8, %v4840_v29  ;;  %v1717_v63 = vpop.f32.mrb[87].mxu1  ;;  %v1920_v14 = vmax.f32 %v1712_v60, 0.0 }
 0x26c   : > { %v1718_v2 = vadd.f32 %v1717_v63, %v4844_v1  ;;  %v1921_v16 = vmax.f32 %v1714_v61, 0.0 }
 0x26d   : > { %v1922_v21 = vmax.f32 %v1716_v62, 0.0 }
 0x26e   : > { %v1923_v13 = vmax.f32 %v1718_v2, 0.0  ;;  %v3980_v2 = vld [vmem:[%s5272_s11 + $0x48] sm:$0xff]  }
 0x26f   : > { %v2004_v9 = vpack.c.bf16 %v1922_v21, %v1920_v14  ;;  %2773 = vmatpush1.bf16.msra.mxu1 %v3980_v2 }
 0x270   : > { %v2005_v18 = vpack.c.bf16 %v1923_v13, %v1921_v16  ;;  %v1721_v19 = vpop.f32.mrb[88].mxu1  ;;  %2774 = vmatprep.subr.bf16.mxu1 %v4166_v40 }
 0x271   : > { %v1722_v26 = vadd.f32 %v1721_v19, %v4840_v29  ;;  %v1723_v28 = vpop.f32.mrb[89].mxu1 }
 0x272   : > { %v1724_v30 = vadd.f32 %v1723_v28, %v4844_v1  ;;  %v1725_v22 = vpop.f32.mrb[90].mxu1  ;;  %2282 = vmatprep.mubr.bf16.mxu0 %v2005_v18 }
 0x273   : > { %v1726_v31 = vadd.f32 %v1725_v22, %v4840_v29  ;;  %v1727_v32 = vpop.f32.mrb[91].mxu1  ;;  %2283 = vmatmul.mubr.bf16.vlgmr.msra.gmra.mrb[168].mxu0 %v2004_v9  ;;  %v1924_v34 = vmax.f32 %v1722_v26, 0.0 }
 0x274   : > { %v1728_v33 = vadd.f32 %v1727_v32, %v4844_v1  ;;  %v1925_v36 = vmax.f32 %v1724_v30, 0.0  ;;  %v3981_v32 = vld [vmem:[%s5272_s11 + $0x50] sm:$0xff]  }
 0x275   : > { %v1926_v35 = vmax.f32 %v1726_v31, 0.0  ;;  %2775 = vmatpush1.bf16.msra.mxu1 %v3981_v32 }
 0x276   : > { %v1927_v15 = vmax.f32 %v1728_v33, 0.0  ;;  %2776 = vmatprep.subr.bf16.mxu1 %v4166_v40 }
 0x277   : > { %v2006_v10 = vpack.c.bf16 %v1926_v35, %v1924_v34 }
 0x278   : > { %v2007_v23 = vpack.c.bf16 %v1927_v15, %v1925_v36  ;;  %v1731_v37 = vpop.f32.mrb[92].mxu1 }
 0x279   : > { %v1732_v39 = vadd.f32 %v1731_v37, %v4840_v29  ;;  %v1733_v41 = vpop.f32.mrb[93].mxu1 }
 0x27a   : > { %v1734_v42 = vadd.f32 %v1733_v41, %v4844_v1  ;;  %v1735_v43 = vpop.f32.mrb[94].mxu1  ;;  %2292 = vmatprep.mubr.bf16.mxu0 %v2007_v23 }
 0x27b   : > { %v1736_v44 = vadd.f32 %v1735_v43, %v4840_v29  ;;  %v1737_v45 = vpop.f32.mrb[95].mxu1  ;;  %2293 = vmatmul.mubr.bf16.gmra.mrb[172].mxu0 %v2006_v10  ;;  %v1928_v46 = vmax.f32 %v1732_v39, 0.0 }
 0x27c   : > { %v1738_v24 = vadd.f32 %v1737_v45, %v4844_v1  ;;  %v1929_v48 = vmax.f32 %v1734_v42, 0.0  ;;  %v4897_v45 = vld [vmem:[%s5267_s6] ss:$0 sm:$0xff] }
 0x27d   : > { %v1930_v47 = vmax.f32 %v1736_v44, 0.0 }
 0x27e   : > { %v1931_v17 = vmax.f32 %v1738_v24, 0.0 }
 0x27f   : > { %v2008_v49 = vpack.c.bf16 %v1930_v47, %v1928_v46 }
 0x280   : > { %v2009_v11 = vpack.c.bf16 %v1931_v17, %v1929_v48  ;;  %v1741_v25 = vpop.f32.mrb[96].mxu1 }
 0x281   : > { %v1742_v52 = vadd.f32 %v1741_v25, %v4840_v29  ;;  %v1743_v53 = vpop.f32.mrb[97].mxu1 }
 0x282   : > { %v1744_v54 = vadd.f32 %v1743_v53, %v4844_v1  ;;  %v1745_v55 = vpop.f32.mrb[98].mxu1  ;;  %2302 = vmatprep.mubr.bf16.mxu0 %v2009_v11 }
 0x283   : > { %v1746_v57 = vadd.f32 %v1745_v55, %v4840_v29  ;;  %v1747_v58 = vpop.f32.mrb[99].mxu1  ;;  %2303 = vmatmul.mubr.bf16.gmra.mrb[176].mxu0 %v2008_v49  ;;  %v1932_v20 = vmax.f32 %v1742_v52, 0.0 }
 0x284   : > { %v1748_v27 = vadd.f32 %v1747_v58, %v4844_v1  ;;  %v1933_v6 = vmax.f32 %v1744_v54, 0.0  ;;  %v3982_v58 = vld [vmem:[%s5272_s11 + $0x58] sm:$0xff]  }
 0x285   : > { %v1934_v5 = vmax.f32 %v1746_v57, 0.0  ;;  %2777 = vmatpush1.bf16.msra.mxu1 %v3982_v58 }
 0x286   : > { %v1935_v12 = vmax.f32 %v1748_v27, 0.0  ;;  %2778 = vmatprep.subr.bf16.mxu1 %v4166_v40 }
 0x287   : > { %v2010_v59 = vpack.c.bf16 %v1934_v5, %v1932_v20 }
 0x288   : > { %v2011_v7 = vpack.c.bf16 %v1935_v12, %v1933_v6  ;;  %v1751_v60 = vpop.f32.mrb[100].mxu1 }
 0x289   : > { %v1752_v3 = vadd.f32 %v1751_v60, %v4840_v29  ;;  %v1753_v61 = vpop.f32.mrb[101].mxu1 }
 0x28a   : > { %v1754_v8 = vadd.f32 %v1753_v61, %v4844_v1  ;;  %v1755_v62 = vpop.f32.mrb[102].mxu1  ;;  %2312 = vmatprep.mubr.bf16.mxu0 %v2011_v7 }
 0x28b   : > { %v1756_v63 = vadd.f32 %v1755_v62, %v4840_v29  ;;  %v1757_v0 = vpop.f32.mrb[103].mxu1  ;;  %2313 = vmatmul.mubr.bf16.gmra.mrb[180].mxu0 %v2010_v59  ;;  %v1936_v21 = vmax.f32 %v1752_v3, 0.0 }
 0x28c   : > { %v1758_v14 = vadd.f32 %v1757_v0, %v4844_v1  ;;  %v1937_v13 = vmax.f32 %v1754_v8, 0.0 }
 0x28d   : > { %v1938_v16 = vmax.f32 %v1756_v63, 0.0 }
 0x28e   : > { %v1939_v9 = vmax.f32 %v1758_v14, 0.0 }
 0x28f   : > { %v2012_v18 = vpack.c.bf16 %v1938_v16, %v1936_v21 }
 0x290   : > { %v2013_v19 = vpack.c.bf16 %v1939_v9, %v1937_v13  ;;  %v1761_v26 = vpop.f32.mrb[104].mxu1 }
 0x291   : > { %v1762_v28 = vadd.f32 %v1761_v26, %v4840_v29  ;;  %v1763_v30 = vpop.f32.mrb[105].mxu1 }
 0x292   : > { %v1764_v22 = vadd.f32 %v1763_v30, %v4844_v1  ;;  %v1765_v31 = vpop.f32.mrb[106].mxu1  ;;  %2322 = vmatprep.mubr.bf16.mxu0 %v2013_v19  ;;  %v3983_v30 = vld [vmem:[%s5272_s11 + $0x60] sm:$0xff]  }
 0x293   : > { %v1766_v33 = vadd.f32 %v1765_v31, %v4840_v29  ;;  %v1767_v34 = vpop.f32.mrb[107].mxu1  ;;  %2323 = vmatmul.mubr.bf16.gmra.mrb[184].mxu0 %v2012_v18  ;;  %v1940_v36 = vmax.f32 %v1762_v28, 0.0  ;;  %2779 = vmatpush1.bf16.msra.mxu1 %v3983_v30 }
 0x294   : > { %v1768_v35 = vadd.f32 %v1767_v34, %v4844_v1  ;;  %v1941_v10 = vmax.f32 %v1764_v22, 0.0  ;;  %2780 = vmatprep.subr.bf16.mxu1 %v4166_v40 }
 0x295   : > { %v1942_v15 = vmax.f32 %v1766_v33, 0.0 }
 0x296   : > { %v1943_v23 = vmax.f32 %v1768_v35, 0.0 }
 0x297   : > { %v2014_v37 = vpack.c.bf16 %v1942_v15, %v1940_v36 }
 0x298   : > { %v2015_v38 = vpack.c.bf16 %v1943_v23, %v1941_v10  ;;  %v1771_v39 = vpop.f32.mrb[108].mxu1 }
 0x299   : > { %v1772_v41 = vadd.f32 %v1771_v39, %v4840_v29  ;;  %v1773_v42 = vpop.f32.mrb[109].mxu1 }
 0x29a   : > { %v1774_v43 = vadd.f32 %v1773_v42, %v4844_v1  ;;  %v1775_v44 = vpop.f32.mrb[110].mxu1  ;;  %2332 = vmatprep.mubr.bf16.mxu0 %v2015_v38 }
 0x29b   : > { %v1776_v24 = vadd.f32 %v1775_v44, %v4840_v29  ;;  %v1777_v46 = vpop.f32.mrb[111].mxu1  ;;  %2333 = vmatmul.mubr.bf16.gmra.mrb[188].mxu0 %v2014_v37  ;;  %v1944_v17 = vmax.f32 %v1772_v41, 0.0 }
 0x29c   : > { %v1778_v47 = vadd.f32 %v1777_v46, %v4844_v1  ;;  %v1444_v48 = vpop.f32.mrb[84].mxu0  ;;  %v1945_v50 = vmax.f32 %v1774_v43, 0.0 }
 0x29d   : > { %v1946_v49 = vmax.f32 %v1776_v24, 0.0  ;;  %v1445_v11 = vadd.f32 %v4897_v45, %v1444_v48  ;;  %v3803_v25 = vpop.f32.mrb[85].mxu0  ;;  %v3984_v48 = vld [vmem:[%s5272_s11 + $0x68] sm:$0xff]  }
 0x29e   : > { %v1947_v52 = vmax.f32 %v1778_v47, 0.0  ;;  %v1447_v53 = vpop.f32.mrb[86].mxu0  ;;  %2781 = vmatpush1.bf16.msra.mxu1 %v3984_v48 }
 0x29f   : > { %v2016_v54 = vpack.c.bf16 %v1946_v49, %v1944_v17  ;;  %1611 = vst [vmem:[%s4906_s23] sm:$0xff] %v1445_v11  ;;  %v1448_v55 = vadd.f32 %v4897_v45, %v1447_v53  ;;  %v3804_v57 = vpop.f32.mrb[87].mxu0  ;;  %2782 = vmatprep.subr.bf16.mxu1 %v4166_v40 }
 0x2a0   : > { %v2017_v27 = vpack.c.bf16 %v1947_v52, %v1945_v50  ;;  %v1781_v20 = vpop.f32.mrb[112].mxu1 }
 0x2a1   : > { %1612 = vst [vmem:[%s4906_s23 + $0x8] sm:$0xff] %v1448_v55  ;;  %v1782_v5 = vadd.f32 %v1781_v20, %v4840_v29  ;;  %v1783_v6 = vpop.f32.mrb[113].mxu1 }
 0x2a2   : > { %v1784_v12 = vadd.f32 %v1783_v6, %v4844_v1  ;;  %v1785_v59 = vpop.f32.mrb[114].mxu1  ;;  %2342 = vmatprep.mubr.bf16.mxu0 %v2017_v27 }
 0x2a3   : > { %v1786_v7 = vadd.f32 %v1785_v59, %v4840_v29  ;;  %v1787_v60 = vpop.f32.mrb[115].mxu1  ;;  %2343 = vmatmul.mubr.bf16.gmra.mrb[192].mxu0 %v2016_v54  ;;  %v1948_v8 = vmax.f32 %v1782_v5, 0.0 }
 0x2a4   : > { %v1788_v3 = vadd.f32 %v1787_v60, %v4844_v1  ;;  %v1452_v61 = vpop.f32.mrb[88].mxu0  ;;  %v1949_v2 = vmax.f32 %v1784_v12, 0.0 }
 0x2a5   : > { %v1950_v62 = vmax.f32 %v1786_v7, 0.0  ;;  %v1453_v63 = vadd.f32 %v4897_v45, %v1452_v61  ;;  %v3807_v0 = vpop.f32.mrb[89].mxu0 }
 0x2a6   : > { %v1951_v14 = vmax.f32 %v1788_v3, 0.0  ;;  %v1455_v21 = vpop.f32.mrb[90].mxu0 }
 0x2a7   : > { %v2018_v16 = vpack.c.bf16 %v1950_v62, %v1948_v8  ;;  %1613 = vst [vmem:[%s4906_s23 + $0x10] sm:$0xff] %v1453_v63  ;;  %v1456_v13 = vadd.f32 %v4897_v45, %v1455_v21  ;;  %v3808_v9 = vpop.f32.mrb[91].mxu0 }
 0x2a8   : > { %v2019_v18 = vpack.c.bf16 %v1951_v14, %v1949_v2  ;;  %v1791_v19 = vpop.f32.mrb[116].mxu1 }
 0x2a9   : > { %1614 = vst [vmem:[%s4906_s23 + $0x18] sm:$0xff] %v1456_v13  ;;  %v1792_v26 = vadd.f32 %v1791_v19, %v4840_v29  ;;  %v1793_v28 = vpop.f32.mrb[117].mxu1 }
 0x2aa   : > { %v1794_v22 = vadd.f32 %v1793_v28, %v4844_v1  ;;  %v1795_v31 = vpop.f32.mrb[118].mxu1  ;;  %2352 = vmatprep.mubr.bf16.mxu0 %v2019_v18 }
 0x2ab   : > { %v1796_v32 = vadd.f32 %v1795_v31, %v4840_v29  ;;  %v1797_v33 = vpop.f32.mrb[119].mxu1  ;;  %2353 = vmatmul.mubr.bf16.gmra.mrb[196].mxu0 %v2018_v16  ;;  %v1952_v36 = vmax.f32 %v1792_v26, 0.0 }
 0x2ac   : > { %v1798_v34 = vadd.f32 %v1797_v33, %v4844_v1  ;;  %v1460_v35 = vpop.f32.mrb[92].mxu0  ;;  %v1953_v37 = vmax.f32 %v1794_v22, 0.0  ;;  %v3985_v22 = vld [vmem:[%s5272_s11 + $0x70] sm:$0xff]  }
 0x2ad   : > { %v1954_v15 = vmax.f32 %v1796_v32, 0.0  ;;  %v1461_v10 = vadd.f32 %v4897_v45, %v1460_v35  ;;  %v3811_v23 = vpop.f32.mrb[93].mxu0  ;;  %2783 = vmatpush1.bf16.msra.mxu1 %v3985_v22 }
 0x2ae   : > { %v1955_v38 = vmax.f32 %v1798_v34, 0.0  ;;  %v1463_v39 = vpop.f32.mrb[94].mxu0  ;;  %2784 = vmatprep.subr.bf16.mxu1 %v4166_v40 }
 0x2af   : > { %v2020_v41 = vpack.c.bf16 %v1954_v15, %v1952_v36  ;;  %1615 = vst [vmem:[%s4906_s23 + $0x20] sm:$0xff] %v1461_v10  ;;  %v1464_v42 = vadd.f32 %v4897_v45, %v1463_v39  ;;  %v3812_v43 = vpop.f32.mrb[95].mxu0 }
 0x2b0   : > { %v2021_v44 = vpack.c.bf16 %v1955_v38, %v1953_v37  ;;  %v1801_v24 = vpop.f32.mrb[120].mxu1 }
 0x2b1   : > { %1616 = vst [vmem:[%s4906_s23 + $0x28] sm:$0xff] %v1464_v42  ;;  %v1802_v46 = vadd.f32 %v1801_v24, %v4840_v29  ;;  %v1803_v47 = vpop.f32.mrb[121].mxu1 }
 0x2b2   : > { %v1804_v17 = vadd.f32 %v1803_v47, %v4844_v1  ;;  %v1805_v49 = vpop.f32.mrb[122].mxu1  ;;  %2362 = vmatprep.mubr.bf16.mxu0 %v2021_v44 }
 0x2b3   : > { %v1806_v11 = vadd.f32 %v1805_v49, %v4840_v29  ;;  %v1807_v25 = vpop.f32.mrb[123].mxu1  ;;  %2363 = vmatmul.mubr.bf16.gmra.mrb[200].mxu0 %v2020_v41  ;;  %v1956_v53 = vmax.f32 %v1802_v46, 0.0 }
 0x2b4   : > { %v1808_v50 = vadd.f32 %v1807_v25, %v4844_v1  ;;  %v1468_v52 = vpop.f32.mrb[96].mxu0  ;;  %v1957_v58 = vmax.f32 %v1804_v17, 0.0 }
 0x2b5   : > { %v1958_v54 = vmax.f32 %v1806_v11, 0.0  ;;  %v1469_v55 = vadd.f32 %v4897_v45, %v1468_v52  ;;  %v3815_v57 = vpop.f32.mrb[97].mxu0  ;;  %v3986_v52 = vld [vmem:[%s5272_s11 + $0x78] sm:$0xff]  }
 0x2b6   : > { %v1959_v27 = vmax.f32 %v1808_v50, 0.0  ;;  %v1471_v20 = vpop.f32.mrb[98].mxu0  ;;  %2785 = vmatpush1.bf16.msra.mxu1 %v3986_v52 }
 0x2b7   : > { %v2022_v5 = vpack.c.bf16 %v1958_v54, %v1956_v53  ;;  %1617 = vst [vmem:[%s4906_s23 + $0x30] sm:$0xff] %v1469_v55  ;;  %v1472_v6 = vadd.f32 %v4897_v45, %v1471_v20  ;;  %v3816_v12 = vpop.f32.mrb[99].mxu0 }
 0x2b8   : > { %v2023_v59 = vpack.c.bf16 %v1959_v27, %v1957_v58  ;;  %v1811_v7 = vpop.f32.mrb[124].mxu1 }
 0x2b9   : > { %1618 = vst [vmem:[%s4906_s23 + $0x38] sm:$0xff] %v1472_v6  ;;  %v1812_v60 = vadd.f32 %v1811_v7, %v4840_v29  ;;  %v1813_v3 = vpop.f32.mrb[125].mxu1 }
 0x2ba   : > { %v1814_v61 = vadd.f32 %v1813_v3, %v4844_v1  ;;  %v1815_v8 = vpop.f32.mrb[126].mxu1  ;;  %2372 = vmatprep.mubr.bf16.mxu0 %v2023_v59 }
 0x2bb   : > { %v1816_v62 = vadd.f32 %v1815_v8, %v4840_v29  ;;  %v1817_v63 = vpop.f32.mrb[127].mxu1  ;;  %2373 = vmatmul.mubr.bf16.gmra.mrb[204].mxu0 %v2022_v5  ;;  %v1960_v14 = vmax.f32 %v1812_v60, 0.0 }
 0x2bc   : > { %v1818_v0 = vadd.f32 %v1817_v63, %v4844_v1  ;;  %v1476_v2 = vpop.f32.mrb[100].mxu0  ;;  %v1961_v9 = vmax.f32 %v1814_v61, 0.0 }
 0x2bd   : > { %v1962_v21 = vmax.f32 %v1816_v62, 0.0  ;;  %v1477_v16 = vadd.f32 %v4897_v45, %v1476_v2  ;;  %v3819_v13 = vpop.f32.mrb[101].mxu0 }
 0x2be   : > { %v1963_v18 = vmax.f32 %v1818_v0, 0.0  ;;  %v1479_v19 = vpop.f32.mrb[102].mxu0 }
 0x2bf   : > { %v2024_v26 = vpack.c.bf16 %v1962_v21, %v1960_v14  ;;  %1619 = vst [vmem:[%s4906_s23 + $0x40] sm:$0xff] %v1477_v16  ;;  %v1480_v28 = vadd.f32 %v4897_v45, %v1479_v19  ;;  %v3820_v30 = vpop.f32.mrb[103].mxu0 }
 0x2c0   : > { %v2025_v31 = vpack.c.bf16 %v1963_v18, %v1961_v9  ;;  %v1821_v32 = vpop.f32.mrb[128].mxu1 }
 0x2c1   : > { %1620 = vst [vmem:[%s4906_s23 + $0x48] sm:$0xff] %v1480_v28  ;;  %v1822_v33 = vadd.f32 %v1821_v32, %v4840_v29  ;;  %v1823_v34 = vpop.f32.mrb[129].mxu1 }
 0x2c2   : > { %v1824_v35 = vadd.f32 %v1823_v34, %v4844_v1  ;;  %v1825_v36 = vpop.f32.mrb[130].mxu1  ;;  %2382 = vmatprep.mubr.bf16.mxu0 %v2025_v31 }
 0x2c3   : > { %v1826_v15 = vadd.f32 %v1825_v36, %v4840_v29  ;;  %v1827_v10 = vpop.f32.mrb[131].mxu1  ;;  %2383 = vmatmul.mubr.bf16.gmra.mrb[208].mxu0 %v2024_v26  ;;  %v1964_v38 = vmax.f32 %v1822_v33, 0.0 }
 0x2c4   : > { %v1828_v23 = vadd.f32 %v1827_v10, %v4844_v1  ;;  %v1484_v37 = vpop.f32.mrb[104].mxu0  ;;  %v1965_v43 = vmax.f32 %v1824_v35, 0.0 }
 0x2c5   : > { %v1966_v39 = vmax.f32 %v1826_v15, 0.0  ;;  %v1485_v41 = vadd.f32 %v4897_v45, %v1484_v37  ;;  %v3823_v42 = vpop.f32.mrb[105].mxu0 }
 0x2c6   : > { %v1967_v44 = vmax.f32 %v1828_v23, 0.0  ;;  %v1487_v24 = vpop.f32.mrb[106].mxu0 }
 0x2c7   : > { %v2026_v46 = vpack.c.bf16 %v1966_v39, %v1964_v38  ;;  %1621 = vst [vmem:[%s4906_s23 + $0x50] sm:$0xff] %v1485_v41  ;;  %v1488_v40 = vadd.f32 %v4897_v45, %v1487_v24  ;;  %v3824_v47 = vpop.f32.mrb[107].mxu0 }
 0x2c8   : > { %v2027_v48 = vpack.c.bf16 %v1967_v44, %v1965_v43  ;;  %v1831_v17 = vpop.f32.mrb[132].mxu1 }
 0x2c9   : > { %1622 = vst [vmem:[%s4906_s23 + $0x58] sm:$0xff] %v1488_v40  ;;  %v1832_v49 = vadd.f32 %v1831_v17, %v4840_v29  ;;  %v1833_v11 = vpop.f32.mrb[133].mxu1 }
 0x2ca   : > { %v1834_v25 = vadd.f32 %v1833_v11, %v4844_v1  ;;  %v1835_v50 = vpop.f32.mrb[134].mxu1  ;;  %2392 = vmatprep.mubr.bf16.mxu0 %v2027_v48 }
 0x2cb   : > { %v1836_v53 = vadd.f32 %v1835_v50, %v4840_v29  ;;  %v1837_v54 = vpop.f32.mrb[135].mxu1  ;;  %2393 = vmatmul.mubr.bf16.gmra.mrb[212].mxu0 %v2026_v46  ;;  %v1968_v58 = vmax.f32 %v1832_v49, 0.0 }
 0x2cc   : > { %v1838_v55 = vadd.f32 %v1837_v54, %v4844_v1  ;;  %v1492_v57 = vpop.f32.mrb[108].mxu0  ;;  %v1969_v6 = vmax.f32 %v1834_v25, 0.0 }
 0x2cd   : > { %v1970_v27 = vmax.f32 %v1836_v53, 0.0  ;;  %v1493_v20 = vadd.f32 %v4897_v45, %v1492_v57  ;;  %v3827_v5 = vpop.f32.mrb[109].mxu0 }
 0x2ce   : > { %v1971_v12 = vmax.f32 %v1838_v55, 0.0  ;;  %v1495_v59 = vpop.f32.mrb[110].mxu0 }
 0x2cf   : > { %v2028_v7 = vpack.c.bf16 %v1970_v27, %v1968_v58  ;;  %1623 = vst [vmem:[%s4906_s23 + $0x60] sm:$0xff] %v1493_v20  ;;  %v1496_v60 = vadd.f32 %v4897_v45, %v1495_v59  ;;  %v3828_v3 = vpop.f32.mrb[111].mxu0 }
 0x2d0   : > { %v2029_v61 = vpack.c.bf16 %v1971_v12, %v1969_v6  ;;  %v1841_v8 = vpop.f32.mrb[136].mxu1 }
 0x2d1   : > { %1624 = vst [vmem:[%s4906_s23 + $0x68] sm:$0xff] %v1496_v60  ;;  %v1842_v62 = vadd.f32 %v1841_v8, %v4840_v29  ;;  %v1843_v63 = vpop.f32.mrb[137].mxu1 }
 0x2d2   : > { %v1844_v0 = vadd.f32 %v1843_v63, %v4844_v1  ;;  %v1845_v2 = vpop.f32.mrb[138].mxu1  ;;  %2402 = vmatprep.mubr.bf16.mxu0 %v2029_v61 }
 0x2d3   : > { %v1846_v14 = vadd.f32 %v1845_v2, %v4840_v29  ;;  %v1847_v21 = vpop.f32.mrb[139].mxu1  ;;  %2403 = vmatmul.mubr.bf16.gmra.mrb[216].mxu0 %v2028_v7  ;;  %v1972_v9 = vmax.f32 %v1842_v62, 0.0 }
 0x2d4   : > { %v1848_v16 = vadd.f32 %v1847_v21, %v4844_v1  ;;  %v1500_v13 = vpop.f32.mrb[112].mxu0  ;;  %v1973_v28 = vmax.f32 %v1844_v0, 0.0 }
 0x2d5   : > { %v1974_v18 = vmax.f32 %v1846_v14, 0.0  ;;  %v1501_v19 = vadd.f32 %v4897_v45, %v1500_v13  ;;  %v3831_v26 = vpop.f32.mrb[113].mxu0 }
 0x2d6   : > { %v1975_v30 = vmax.f32 %v1848_v16, 0.0  ;;  %v1503_v22 = vpop.f32.mrb[114].mxu0 }
 0x2d7   : > { %v2030_v31 = vpack.c.bf16 %v1974_v18, %v1972_v9  ;;  %1625 = vst [vmem:[%s4906_s23 + $0x70] sm:$0xff] %v1501_v19  ;;  %v1504_v32 = vadd.f32 %v4897_v45, %v1503_v22  ;;  %v3832_v33 = vpop.f32.mrb[115].mxu0 }
 0x2d8   : > { %v2031_v34 = vpack.c.bf16 %v1975_v30, %v1973_v28  ;;  %v1851_v35 = vpop.f32.mrb[140].mxu1 }
 0x2d9   : > { %1626 = vst [vmem:[%s4906_s23 + $0x78] sm:$0xff] %v1504_v32  ;;  %v1852_v36 = vadd.f32 %v1851_v35, %v4840_v29  ;;  %v1853_v15 = vpop.f32.mrb[141].mxu1 }
 0x2da   : > { %v1854_v10 = vadd.f32 %v1853_v15, %v4844_v1  ;;  %v1855_v23 = vpop.f32.mrb[142].mxu1  ;;  %2412 = vmatprep.mubr.bf16.mxu0 %v2031_v34 }
 0x2db   : > { %v1856_v37 = vadd.f32 %v1855_v23, %v4840_v29  ;;  %v1857_v38 = vpop.f32.mrb[143].mxu1  ;;  %2413 = vmatmul.mubr.bf16.gmra.mrb[220].mxu0 %v2030_v31  ;;  %v1976_v42 = vmax.f32 %v1852_v36, 0.0 }
 0x2dc   : > { %v1858_v39 = vadd.f32 %v1857_v38, %v4844_v1  ;;  %v1508_v41 = vpop.f32.mrb[116].mxu0  ;;  %v1977_v46 = vmax.f32 %v1854_v10, 0.0 }
 0x2dd   : > { %v1978_v43 = vmax.f32 %v1856_v37, 0.0  ;;  %v1509_v44 = vadd.f32 %v4897_v45, %v1508_v41  ;;  %v3835_v24 = vpop.f32.mrb[117].mxu0 }
 0x2de   : > { %v1979_v40 = vmax.f32 %v1858_v39, 0.0  ;;  %v1511_v47 = vpop.f32.mrb[118].mxu0 }
 0x2df   : > { %v2032_v48 = vpack.c.bf16 %v1978_v43, %v1976_v42  ;;  %1627 = vst [vmem:[%s4906_s23 + $0x80] sm:$0xff] %v1509_v44  ;;  %v1512_v17 = vadd.f32 %v4897_v45, %v1511_v47  ;;  %v3836_v49 = vpop.f32.mrb[119].mxu0 }
 0x2e0   : > { %v2033_v11 = vpack.c.bf16 %v1979_v40, %v1977_v46  ;;  %v1861_v25 = vpop.f32.mrb[144].mxu1 }
 0x2e1   : > { %1628 = vst [vmem:[%s4906_s23 + $0x88] sm:$0xff] %v1512_v17  ;;  %v1862_v50 = vadd.f32 %v1861_v25, %v4840_v29  ;;  %v1863_v52 = vpop.f32.mrb[145].mxu1 }
 0x2e2   : > { %v1864_v53 = vadd.f32 %v1863_v52, %v4844_v1  ;;  %v1865_v54 = vpop.f32.mrb[146].mxu1  ;;  %2422 = vmatprep.mubr.bf16.mxu0 %v2033_v11 }
 0x2e3   : > { %v1866_v55 = vadd.f32 %v1865_v54, %v4840_v29  ;;  %v1867_v57 = vpop.f32.mrb[147].mxu1  ;;  %2423 = vmatmul.mubr.bf16.gmra.mrb[224].mxu0 %v2032_v48  ;;  %v1980_v20 = vmax.f32 %v1862_v50, 0.0 }
 0x2e4   : > { %v1868_v58 = vadd.f32 %v1867_v57, %v4844_v1  ;;  %v1516_v27 = vpop.f32.mrb[120].mxu0  ;;  %v1981_v59 = vmax.f32 %v1864_v53, 0.0 }
 0x2e5   : > { %v1982_v5 = vmax.f32 %v1866_v55, 0.0  ;;  %v1517_v6 = vadd.f32 %v4897_v45, %v1516_v27  ;;  %v3839_v12 = vpop.f32.mrb[121].mxu0 }
 0x2e6   : > { %v1983_v7 = vmax.f32 %v1868_v58, 0.0  ;;  %v1519_v60 = vpop.f32.mrb[122].mxu0 }
 0x2e7   : > { %v2034_v3 = vpack.c.bf16 %v1982_v5, %v1980_v20  ;;  %1629 = vst [vmem:[%s4906_s23 + $0x90] sm:$0xff] %v1517_v6  ;;  %v1520_v61 = vadd.f32 %v4897_v45, %v1519_v60  ;;  %v3840_v8 = vpop.f32.mrb[123].mxu0 }
 0x2e8   : > { %v2035_v62 = vpack.c.bf16 %v1983_v7, %v1981_v59  ;;  %v1871_v63 = vpop.f32.mrb[148].mxu1 }
 0x2e9   : > { %1630 = vst [vmem:[%s4906_s23 + $0x98] sm:$0xff] %v1520_v61  ;;  %v1872_v0 = vadd.f32 %v1871_v63, %v4840_v29  ;;  %v1873_v2 = vpop.f32.mrb[149].mxu1 }
 0x2ea   : > { %v1874_v14 = vadd.f32 %v1873_v2, %v4844_v1  ;;  %v1875_v21 = vpop.f32.mrb[150].mxu1  ;;  %2432 = vmatprep.mubr.bf16.mxu0 %v2035_v62 }
 0x2eb   : > { %v1876_v16 = vadd.f32 %v1875_v21, %v4840_v29  ;;  %v1877_v13 = vpop.f32.mrb[151].mxu1  ;;  %2433 = vmatmul.mubr.bf16.gmra.mrb[228].mxu0 %v2034_v3  ;;  %v1984_v19 = vmax.f32 %v1872_v0, 0.0 }
 0x2ec   : > { %v1878_v9 = vadd.f32 %v1877_v13, %v4844_v1  ;;  %v1524_v18 = vpop.f32.mrb[124].mxu0  ;;  %v1985_v22 = vmax.f32 %v1874_v14, 0.0 }
 0x2ed   : > { %v1986_v26 = vmax.f32 %v1876_v16, 0.0  ;;  %v1525_v28 = vadd.f32 %v4897_v45, %v1524_v18  ;;  %v3843_v30 = vpop.f32.mrb[125].mxu0 }
 0x2ee   : > { %v1987_v31 = vmax.f32 %v1878_v9, 0.0  ;;  %v1527_v32 = vpop.f32.mrb[126].mxu0 }
 0x2ef   : > { %v2036_v33 = vpack.c.bf16 %v1986_v26, %v1984_v19  ;;  %1631 = vst [vmem:[%s4906_s23 + $0xa0] sm:$0xff] %v1525_v28  ;;  %v1528_v34 = vadd.f32 %v4897_v45, %v1527_v32  ;;  %v3844_v35 = vpop.f32.mrb[127].mxu0 }
 0x2f0   : > { %v2037_v36 = vpack.c.bf16 %v1987_v31, %v1985_v22  ;;  %v1881_v15 = vpop.f32.mrb[152].mxu1 }
 0x2f1   : > { %1632 = vst [vmem:[%s4906_s23 + $0xa8] sm:$0xff] %v1528_v34  ;;  %v1882_v10 = vadd.f32 %v1881_v15, %v4840_v29  ;;  %v1883_v23 = vpop.f32.mrb[153].mxu1 }
 0x2f2   : > { %v1884_v37 = vadd.f32 %v1883_v23, %v4844_v1  ;;  %v1885_v38 = vpop.f32.mrb[154].mxu1  ;;  %2442 = vmatprep.mubr.bf16.mxu0 %v2037_v36 }
 0x2f3   : > { %v1886_v39 = vadd.f32 %v1885_v38, %v4840_v29  ;;  %v1887_v41 = vpop.f32.mrb[155].mxu1  ;;  %2443 = vmatmul.mubr.bf16.gmra.mrb[232].mxu0 %v2036_v33  ;;  %v1988_v44 = vmax.f32 %v1882_v10, 0.0 }
 0x2f4   : > { %v1888_v42 = vadd.f32 %v1887_v41, %v4844_v1  ;;  %v1532_v43 = vpop.f32.mrb[128].mxu0  ;;  %v1989_v47 = vmax.f32 %v1884_v37, 0.0 }
 0x2f5   : > { %v1990_v24 = vmax.f32 %v1886_v39, 0.0  ;;  %v1533_v46 = vadd.f32 %v4897_v45, %v1532_v43  ;;  %v3847_v40 = vpop.f32.mrb[129].mxu0 }
 0x2f6   : > { %v1991_v48 = vmax.f32 %v1888_v42, 0.0  ;;  %v1535_v17 = vpop.f32.mrb[130].mxu0 }
 0x2f7   : > { %v2038_v49 = vpack.c.bf16 %v1990_v24, %v1988_v44  ;;  %1633 = vst [vmem:[%s4906_s23 + $0xb0] sm:$0xff] %v1533_v46  ;;  %v1536_v11 = vadd.f32 %v4897_v45, %v1535_v17  ;;  %v3848_v25 = vpop.f32.mrb[131].mxu0 }
 0x2f8   : > { %v2039_v50 = vpack.c.bf16 %v1991_v48, %v1989_v47  ;;  %v1891_v52 = vpop.f32.mrb[156].mxu1 }
 0x2f9   : > { %1634 = vst [vmem:[%s4906_s23 + $0xb8] sm:$0xff] %v1536_v11  ;;  %v1892_v53 = vadd.f32 %v1891_v52, %v4840_v29  ;;  %v1893_v54 = vpop.f32.mrb[157].mxu1 }
 0x2fa   : > { %v1894_v55 = vadd.f32 %v1893_v54, %v4844_v1  ;;  %v1895_v57 = vpop.f32.mrb[158].mxu1  ;;  %2452 = vmatprep.mubr.bf16.mxu0 %v2039_v50 }
 0x2fb   : > { %v1896_v58 = vadd.f32 %v1895_v57, %v4840_v29  ;;  %v1897_v27 = vpop.f32.mrb[159].mxu1  ;;  %2453 = vmatmul.mubr.bf16.gmra.mrb[236].mxu0 %v2038_v49  ;;  %v1992_v6 = vmax.f32 %v1892_v53, 0.0 }
 0x2fc   : > { %v1898_v20 = vadd.f32 %v1897_v27, %v4844_v1  ;;  %v1540_v5 = vpop.f32.mrb[132].mxu0  ;;  %v1993_v60 = vmax.f32 %v1894_v55, 0.0 }
 0x2fd   : > { %v1994_v12 = vmax.f32 %v1896_v58, 0.0  ;;  %v1541_v59 = vadd.f32 %v4897_v45, %v1540_v5  ;;  %v3851_v7 = vpop.f32.mrb[133].mxu0 }
 0x2fe   : > { %v1995_v3 = vmax.f32 %v1898_v20, 0.0  ;;  %v1543_v61 = vpop.f32.mrb[134].mxu0 }
 0x2ff   : > { %v2040_v8 = vpack.c.bf16 %v1994_v12, %v1992_v6  ;;  %1635 = vst [vmem:[%s4906_s23 + $0xc0] sm:$0xff] %v1541_v59  ;;  %v1544_v62 = vadd.f32 %v4897_v45, %v1543_v61  ;;  %v3852_v63 = vpop.f32.mrb[135].mxu0 }
 0x300   : > { %v2041_v0 = vpack.c.bf16 %v1995_v3, %v1993_v60  ;;  %v1901_v2 = vpop.f32.mrb[160].mxu1 }
 0x301   : > { %1636 = vst [vmem:[%s4906_s23 + $0xc8] sm:$0xff] %v1544_v62  ;;  %v1902_v14 = vadd.f32 %v1901_v2, %v4840_v29  ;;  %v1903_v21 = vpop.f32.mrb[161].mxu1 }
 0x302   : > { %v1904_v16 = vadd.f32 %v1903_v21, %v4844_v1  ;;  %v1905_v13 = vpop.f32.mrb[162].mxu1  ;;  %2462 = vmatprep.mubr.bf16.mxu0 %v2041_v0 }
 0x303   : > { %v1906_v9 = vadd.f32 %v1905_v13, %v4840_v29  ;;  %v1907_v18 = vpop.f32.mrb[163].mxu1  ;;  %2463 = vmatmul.mubr.bf16.gmra.mrb[240].mxu0 %v2040_v8  ;;  %v1996_v28 = vmax.f32 %v1902_v14, 0.0 }
 0x304   : > { %v1908_v19 = vadd.f32 %v1907_v18, %v4844_v1  ;;  %v1548_v26 = vpop.f32.mrb[136].mxu0  ;;  %v1997_v32 = vmax.f32 %v1904_v16, 0.0 }
 0x305   : > { %v1998_v30 = vmax.f32 %v1906_v9, 0.0  ;;  %v1549_v22 = vadd.f32 %v4897_v45, %v1548_v26  ;;  %v3855_v31 = vpop.f32.mrb[137].mxu0 }
 0x306   : > { %v1999_v33 = vmax.f32 %v1908_v19, 0.0  ;;  %v1551_v34 = vpop.f32.mrb[138].mxu0 }
 0x307   : > { %v2042_v35 = vpack.c.bf16 %v1998_v30, %v1996_v28  ;;  %1637 = vst [vmem:[%s4906_s23 + $0xd0] sm:$0xff] %v1549_v22  ;;  %v1552_v36 = vadd.f32 %v4897_v45, %v1551_v34  ;;  %v3856_v15 = vpop.f32.mrb[139].mxu0 }
 0x308   : > { %v2043_v10 = vpack.c.bf16 %v1999_v33, %v1997_v32  ;;  %v1911_v23 = vpop.f32.mrb[164].mxu1 }
 0x309   : > { %1638 = vst [vmem:[%s4906_s23 + $0xd8] sm:$0xff] %v1552_v36  ;;  %v1912_v37 = vadd.f32 %v1911_v23, %v4840_v29  ;;  %v1913_v38 = vpop.f32.mrb[165].mxu1 }
 0x30a   : > { %v1914_v39 = vadd.f32 %v1913_v38, %v4844_v1  ;;  %v1915_v41 = vpop.f32.mrb[166].mxu1  ;;  %2472 = vmatprep.mubr.bf16.mxu0 %v2043_v10 }
 0x30b   : > { %v1916_v42 = vadd.f32 %v1915_v41, %v4840_v29  ;;  %v1917_v43 = vpop.f32.mrb[167].mxu1  ;;  %2473 = vmatmul.mubr.bf16.gmra.mrb[244].mxu0 %v2042_v35  ;;  %v2000_v46 = vmax.f32 %v1912_v37, 0.0  ;;  %v2078_v35 = vld [vmem:[%s5271_s10] sm:$0x3] }
 0x30c   : > { %v1918_v44 = vadd.f32 %v1917_v43, %v4844_v1  ;;  %v1556_v24 = vpop.f32.mrb[140].mxu0  ;;  %v2001_v17 = vmax.f32 %v1914_v39, 0.0  ;;  %v5072_v36 = vrot.slane %v2078_v35, %v1658_v56  ;;  %v5076_v15 = vrot.slane %v2078_v35, %v1662_v4 }
 0x30d   : > { %v2002_v40 = vmax.f32 %v1916_v42, 0.0  ;;  %v1557_v47 = vadd.f32 %v4897_v45, %v1556_v24  ;;  %v3859_v48 = vpop.f32.mrb[141].mxu0 }
 0x30e   : > { %v2003_v49 = vmax.f32 %v1918_v44, 0.0  ;;  %v1559_v11 = vpop.f32.mrb[142].mxu0 }
 0x30f   : > { %v2044_v25 = vpack.c.bf16 %v2002_v40, %v2000_v46  ;;  %1639 = vst [vmem:[%s4906_s23 + $0xe0] sm:$0xff] %v1557_v47  ;;  %v1560_v29 = vadd.f32 %v4897_v45, %v1559_v11  ;;  %v3860_v50 = vpop.f32.mrb[143].mxu0 }
 0x310   : > { %v2045_v52 = vpack.c.bf16 %v2003_v49, %v2001_v17 }
 0x311   : > { %1640 = vst [vmem:[%s4906_s23 + $0xe8] sm:$0xff] %v1560_v29 }
 0x312   : > { %2482 = vmatprep.mubr.bf16.mxu0 %v2045_v52 }
 0x313   : > { %2483 = vmatmul.mubr.bf16.gmra.mrb[248].mxu0 %v2044_v25 }
 0x314   : > { %v1564_v1 = vpop.f32.mrb[144].mxu0 }
 0x315   : > { %v1565_v53 = vadd.f32 %v4897_v45, %v1564_v1  ;;  %v3863_v54 = vpop.f32.mrb[145].mxu0 }
 0x316   : > { %v1567_v55 = vpop.f32.mrb[146].mxu0 }
 0x317   : > { %1641 = vst [vmem:[%s4906_s23 + $0xf0] sm:$0xff] %v1565_v53  ;;  %v1568_v57 = vadd.f32 %v4897_v45, %v1567_v55  ;;  %v3864_v58 = vpop.f32.mrb[147].mxu0 }
 0x319   : > { %1642 = vst [vmem:[%s4906_s23 + $0xf8] sm:$0xff] %v1568_v57 }
 0x31c   : > { %v1572_v27 = vpop.f32.mrb[148].mxu0 }
 0x31d   : > { %v1573_v20 = vadd.f32 %v4897_v45, %v1572_v27  ;;  %v3867_v5 = vpop.f32.mrb[149].mxu0 }
 0x31e   : > { %v1575_v6 = vpop.f32.mrb[150].mxu0 }
 0x31f   : > { %1643 = vst [vmem:[%s4906_s23 + $0x100] sm:$0xff] %v1573_v20  ;;  %v1576_v12 = vadd.f32 %v4897_v45, %v1575_v6  ;;  %v3868_v59 = vpop.f32.mrb[151].mxu0 }
 0x321   : > { %1644 = vst [vmem:[%s4906_s23 + $0x108] sm:$0xff] %v1576_v12 }
 0x324   : > { %v1580_v7 = vpop.f32.mrb[152].mxu0 }
 0x325   : > { %v1581_v60 = vadd.f32 %v4897_v45, %v1580_v7  ;;  %v3871_v3 = vpop.f32.mrb[153].mxu0 }
 0x326   : > { %v1583_v61 = vpop.f32.mrb[154].mxu0 }
 0x327   : > { %1645 = vst [vmem:[%s4906_s23 + $0x110] sm:$0xff] %v1581_v60  ;;  %v1584_v8 = vadd.f32 %v4897_v45, %v1583_v61  ;;  %v3872_v62 = vpop.f32.mrb[155].mxu0 }
 0x329   : > { %1646 = vst [vmem:[%s4906_s23 + $0x118] sm:$0xff] %v1584_v8 }
 0x32c   : > { %v1588_v63 = vpop.f32.mrb[156].mxu0 }
 0x32d   : > { %v1589_v0 = vadd.f32 %v4897_v45, %v1588_v63  ;;  %v3875_v2 = vpop.f32.mrb[157].mxu0 }
 0x32e   : > { %v1591_v14 = vpop.f32.mrb[158].mxu0 }
 0x32f   : > { %1647 = vst [vmem:[%s4906_s23 + $0x120] sm:$0xff] %v1589_v0  ;;  %v1592_v21 = vadd.f32 %v4897_v45, %v1591_v14  ;;  %v3876_v16 = vpop.f32.mrb[159].mxu0 }
 0x331   : > { %1648 = vst [vmem:[%s4906_s23 + $0x128] sm:$0xff] %v1592_v21 }
 0x334   : > { %v1596_v13 = vpop.f32.mrb[160].mxu0 }
 0x335   : > { %v1597_v9 = vadd.f32 %v4897_v45, %v1596_v13  ;;  %v3879_v18 = vpop.f32.mrb[161].mxu0 }
 0x336   : > { %v1599_v19 = vpop.f32.mrb[162].mxu0 }
 0x337   : > { %1649 = vst [vmem:[%s4906_s23 + $0x130] sm:$0xff] %v1597_v9  ;;  %v1600_v26 = vadd.f32 %v4897_v45, %v1599_v19  ;;  %v3880_v28 = vpop.f32.mrb[163].mxu0 }
 0x339   : > { %1650 = vst [vmem:[%s4906_s23 + $0x138] sm:$0xff] %v1600_v26 }
 0x33c   : > { %v1604_v30 = vpop.f32.mrb[164].mxu0 }
 0x33d   : > { %v1605_v22 = vadd.f32 %v4897_v45, %v1604_v30  ;;  %v3883_v31 = vpop.f32.mrb[165].mxu0 }
 0x33e   : > { %v1607_v32 = vpop.f32.mrb[166].mxu0 }
 0x33f   : > { %1651 = vst [vmem:[%s4906_s23 + $0x140] sm:$0xff] %v1605_v22  ;;  %v1608_v33 = vadd.f32 %v4897_v45, %v1607_v32  ;;  %v3884_v34 = vpop.f32.mrb[167].mxu0 }
 0x341   : > { %1652 = vst [vmem:[%s4906_s23 + $0x148] sm:$0xff] %v1608_v33 }
 0x346   : > { %v2284_v10 = vpop.f32.mrb[168].mxu0 }
 0x347   : > { %v2285_v23 = vadd.f32 %v2284_v10, %v5072_v36  ;;  %v2286_v37 = vpop.f32.mrb[169].mxu0 }
 0x348   : > { %v2287_v45 = vadd.f32 %v2286_v37, %v5076_v15  ;;  %v2288_v38 = vpop.f32.mrb[170].mxu0 }
 0x349   : > { %v2289_v39 = vadd.f32 %v2288_v38, %v5072_v36  ;;  %v2290_v41 = vpop.f32.mrb[171].mxu0  ;;  %v2493_v43 = vmax.f32 %v2285_v23, 0.0 }
 0x34a   : > { %v2291_v42 = vadd.f32 %v2290_v41, %v5076_v15  ;;  %v2494_v56 = vmax.f32 %v2287_v45, 0.0 }
 0x34b   : > { %v2495_v44 = vmax.f32 %v2289_v39, 0.0 }
 0x34c   : > { %v2496_v24 = vmax.f32 %v2291_v42, 0.0 }
 0x34d   : > { %v2577_v46 = vpack.c.bf16 %v2495_v44, %v2493_v43 }
 0x34e   : > { %v2578_v51 = vpack.c.bf16 %v2496_v24, %v2494_v56  ;;  %v2294_v4 = vpop.f32.mrb[172].mxu0 }
 0x34f   : > { %v2295_v40 = vadd.f32 %v2294_v4, %v5072_v36  ;;  %v2296_v47 = vpop.f32.mrb[173].mxu0 }
 0x350   : > { %v2297_v48 = vadd.f32 %v2296_v47, %v5076_v15  ;;  %v2298_v17 = vpop.f32.mrb[174].mxu0  ;;  %2786 = vmatprep.mubr.bf16.mxu1 %v2578_v51 }
 0x351   : > { %v2299_v49 = vadd.f32 %v2298_v17, %v5072_v36  ;;  %v2300_v11 = vpop.f32.mrb[175].mxu0  ;;  %2787 = vmatmul.mubr.bf16.vlgmr.msra.gmra.mrb[168].mxu1 %v2577_v46  ;;  %v2497_v29 = vmax.f32 %v2295_v40, 0.0 }
 0x352   : > { %v2301_v25 = vadd.f32 %v2300_v11, %v5076_v15  ;;  %v2498_v52 = vmax.f32 %v2297_v48, 0.0 }
 0x353   : > { %v2499_v50 = vmax.f32 %v2299_v49, 0.0 }
 0x354   : > { %v2500_v1 = vmax.f32 %v2301_v25, 0.0 }
 0x355   : > { %v2579_v53 = vpack.c.bf16 %v2499_v50, %v2497_v29 }
 0x356   : > { %v2580_v54 = vpack.c.bf16 %v2500_v1, %v2498_v52  ;;  %v2304_v55 = vpop.f32.mrb[176].mxu0 }
 0x357   : > { %v2305_v57 = vadd.f32 %v2304_v55, %v5072_v36  ;;  %v2306_v58 = vpop.f32.mrb[177].mxu0 }
 0x358   : > { %v2307_v27 = vadd.f32 %v2306_v58, %v5076_v15  ;;  %v2308_v20 = vpop.f32.mrb[178].mxu0  ;;  %2794 = vmatprep.mubr.bf16.mxu1 %v2580_v54 }
 0x359   : > { %v2309_v5 = vadd.f32 %v2308_v20, %v5072_v36  ;;  %v2310_v6 = vpop.f32.mrb[179].mxu0  ;;  %2795 = vmatmul.mubr.bf16.gmra.mrb[172].mxu1 %v2579_v53  ;;  %v2501_v59 = vmax.f32 %v2305_v57, 0.0 }
 0x35a   : > { %v2311_v12 = vadd.f32 %v2310_v6, %v5076_v15  ;;  %v2502_v60 = vmax.f32 %v2307_v27, 0.0 }
 0x35b   : > { %v2503_v7 = vmax.f32 %v2309_v5, 0.0 }
 0x35c   : > { %v2504_v3 = vmax.f32 %v2311_v12, 0.0 }
 0x35d   : > { %v2581_v61 = vpack.c.bf16 %v2503_v7, %v2501_v59 }
 0x35e   : > { %v2582_v8 = vpack.c.bf16 %v2504_v3, %v2502_v60  ;;  %v2314_v62 = vpop.f32.mrb[180].mxu0 }
 0x35f   : > { %v2315_v63 = vadd.f32 %v2314_v62, %v5072_v36  ;;  %v2316_v0 = vpop.f32.mrb[181].mxu0 }
 0x360   : > { %v2317_v2 = vadd.f32 %v2316_v0, %v5076_v15  ;;  %v2318_v14 = vpop.f32.mrb[182].mxu0  ;;  %2802 = vmatprep.mubr.bf16.mxu1 %v2582_v8 }
 0x361   : > { %v2319_v21 = vadd.f32 %v2318_v14, %v5072_v36  ;;  %v2320_v16 = vpop.f32.mrb[183].mxu0  ;;  %2803 = vmatmul.mubr.bf16.gmra.mrb[176].mxu1 %v2581_v61  ;;  %v2505_v9 = vmax.f32 %v2315_v63, 0.0 }
 0x362   : > { %v2321_v13 = vadd.f32 %v2320_v16, %v5076_v15  ;;  %v2506_v19 = vmax.f32 %v2317_v2, 0.0 }
 0x363   : > { %v2507_v18 = vmax.f32 %v2319_v21, 0.0 }
 0x364   : > { %v2508_v26 = vmax.f32 %v2321_v13, 0.0 }
 0x365   : > { %v2583_v28 = vpack.c.bf16 %v2507_v18, %v2505_v9 }
 0x366   : > { %v2584_v30 = vpack.c.bf16 %v2508_v26, %v2506_v19  ;;  %v2324_v22 = vpop.f32.mrb[184].mxu0 }
 0x367   : > { %v2325_v31 = vadd.f32 %v2324_v22, %v5072_v36  ;;  %v2326_v32 = vpop.f32.mrb[185].mxu0 }
 0x368   : > { %v2327_v33 = vadd.f32 %v2326_v32, %v5076_v15  ;;  %v2328_v34 = vpop.f32.mrb[186].mxu0  ;;  %2810 = vmatprep.mubr.bf16.mxu1 %v2584_v30 }
 0x369   : > { %v2329_v35 = vadd.f32 %v2328_v34, %v5072_v36  ;;  %v2330_v10 = vpop.f32.mrb[187].mxu0  ;;  %2811 = vmatmul.mubr.bf16.gmra.mrb[180].mxu1 %v2583_v28  ;;  %v2509_v37 = vmax.f32 %v2325_v31, 0.0 }
 0x36a   : > { %v2331_v23 = vadd.f32 %v2330_v10, %v5076_v15  ;;  %v2510_v38 = vmax.f32 %v2327_v33, 0.0 }
 0x36b   : > { %v2511_v45 = vmax.f32 %v2329_v35, 0.0 }
 0x36c   : > { %v2512_v39 = vmax.f32 %v2331_v23, 0.0 }
 0x36d   : > { %v2585_v41 = vpack.c.bf16 %v2511_v45, %v2509_v37 }
 0x36e   : > { %v2586_v42 = vpack.c.bf16 %v2512_v39, %v2510_v38  ;;  %v2334_v43 = vpop.f32.mrb[188].mxu0 }
 0x36f   : > { %v2335_v44 = vadd.f32 %v2334_v43, %v5072_v36  ;;  %v2336_v56 = vpop.f32.mrb[189].mxu0 }
 0x370   : > { %v2337_v24 = vadd.f32 %v2336_v56, %v5076_v15  ;;  %v2338_v46 = vpop.f32.mrb[190].mxu0  ;;  %2818 = vmatprep.mubr.bf16.mxu1 %v2586_v42 }
 0x371   : > { %v2339_v51 = vadd.f32 %v2338_v46, %v5072_v36  ;;  %v2340_v4 = vpop.f32.mrb[191].mxu0  ;;  %2819 = vmatmul.mubr.bf16.gmra.mrb[184].mxu1 %v2585_v41  ;;  %v2513_v47 = vmax.f32 %v2335_v44, 0.0 }
 0x372   : > { %v2341_v40 = vadd.f32 %v2340_v4, %v5076_v15  ;;  %v2514_v17 = vmax.f32 %v2337_v24, 0.0 }
 0x373   : > { %v2515_v48 = vmax.f32 %v2339_v51, 0.0 }
 0x374   : > { %v2516_v49 = vmax.f32 %v2341_v40, 0.0 }
 0x375   : > { %v2587_v11 = vpack.c.bf16 %v2515_v48, %v2513_v47 }
 0x376   : > { %v2588_v25 = vpack.c.bf16 %v2516_v49, %v2514_v17  ;;  %v2344_v29 = vpop.f32.mrb[192].mxu0 }
 0x377   : > { %v2345_v50 = vadd.f32 %v2344_v29, %v5072_v36  ;;  %v2346_v52 = vpop.f32.mrb[193].mxu0 }
 0x378   : > { %v2347_v1 = vadd.f32 %v2346_v52, %v5076_v15  ;;  %v2348_v53 = vpop.f32.mrb[194].mxu0  ;;  %2826 = vmatprep.mubr.bf16.mxu1 %v2588_v25 }
 0x379   : > { %v2349_v54 = vadd.f32 %v2348_v53, %v5072_v36  ;;  %v2350_v55 = vpop.f32.mrb[195].mxu0  ;;  %2827 = vmatmul.mubr.bf16.gmra.mrb[188].mxu1 %v2587_v11  ;;  %v2517_v58 = vmax.f32 %v2345_v50, 0.0 }
 0x37a   : > { %v2351_v57 = vadd.f32 %v2350_v55, %v5076_v15  ;;  %v2518_v20 = vmax.f32 %v2347_v1, 0.0 }
 0x37b   : > { %v2519_v27 = vmax.f32 %v2349_v54, 0.0 }
 0x37c   : > { %v2520_v5 = vmax.f32 %v2351_v57, 0.0 }
 0x37d   : > { %v2589_v6 = vpack.c.bf16 %v2519_v27, %v2517_v58 }
 0x37e   : > { %v2590_v12 = vpack.c.bf16 %v2520_v5, %v2518_v20  ;;  %v2354_v59 = vpop.f32.mrb[196].mxu0 }
 0x37f   : > { %v2355_v7 = vadd.f32 %v2354_v59, %v5072_v36  ;;  %v2356_v60 = vpop.f32.mrb[197].mxu0 }
 0x380   : > { %v2357_v3 = vadd.f32 %v2356_v60, %v5076_v15  ;;  %v2358_v61 = vpop.f32.mrb[198].mxu0  ;;  %2834 = vmatprep.mubr.bf16.mxu1 %v2590_v12 }
 0x381   : > { %v2359_v8 = vadd.f32 %v2358_v61, %v5072_v36  ;;  %v2360_v62 = vpop.f32.mrb[199].mxu0  ;;  %2835 = vmatmul.mubr.bf16.gmra.mrb[192].mxu1 %v2589_v6  ;;  %v2521_v0 = vmax.f32 %v2355_v7, 0.0 }
 0x382   : > { %v2361_v63 = vadd.f32 %v2360_v62, %v5076_v15  ;;  %v2522_v14 = vmax.f32 %v2357_v3, 0.0 }
 0x383   : > { %v2523_v2 = vmax.f32 %v2359_v8, 0.0 }
 0x384   : > { %v2524_v21 = vmax.f32 %v2361_v63, 0.0 }
 0x385   : > { %v2591_v16 = vpack.c.bf16 %v2523_v2, %v2521_v0 }
 0x386   : > { %v2592_v13 = vpack.c.bf16 %v2524_v21, %v2522_v14  ;;  %v2364_v9 = vpop.f32.mrb[200].mxu0 }
 0x387   : > { %v2365_v18 = vadd.f32 %v2364_v9, %v5072_v36  ;;  %v2366_v19 = vpop.f32.mrb[201].mxu0 }
 0x388   : > { %v2367_v26 = vadd.f32 %v2366_v19, %v5076_v15  ;;  %v2368_v28 = vpop.f32.mrb[202].mxu0  ;;  %2842 = vmatprep.mubr.bf16.mxu1 %v2592_v13 }
 0x389   : > { %v2369_v30 = vadd.f32 %v2368_v28, %v5072_v36  ;;  %v2370_v22 = vpop.f32.mrb[203].mxu0  ;;  %2843 = vmatmul.mubr.bf16.gmra.mrb[196].mxu1 %v2591_v16  ;;  %v2525_v32 = vmax.f32 %v2365_v18, 0.0 }
 0x38a   : > { %v2371_v31 = vadd.f32 %v2370_v22, %v5076_v15  ;;  %v2526_v34 = vmax.f32 %v2367_v26, 0.0 }
 0x38b   : > { %v2527_v33 = vmax.f32 %v2369_v30, 0.0 }
 0x38c   : > { %v2528_v35 = vmax.f32 %v2371_v31, 0.0 }
 0x38d   : > { %v2593_v10 = vpack.c.bf16 %v2527_v33, %v2525_v32 }
 0x38e   : > { %v2594_v23 = vpack.c.bf16 %v2528_v35, %v2526_v34  ;;  %v2374_v37 = vpop.f32.mrb[204].mxu0 }
 0x38f   : > { %v2375_v45 = vadd.f32 %v2374_v37, %v5072_v36  ;;  %v2376_v38 = vpop.f32.mrb[205].mxu0 }
 0x390   : > { %v2377_v39 = vadd.f32 %v2376_v38, %v5076_v15  ;;  %v2378_v41 = vpop.f32.mrb[206].mxu0  ;;  %2850 = vmatprep.mubr.bf16.mxu1 %v2594_v23 }
 0x391   : > { %v2379_v42 = vadd.f32 %v2378_v41, %v5072_v36  ;;  %v2380_v43 = vpop.f32.mrb[207].mxu0  ;;  %2851 = vmatmul.mubr.bf16.gmra.mrb[200].mxu1 %v2593_v10  ;;  %v2529_v56 = vmax.f32 %v2375_v45, 0.0 }
 0x392   : > { %v2381_v44 = vadd.f32 %v2380_v43, %v5076_v15  ;;  %v2530_v46 = vmax.f32 %v2377_v39, 0.0 }
 0x393   : > { %v2531_v24 = vmax.f32 %v2379_v42, 0.0 }
 0x394   : > { %v2532_v51 = vmax.f32 %v2381_v44, 0.0 }
 0x395   : > { %v2595_v4 = vpack.c.bf16 %v2531_v24, %v2529_v56 }
 0x396   : > { %v2596_v40 = vpack.c.bf16 %v2532_v51, %v2530_v46  ;;  %v2384_v47 = vpop.f32.mrb[208].mxu0 }
 0x397   : > { %v2385_v48 = vadd.f32 %v2384_v47, %v5072_v36  ;;  %v2386_v17 = vpop.f32.mrb[209].mxu0 }
 0x398   : > { %v2387_v49 = vadd.f32 %v2386_v17, %v5076_v15  ;;  %v2388_v11 = vpop.f32.mrb[210].mxu0  ;;  %2858 = vmatprep.mubr.bf16.mxu1 %v2596_v40 }
 0x399   : > { %v2389_v25 = vadd.f32 %v2388_v11, %v5072_v36  ;;  %v2390_v29 = vpop.f32.mrb[211].mxu0  ;;  %2859 = vmatmul.mubr.bf16.gmra.mrb[204].mxu1 %v2595_v4  ;;  %v2533_v52 = vmax.f32 %v2385_v48, 0.0 }
 0x39a   : > { %v2391_v50 = vadd.f32 %v2390_v29, %v5076_v15  ;;  %v2534_v53 = vmax.f32 %v2387_v49, 0.0 }
 0x39b   : > { %v2535_v1 = vmax.f32 %v2389_v25, 0.0 }
 0x39c   : > { %v2536_v54 = vmax.f32 %v2391_v50, 0.0 }
 0x39d   : > { %v2597_v55 = vpack.c.bf16 %v2535_v1, %v2533_v52 }
 0x39e   : > { %v2598_v57 = vpack.c.bf16 %v2536_v54, %v2534_v53  ;;  %v2394_v58 = vpop.f32.mrb[212].mxu0 }
 0x39f   : > { %v2395_v27 = vadd.f32 %v2394_v58, %v5072_v36  ;;  %v2396_v20 = vpop.f32.mrb[213].mxu0 }
 0x3a0   : > { %v2397_v5 = vadd.f32 %v2396_v20, %v5076_v15  ;;  %v2398_v6 = vpop.f32.mrb[214].mxu0  ;;  %2866 = vmatprep.mubr.bf16.mxu1 %v2598_v57 }
 0x3a1   : > { %v2399_v12 = vadd.f32 %v2398_v6, %v5072_v36  ;;  %v2400_v59 = vpop.f32.mrb[215].mxu0  ;;  %2867 = vmatmul.mubr.bf16.gmra.mrb[208].mxu1 %v2597_v55  ;;  %v2537_v60 = vmax.f32 %v2395_v27, 0.0 }
 0x3a2   : > { %v2401_v7 = vadd.f32 %v2400_v59, %v5076_v15  ;;  %v2538_v61 = vmax.f32 %v2397_v5, 0.0 }
 0x3a3   : > { %v2539_v3 = vmax.f32 %v2399_v12, 0.0 }
 0x3a4   : > { %v2540_v8 = vmax.f32 %v2401_v7, 0.0 }
 0x3a5   : > { %v2599_v62 = vpack.c.bf16 %v2539_v3, %v2537_v60 }
 0x3a6   : > { %v2600_v63 = vpack.c.bf16 %v2540_v8, %v2538_v61  ;;  %v2404_v0 = vpop.f32.mrb[216].mxu0 }
 0x3a7   : > { %v2405_v2 = vadd.f32 %v2404_v0, %v5072_v36  ;;  %v2406_v14 = vpop.f32.mrb[217].mxu0 }
 0x3a8   : > { %v2407_v21 = vadd.f32 %v2406_v14, %v5076_v15  ;;  %v2408_v16 = vpop.f32.mrb[218].mxu0  ;;  %2874 = vmatprep.mubr.bf16.mxu1 %v2600_v63 }
 0x3a9   : > { %v2409_v13 = vadd.f32 %v2408_v16, %v5072_v36  ;;  %v2410_v9 = vpop.f32.mrb[219].mxu0  ;;  %2875 = vmatmul.mubr.bf16.gmra.mrb[212].mxu1 %v2599_v62  ;;  %v2541_v19 = vmax.f32 %v2405_v2, 0.0 }
 0x3aa   : > { %v2411_v18 = vadd.f32 %v2410_v9, %v5076_v15  ;;  %v2542_v28 = vmax.f32 %v2407_v21, 0.0 }
 0x3ab   : > { %v2543_v26 = vmax.f32 %v2409_v13, 0.0 }
 0x3ac   : > { %v2544_v30 = vmax.f32 %v2411_v18, 0.0 }
 0x3ad   : > { %v2601_v22 = vpack.c.bf16 %v2543_v26, %v2541_v19 }
 0x3ae   : > { %v2602_v31 = vpack.c.bf16 %v2544_v30, %v2542_v28  ;;  %v2414_v32 = vpop.f32.mrb[220].mxu0 }
 0x3af   : > { %v2415_v33 = vadd.f32 %v2414_v32, %v5072_v36  ;;  %v2416_v34 = vpop.f32.mrb[221].mxu0 }
 0x3b0   : > { %v2417_v35 = vadd.f32 %v2416_v34, %v5076_v15  ;;  %v2418_v10 = vpop.f32.mrb[222].mxu0  ;;  %2882 = vmatprep.mubr.bf16.mxu1 %v2602_v31 }
 0x3b1   : > { %v2419_v23 = vadd.f32 %v2418_v10, %v5072_v36  ;;  %v2420_v37 = vpop.f32.mrb[223].mxu0  ;;  %2883 = vmatmul.mubr.bf16.gmra.mrb[216].mxu1 %v2601_v22  ;;  %v2545_v38 = vmax.f32 %v2415_v33, 0.0 }
 0x3b2   : > { %v2421_v45 = vadd.f32 %v2420_v37, %v5076_v15  ;;  %v2546_v41 = vmax.f32 %v2417_v35, 0.0 }
 0x3b3   : > { %v2547_v39 = vmax.f32 %v2419_v23, 0.0 }
 0x3b4   : > { %v2548_v42 = vmax.f32 %v2421_v45, 0.0 }
 0x3b5   : > { %v2603_v43 = vpack.c.bf16 %v2547_v39, %v2545_v38 }
 0x3b6   : > { %v2604_v44 = vpack.c.bf16 %v2548_v42, %v2546_v41  ;;  %v2424_v56 = vpop.f32.mrb[224].mxu0 }
 0x3b7   : > { %v2425_v24 = vadd.f32 %v2424_v56, %v5072_v36  ;;  %v2426_v46 = vpop.f32.mrb[225].mxu0 }
 0x3b8   : > { %v2427_v51 = vadd.f32 %v2426_v46, %v5076_v15  ;;  %v2428_v4 = vpop.f32.mrb[226].mxu0  ;;  %2890 = vmatprep.mubr.bf16.mxu1 %v2604_v44 }
 0x3b9   : > { %v2429_v40 = vadd.f32 %v2428_v4, %v5072_v36  ;;  %v2430_v47 = vpop.f32.mrb[227].mxu0  ;;  %2891 = vmatmul.mubr.bf16.gmra.mrb[220].mxu1 %v2603_v43  ;;  %v2549_v17 = vmax.f32 %v2425_v24, 0.0 }
 0x3ba   : > { %v2431_v48 = vadd.f32 %v2430_v47, %v5076_v15  ;;  %v2550_v11 = vmax.f32 %v2427_v51, 0.0 }
 0x3bb   : > { %v2551_v49 = vmax.f32 %v2429_v40, 0.0 }
 0x3bc   : > { %v2552_v25 = vmax.f32 %v2431_v48, 0.0 }
 0x3bd   : > { %v2605_v29 = vpack.c.bf16 %v2551_v49, %v2549_v17 }
 0x3be   : > { %v2606_v50 = vpack.c.bf16 %v2552_v25, %v2550_v11  ;;  %v2434_v52 = vpop.f32.mrb[228].mxu0 }
 0x3bf   : > { %v2435_v1 = vadd.f32 %v2434_v52, %v5072_v36  ;;  %v2436_v53 = vpop.f32.mrb[229].mxu0 }
 0x3c0   : > { %v2437_v54 = vadd.f32 %v2436_v53, %v5076_v15  ;;  %v2438_v55 = vpop.f32.mrb[230].mxu0  ;;  %2898 = vmatprep.mubr.bf16.mxu1 %v2606_v50 }
 0x3c1   : > { %v2439_v57 = vadd.f32 %v2438_v55, %v5072_v36  ;;  %v2440_v58 = vpop.f32.mrb[231].mxu0  ;;  %2899 = vmatmul.mubr.bf16.gmra.mrb[224].mxu1 %v2605_v29  ;;  %v2553_v20 = vmax.f32 %v2435_v1, 0.0 }
 0x3c2   : > { %v2441_v27 = vadd.f32 %v2440_v58, %v5076_v15  ;;  %v2554_v6 = vmax.f32 %v2437_v54, 0.0 }
 0x3c3   : > { %v2555_v5 = vmax.f32 %v2439_v57, 0.0 }
 0x3c4   : > { %v2556_v12 = vmax.f32 %v2441_v27, 0.0 }
 0x3c5   : > { %v2607_v59 = vpack.c.bf16 %v2555_v5, %v2553_v20 }
 0x3c6   : > { %v2608_v7 = vpack.c.bf16 %v2556_v12, %v2554_v6  ;;  %v2444_v60 = vpop.f32.mrb[232].mxu0 }
 0x3c7   : > { %v2445_v3 = vadd.f32 %v2444_v60, %v5072_v36  ;;  %v2446_v61 = vpop.f32.mrb[233].mxu0 }
 0x3c8   : > { %v2447_v8 = vadd.f32 %v2446_v61, %v5076_v15  ;;  %v2448_v62 = vpop.f32.mrb[234].mxu0  ;;  %2906 = vmatprep.mubr.bf16.mxu1 %v2608_v7 }
 0x3c9   : > { %v2449_v63 = vadd.f32 %v2448_v62, %v5072_v36  ;;  %v2450_v0 = vpop.f32.mrb[235].mxu0  ;;  %2907 = vmatmul.mubr.bf16.gmra.mrb[228].mxu1 %v2607_v59  ;;  %v2557_v14 = vmax.f32 %v2445_v3, 0.0 }
 0x3ca   : > { %v2451_v2 = vadd.f32 %v2450_v0, %v5076_v15  ;;  %v2558_v16 = vmax.f32 %v2447_v8, 0.0 }
 0x3cb   : > { %v2559_v21 = vmax.f32 %v2449_v63, 0.0 }
 0x3cc   : > { %v2560_v13 = vmax.f32 %v2451_v2, 0.0 }
 0x3cd   : > { %v2609_v9 = vpack.c.bf16 %v2559_v21, %v2557_v14  ;;  %v5165_v14 = vld [vmem:[%s5273_s12] ss:$0 sm:$0xff] }
 0x3ce   : > { %v2610_v18 = vpack.c.bf16 %v2560_v13, %v2558_v16  ;;  %v2454_v19 = vpop.f32.mrb[236].mxu0 }
 0x3cf   : > { %v2455_v26 = vadd.f32 %v2454_v19, %v5072_v36  ;;  %v2456_v28 = vpop.f32.mrb[237].mxu0 }
 0x3d0   : > { %v2457_v30 = vadd.f32 %v2456_v28, %v5076_v15  ;;  %v2458_v22 = vpop.f32.mrb[238].mxu0  ;;  %2914 = vmatprep.mubr.bf16.mxu1 %v2610_v18 }
 0x3d1   : > { %v2459_v31 = vadd.f32 %v2458_v22, %v5072_v36  ;;  %v2460_v32 = vpop.f32.mrb[239].mxu0  ;;  %2915 = vmatmul.mubr.bf16.gmra.mrb[232].mxu1 %v2609_v9  ;;  %v2561_v34 = vmax.f32 %v2455_v26, 0.0 }
 0x3d2   : > { %v2461_v33 = vadd.f32 %v2460_v32, %v5076_v15  ;;  %v2562_v10 = vmax.f32 %v2457_v30, 0.0 }
 0x3d3   : > { %v2563_v35 = vmax.f32 %v2459_v31, 0.0 }
 0x3d4   : > { %v2564_v23 = vmax.f32 %v2461_v33, 0.0 }
 0x3d5   : > { %v2611_v37 = vpack.c.bf16 %v2563_v35, %v2561_v34 }
 0x3d6   : > { %v2612_v45 = vpack.c.bf16 %v2564_v23, %v2562_v10  ;;  %v2464_v38 = vpop.f32.mrb[240].mxu0 }
 0x3d7   : > { %v2465_v39 = vadd.f32 %v2464_v38, %v5072_v36  ;;  %v2466_v41 = vpop.f32.mrb[241].mxu0 }
 0x3d8   : > { %v2467_v42 = vadd.f32 %v2466_v41, %v5076_v15  ;;  %v2468_v43 = vpop.f32.mrb[242].mxu0  ;;  %2922 = vmatprep.mubr.bf16.mxu1 %v2612_v45 }
 0x3d9   : > { %v2469_v44 = vadd.f32 %v2468_v43, %v5072_v36  ;;  %v2470_v56 = vpop.f32.mrb[243].mxu0  ;;  %2923 = vmatmul.mubr.bf16.gmra.mrb[236].mxu1 %v2611_v37  ;;  %v2565_v46 = vmax.f32 %v2465_v39, 0.0 }
 0x3da   : > { %v2471_v24 = vadd.f32 %v2470_v56, %v5076_v15  ;;  %v2566_v4 = vmax.f32 %v2467_v42, 0.0 }
 0x3db   : > { %v2567_v51 = vmax.f32 %v2469_v44, 0.0 }
 0x3dc   : > { %v2568_v40 = vmax.f32 %v2471_v24, 0.0 }
 0x3dd   : > { %v2613_v47 = vpack.c.bf16 %v2567_v51, %v2565_v46 }
 0x3de   : > { %v2614_v48 = vpack.c.bf16 %v2568_v40, %v2566_v4  ;;  %v2474_v17 = vpop.f32.mrb[244].mxu0 }
 0x3df   : > { %v2475_v49 = vadd.f32 %v2474_v17, %v5072_v36  ;;  %v2476_v11 = vpop.f32.mrb[245].mxu0 }
 0x3e0   : > { %v2477_v25 = vadd.f32 %v2476_v11, %v5076_v15  ;;  %v2478_v29 = vpop.f32.mrb[246].mxu0  ;;  %2930 = vmatprep.mubr.bf16.mxu1 %v2614_v48 }
 0x3e1   : > { %v2479_v50 = vadd.f32 %v2478_v29, %v5072_v36  ;;  %v2480_v52 = vpop.f32.mrb[247].mxu0  ;;  %2931 = vmatmul.mubr.bf16.gmra.mrb[240].mxu1 %v2613_v47  ;;  %v2569_v53 = vmax.f32 %v2475_v49, 0.0 }
 0x3e2   : > { %v2481_v1 = vadd.f32 %v2480_v52, %v5076_v15  ;;  %v2570_v55 = vmax.f32 %v2477_v25, 0.0 }
 0x3e3   : > { %v2571_v54 = vmax.f32 %v2479_v50, 0.0 }
 0x3e4   : > { %v2572_v57 = vmax.f32 %v2481_v1, 0.0 }
 0x3e5   : > { %v2615_v58 = vpack.c.bf16 %v2571_v54, %v2569_v53 }
 0x3e6   : > { %v2616_v27 = vpack.c.bf16 %v2572_v57, %v2570_v55  ;;  %v2484_v20 = vpop.f32.mrb[248].mxu0 }
 0x3e7   : > { %v2485_v5 = vadd.f32 %v2484_v20, %v5072_v36  ;;  %v2486_v6 = vpop.f32.mrb[249].mxu0 }
 0x3e8   : > { %v2487_v12 = vadd.f32 %v2486_v6, %v5076_v15  ;;  %v2488_v59 = vpop.f32.mrb[250].mxu0  ;;  %2938 = vmatprep.mubr.bf16.mxu1 %v2616_v27 }
 0x3e9   : > { %v2489_v7 = vadd.f32 %v2488_v59, %v5072_v36  ;;  %v2490_v60 = vpop.f32.mrb[251].mxu0  ;;  %2939 = vmatmul.mubr.bf16.gmra.mrb[244].mxu1 %v2615_v58  ;;  %v2573_v61 = vmax.f32 %v2485_v5, 0.0 }
 0x3ea   : > { %v2491_v3 = vadd.f32 %v2490_v60, %v5076_v15  ;;  %v2574_v62 = vmax.f32 %v2487_v12, 0.0 }
 0x3eb   : > { %v2575_v8 = vmax.f32 %v2489_v7, 0.0 }
 0x3ec   : > { %v2576_v63 = vmax.f32 %v2491_v3, 0.0 }
 0x3ed   : > { %v2617_v0 = vpack.c.bf16 %v2575_v8, %v2573_v61 }
 0x3ee   : > { %v2618_v2 = vpack.c.bf16 %v2576_v63, %v2574_v62 }
 0x3f0   : > { %2946 = vmatprep.mubr.bf16.mxu1 %v2618_v2 }
 0x3f1   : > { %2947 = vmatmul.mubr.bf16.gmra.mrb[248].mxu1 %v2617_v0 }
 0x424   : > { %v2788_v21 = vpop.f32.mrb[168].mxu1 }
 0x425   : > { %v2789_v36 = vadd.f32 %v5165_v14, %v2788_v21  ;;  %v2790_v16 = vpop.f32.mrb[169].mxu1 }
 0x426   : > { %v2791_v13 = vpop.f32.mrb[170].mxu1 }
 0x427   : > { %v3511_v9 = vmul.f32 -1.442695, %v2789_v36  ;;  %v2792_v15 = vadd.f32 %v5165_v14, %v2791_v13  ;;  %v2793_v18 = vpop.f32.mrb[171].mxu1 }
 0x429   : > { %3987 = vpow2.f32 %v3511_v9  ;;  %v3512_v19 = vmul.f32 -1.442695, %v2792_v15 }
 0x42b   : > { %3989 = vpow2.f32 %v3512_v19 }
 0x42c   : > { %v2796_v26 = vpop.f32.mrb[172].mxu1 }
 0x42d   : > { %v2797_v28 = vadd.f32 %v5165_v14, %v2796_v26  ;;  %v2798_v30 = vpop.f32.mrb[173].mxu1 }
 0x42e   : > { %v2799_v22 = vpop.f32.mrb[174].mxu1 }
 0x42f   : > { %v3513_v31 = vmul.f32 -1.442695, %v2797_v28  ;;  %v2800_v32 = vadd.f32 %v5165_v14, %v2799_v22  ;;  %v2801_v33 = vpop.f32.mrb[175].mxu1 }
 0x431   : > { %3991 = vpow2.f32 %v3513_v31  ;;  %v3514_v34 = vmul.f32 -1.442695, %v2800_v32 }
 0x433   : > { %v3988_v35 = vpop.eup %3987  ;;  %3993 = vpow2.f32 %v3514_v34 }
 0x434   : > { %v3081_v10 = vadd.f32 1.0, %v3988_v35  ;;  %v2804_v23 = vpop.f32.mrb[176].mxu1 }
 0x435   : > { %v3990_v37 = vpop.eup %3989  ;;  %v2805_v45 = vadd.f32 %v5165_v14, %v2804_v23  ;;  %v2806_v38 = vpop.f32.mrb[177].mxu1 }
 0x436   : > { %3995 = vrcp.f32 %v3081_v10  ;;  %v3082_v39 = vadd.f32 1.0, %v3990_v37  ;;  %v2807_v41 = vpop.f32.mrb[178].mxu1 }
 0x437   : > { %v3515_v42 = vmul.f32 -1.442695, %v2805_v45  ;;  %v2808_v43 = vadd.f32 %v5165_v14, %v2807_v41  ;;  %v2809_v44 = vpop.f32.mrb[179].mxu1 }
 0x438   : > { %3997 = vrcp.f32 %v3082_v39 }
 0x439   : > { %3999 = vpow2.f32 %v3515_v42  ;;  %v3516_v56 = vmul.f32 -1.442695, %v2808_v43 }
 0x43b   : > { %v3992_v24 = vpop.eup %3991  ;;  %4001 = vpow2.f32 %v3516_v56 }
 0x43c   : > { %v3083_v46 = vadd.f32 1.0, %v3992_v24  ;;  %v2812_v51 = vpop.f32.mrb[180].mxu1 }
 0x43d   : > { %v3994_v4 = vpop.eup %3993  ;;  %v2813_v40 = vadd.f32 %v5165_v14, %v2812_v51  ;;  %v2814_v47 = vpop.f32.mrb[181].mxu1 }
 0x43e   : > { %4003 = vrcp.f32 %v3083_v46  ;;  %v3084_v48 = vadd.f32 1.0, %v3994_v4  ;;  %v2815_v17 = vpop.f32.mrb[182].mxu1 }
 0x43f   : > { %v3517_v49 = vmul.f32 -1.442695, %v2813_v40  ;;  %v2816_v11 = vadd.f32 %v5165_v14, %v2815_v17  ;;  %v2817_v25 = vpop.f32.mrb[183].mxu1 }
 0x440   : > { %v3996_v29 = vpop.eup %3995  ;;  %4005 = vrcp.f32 %v3084_v48 }
 0x441   : > { %3207 = vst [vmem:[%s5179_s26] sm:$0xff] %v3996_v29  ;;  %4007 = vpow2.f32 %v3517_v49  ;;  %v3518_v50 = vmul.f32 -1.442695, %v2816_v11 }
 0x442   : > { %v3998_v52 = vpop.eup %3997 }
 0x443   : > { %v4000_v1 = vpop.eup %3999  ;;  %3208 = vst [vmem:[%s5179_s26 + $0x8] sm:$0xff] %v3998_v52  ;;  %4009 = vpow2.f32 %v3518_v50 }
 0x444   : > { %v3085_v53 = vadd.f32 1.0, %v4000_v1  ;;  %v2820_v54 = vpop.f32.mrb[184].mxu1 }
 0x445   : > { %v4002_v55 = vpop.eup %4001  ;;  %v2821_v57 = vadd.f32 %v5165_v14, %v2820_v54  ;;  %v2822_v58 = vpop.f32.mrb[185].mxu1 }
 0x446   : > { %4011 = vrcp.f32 %v3085_v53  ;;  %v3086_v27 = vadd.f32 1.0, %v4002_v55  ;;  %v2823_v20 = vpop.f32.mrb[186].mxu1 }
 0x447   : > { %v3519_v5 = vmul.f32 -1.442695, %v2821_v57  ;;  %v2824_v6 = vadd.f32 %v5165_v14, %v2823_v20  ;;  %v2825_v12 = vpop.f32.mrb[187].mxu1 }
 0x448   : > { %v4004_v59 = vpop.eup %4003  ;;  %4013 = vrcp.f32 %v3086_v27 }
 0x449   : > { %3209 = vst [vmem:[%s5179_s26 + $0x10] sm:$0xff] %v4004_v59  ;;  %4015 = vpow2.f32 %v3519_v5  ;;  %v3520_v7 = vmul.f32 -1.442695, %v2824_v6 }
 0x44a   : > { %v4006_v60 = vpop.eup %4005 }
 0x44b   : > { %v4008_v3 = vpop.eup %4007  ;;  %3210 = vst [vmem:[%s5179_s26 + $0x18] sm:$0xff] %v4006_v60  ;;  %4017 = vpow2.f32 %v3520_v7 }
 0x44c   : > { %v3087_v61 = vadd.f32 1.0, %v4008_v3  ;;  %v2828_v8 = vpop.f32.mrb[188].mxu1 }
 0x44d   : > { %v4010_v62 = vpop.eup %4009  ;;  %v2829_v63 = vadd.f32 %v5165_v14, %v2828_v8  ;;  %v2830_v0 = vpop.f32.mrb[189].mxu1 }
 0x44e   : > { %4019 = vrcp.f32 %v3087_v61  ;;  %v3088_v2 = vadd.f32 1.0, %v4010_v62  ;;  %v2831_v21 = vpop.f32.mrb[190].mxu1 }
 0x44f   : > { %v3521_v36 = vmul.f32 -1.442695, %v2829_v63  ;;  %v2832_v16 = vadd.f32 %v5165_v14, %v2831_v21  ;;  %v2833_v13 = vpop.f32.mrb[191].mxu1 }
 0x450   : > { %v4012_v9 = vpop.eup %4011  ;;  %4021 = vrcp.f32 %v3088_v2 }
 0x451   : > { %3211 = vst [vmem:[%s5179_s26 + $0x20] sm:$0xff] %v4012_v9  ;;  %4023 = vpow2.f32 %v3521_v36  ;;  %v3522_v15 = vmul.f32 -1.442695, %v2832_v16 }
 0x452   : > { %v4014_v18 = vpop.eup %4013 }
 0x453   : > { %v4016_v19 = vpop.eup %4015  ;;  %3212 = vst [vmem:[%s5179_s26 + $0x28] sm:$0xff] %v4014_v18  ;;  %4025 = vpow2.f32 %v3522_v15 }
 0x454   : > { %v3089_v26 = vadd.f32 1.0, %v4016_v19  ;;  %v2836_v28 = vpop.f32.mrb[192].mxu1 }
 0x455   : > { %v4018_v30 = vpop.eup %4017  ;;  %v2837_v22 = vadd.f32 %v5165_v14, %v2836_v28  ;;  %v2838_v31 = vpop.f32.mrb[193].mxu1 }
 0x456   : > { %4027 = vrcp.f32 %v3089_v26  ;;  %v3090_v32 = vadd.f32 1.0, %v4018_v30  ;;  %v2839_v33 = vpop.f32.mrb[194].mxu1 }
 0x457   : > { %v3523_v34 = vmul.f32 -1.442695, %v2837_v22  ;;  %v2840_v35 = vadd.f32 %v5165_v14, %v2839_v33  ;;  %v2841_v10 = vpop.f32.mrb[195].mxu1 }
 0x458   : > { %v4020_v23 = vpop.eup %4019  ;;  %4029 = vrcp.f32 %v3090_v32 }
 0x459   : > { %3213 = vst [vmem:[%s5179_s26 + $0x30] sm:$0xff] %v4020_v23  ;;  %4031 = vpow2.f32 %v3523_v34  ;;  %v3524_v37 = vmul.f32 -1.442695, %v2840_v35 }
 0x45a   : > { %v4022_v45 = vpop.eup %4021 }
 0x45b   : > { %v4024_v38 = vpop.eup %4023  ;;  %3214 = vst [vmem:[%s5179_s26 + $0x38] sm:$0xff] %v4022_v45  ;;  %4033 = vpow2.f32 %v3524_v37 }
 0x45c   : > { %v3091_v39 = vadd.f32 1.0, %v4024_v38  ;;  %v2844_v41 = vpop.f32.mrb[196].mxu1 }
 0x45d   : > { %v4026_v42 = vpop.eup %4025  ;;  %v2845_v43 = vadd.f32 %v5165_v14, %v2844_v41  ;;  %v2846_v44 = vpop.f32.mrb[197].mxu1 }
 0x45e   : > { %4035 = vrcp.f32 %v3091_v39  ;;  %v3092_v56 = vadd.f32 1.0, %v4026_v42  ;;  %v2847_v24 = vpop.f32.mrb[198].mxu1 }
 0x45f   : > { %v3525_v46 = vmul.f32 -1.442695, %v2845_v43  ;;  %v2848_v51 = vadd.f32 %v5165_v14, %v2847_v24  ;;  %v2849_v4 = vpop.f32.mrb[199].mxu1 }
 0x460   : > { %v4028_v40 = vpop.eup %4027  ;;  %4037 = vrcp.f32 %v3092_v56 }
 0x461   : > { %3215 = vst [vmem:[%s5179_s26 + $0x40] sm:$0xff] %v4028_v40  ;;  %4039 = vpow2.f32 %v3525_v46  ;;  %v3526_v47 = vmul.f32 -1.442695, %v2848_v51 }
 0x462   : > { %v4030_v48 = vpop.eup %4029 }
 0x463   : > { %v4032_v17 = vpop.eup %4031  ;;  %3216 = vst [vmem:[%s5179_s26 + $0x48] sm:$0xff] %v4030_v48  ;;  %4041 = vpow2.f32 %v3526_v47 }
 0x464   : > { %v3093_v49 = vadd.f32 1.0, %v4032_v17  ;;  %v2852_v11 = vpop.f32.mrb[200].mxu1 }
 0x465   : > { %v4034_v25 = vpop.eup %4033  ;;  %v2853_v29 = vadd.f32 %v5165_v14, %v2852_v11  ;;  %v2854_v50 = vpop.f32.mrb[201].mxu1 }
 0x466   : > { %4043 = vrcp.f32 %v3093_v49  ;;  %v3094_v52 = vadd.f32 1.0, %v4034_v25  ;;  %v2855_v1 = vpop.f32.mrb[202].mxu1 }
 0x467   : > { %v3527_v53 = vmul.f32 -1.442695, %v2853_v29  ;;  %v2856_v54 = vadd.f32 %v5165_v14, %v2855_v1  ;;  %v2857_v55 = vpop.f32.mrb[203].mxu1 }
 0x468   : > { %v4036_v57 = vpop.eup %4035  ;;  %4045 = vrcp.f32 %v3094_v52 }
 0x469   : > { %3217 = vst [vmem:[%s5179_s26 + $0x50] sm:$0xff] %v4036_v57  ;;  %4047 = vpow2.f32 %v3527_v53  ;;  %v3528_v58 = vmul.f32 -1.442695, %v2856_v54 }
 0x46a   : > { %v4038_v27 = vpop.eup %4037 }
 0x46b   : > { %v4040_v20 = vpop.eup %4039  ;;  %3218 = vst [vmem:[%s5179_s26 + $0x58] sm:$0xff] %v4038_v27  ;;  %4049 = vpow2.f32 %v3528_v58 }
 0x46c   : > { %v3095_v5 = vadd.f32 1.0, %v4040_v20  ;;  %v2860_v6 = vpop.f32.mrb[204].mxu1 }
 0x46d   : > { %v4042_v12 = vpop.eup %4041  ;;  %v2861_v59 = vadd.f32 %v5165_v14, %v2860_v6  ;;  %v2862_v7 = vpop.f32.mrb[205].mxu1 }
 0x46e   : > { %4051 = vrcp.f32 %v3095_v5  ;;  %v3096_v60 = vadd.f32 1.0, %v4042_v12  ;;  %v2863_v3 = vpop.f32.mrb[206].mxu1 }
 0x46f   : > { %v3529_v61 = vmul.f32 -1.442695, %v2861_v59  ;;  %v2864_v8 = vadd.f32 %v5165_v14, %v2863_v3  ;;  %v2865_v62 = vpop.f32.mrb[207].mxu1 }
 0x470   : > { %v4044_v63 = vpop.eup %4043  ;;  %4053 = vrcp.f32 %v3096_v60 }
 0x471   : > { %3219 = vst [vmem:[%s5179_s26 + $0x60] sm:$0xff] %v4044_v63  ;;  %4055 = vpow2.f32 %v3529_v61  ;;  %v3530_v0 = vmul.f32 -1.442695, %v2864_v8 }
 0x472   : > { %v4046_v2 = vpop.eup %4045 }
 0x473   : > { %v4048_v21 = vpop.eup %4047  ;;  %3220 = vst [vmem:[%s5179_s26 + $0x68] sm:$0xff] %v4046_v2  ;;  %4057 = vpow2.f32 %v3530_v0 }
 0x474   : > { %v3097_v36 = vadd.f32 1.0, %v4048_v21  ;;  %v2868_v16 = vpop.f32.mrb[208].mxu1 }
 0x475   : > { %v4050_v13 = vpop.eup %4049  ;;  %v2869_v9 = vadd.f32 %v5165_v14, %v2868_v16  ;;  %v2870_v15 = vpop.f32.mrb[209].mxu1 }
 0x476   : > { %4059 = vrcp.f32 %v3097_v36  ;;  %v3098_v18 = vadd.f32 1.0, %v4050_v13  ;;  %v2871_v19 = vpop.f32.mrb[210].mxu1 }
 0x477   : > { %v3531_v26 = vmul.f32 -1.442695, %v2869_v9  ;;  %v2872_v28 = vadd.f32 %v5165_v14, %v2871_v19  ;;  %v2873_v30 = vpop.f32.mrb[211].mxu1 }
 0x478   : > { %v4052_v22 = vpop.eup %4051  ;;  %4061 = vrcp.f32 %v3098_v18 }
 0x479   : > { %3221 = vst [vmem:[%s5179_s26 + $0x70] sm:$0xff] %v4052_v22  ;;  %4063 = vpow2.f32 %v3531_v26  ;;  %v3532_v31 = vmul.f32 -1.442695, %v2872_v28 }
 0x47a   : > { %v4054_v32 = vpop.eup %4053 }
 0x47b   : > { %v4056_v33 = vpop.eup %4055  ;;  %3222 = vst [vmem:[%s5179_s26 + $0x78] sm:$0xff] %v4054_v32  ;;  %4065 = vpow2.f32 %v3532_v31 }
 0x47c   : > { %v3099_v34 = vadd.f32 1.0, %v4056_v33  ;;  %v2876_v35 = vpop.f32.mrb[212].mxu1 }
 0x47d   : > { %v4058_v10 = vpop.eup %4057  ;;  %v2877_v23 = vadd.f32 %v5165_v14, %v2876_v35  ;;  %v2878_v37 = vpop.f32.mrb[213].mxu1 }
 0x47e   : > { %4067 = vrcp.f32 %v3099_v34  ;;  %v3100_v45 = vadd.f32 1.0, %v4058_v10  ;;  %v2879_v38 = vpop.f32.mrb[214].mxu1 }
 0x47f   : > { %v3533_v39 = vmul.f32 -1.442695, %v2877_v23  ;;  %v2880_v41 = vadd.f32 %v5165_v14, %v2879_v38  ;;  %v2881_v42 = vpop.f32.mrb[215].mxu1 }
 0x480   : > { %v4060_v43 = vpop.eup %4059  ;;  %4069 = vrcp.f32 %v3100_v45 }
 0x481   : > { %3223 = vst [vmem:[%s5179_s26 + $0x80] sm:$0xff] %v4060_v43  ;;  %4071 = vpow2.f32 %v3533_v39  ;;  %v3534_v44 = vmul.f32 -1.442695, %v2880_v41 }
 0x482   : > { %v4062_v56 = vpop.eup %4061 }
 0x483   : > { %v4064_v24 = vpop.eup %4063  ;;  %3224 = vst [vmem:[%s5179_s26 + $0x88] sm:$0xff] %v4062_v56  ;;  %4073 = vpow2.f32 %v3534_v44 }
 0x484   : > { %v3101_v46 = vadd.f32 1.0, %v4064_v24  ;;  %v2884_v51 = vpop.f32.mrb[216].mxu1 }
 0x485   : > { %v4066_v4 = vpop.eup %4065  ;;  %v2885_v40 = vadd.f32 %v5165_v14, %v2884_v51  ;;  %v2886_v47 = vpop.f32.mrb[217].mxu1 }
 0x486   : > { %4075 = vrcp.f32 %v3101_v46  ;;  %v3102_v48 = vadd.f32 1.0, %v4066_v4  ;;  %v2887_v17 = vpop.f32.mrb[218].mxu1 }
 0x487   : > { %v3535_v49 = vmul.f32 -1.442695, %v2885_v40  ;;  %v2888_v11 = vadd.f32 %v5165_v14, %v2887_v17  ;;  %v2889_v25 = vpop.f32.mrb[219].mxu1 }
 0x488   : > { %v4068_v29 = vpop.eup %4067  ;;  %4077 = vrcp.f32 %v3102_v48 }
 0x489   : > { %3225 = vst [vmem:[%s5179_s26 + $0x90] sm:$0xff] %v4068_v29  ;;  %4079 = vpow2.f32 %v3535_v49  ;;  %v3536_v50 = vmul.f32 -1.442695, %v2888_v11 }
 0x48a   : > { %v4070_v52 = vpop.eup %4069 }
 0x48b   : > { %v4072_v1 = vpop.eup %4071  ;;  %3226 = vst [vmem:[%s5179_s26 + $0x98] sm:$0xff] %v4070_v52  ;;  %4081 = vpow2.f32 %v3536_v50 }
 0x48c   : > { %v3103_v53 = vadd.f32 1.0, %v4072_v1  ;;  %v2892_v54 = vpop.f32.mrb[220].mxu1 }
 0x48d   : > { %v4074_v55 = vpop.eup %4073  ;;  %v2893_v57 = vadd.f32 %v5165_v14, %v2892_v54  ;;  %v2894_v58 = vpop.f32.mrb[221].mxu1 }
 0x48e   : > { %4083 = vrcp.f32 %v3103_v53  ;;  %v3104_v27 = vadd.f32 1.0, %v4074_v55  ;;  %v2895_v20 = vpop.f32.mrb[222].mxu1 }
 0x48f   : > { %v3537_v5 = vmul.f32 -1.442695, %v2893_v57  ;;  %v2896_v6 = vadd.f32 %v5165_v14, %v2895_v20  ;;  %v2897_v12 = vpop.f32.mrb[223].mxu1 }
 0x490   : > { %v4076_v59 = vpop.eup %4075  ;;  %4085 = vrcp.f32 %v3104_v27 }
 0x491   : > { %3227 = vst [vmem:[%s5179_s26 + $0xa0] sm:$0xff] %v4076_v59  ;;  %4087 = vpow2.f32 %v3537_v5  ;;  %v3538_v7 = vmul.f32 -1.442695, %v2896_v6 }
 0x492   : > { %v4078_v60 = vpop.eup %4077 }
 0x493   : > { %v4080_v3 = vpop.eup %4079  ;;  %3228 = vst [vmem:[%s5179_s26 + $0xa8] sm:$0xff] %v4078_v60  ;;  %4089 = vpow2.f32 %v3538_v7 }
 0x494   : > { %v3105_v61 = vadd.f32 1.0, %v4080_v3  ;;  %v2900_v8 = vpop.f32.mrb[224].mxu1 }
 0x495   : > { %v4082_v62 = vpop.eup %4081  ;;  %v2901_v63 = vadd.f32 %v5165_v14, %v2900_v8  ;;  %v2902_v0 = vpop.f32.mrb[225].mxu1 }
 0x496   : > { %4091 = vrcp.f32 %v3105_v61  ;;  %v3106_v2 = vadd.f32 1.0, %v4082_v62  ;;  %v2903_v21 = vpop.f32.mrb[226].mxu1 }
 0x497   : > { %v3539_v36 = vmul.f32 -1.442695, %v2901_v63  ;;  %v2904_v16 = vadd.f32 %v5165_v14, %v2903_v21  ;;  %v2905_v13 = vpop.f32.mrb[227].mxu1 }
 0x498   : > { %v4084_v9 = vpop.eup %4083  ;;  %4093 = vrcp.f32 %v3106_v2 }
 0x499   : > { %3229 = vst [vmem:[%s5179_s26 + $0xb0] sm:$0xff] %v4084_v9  ;;  %4095 = vpow2.f32 %v3539_v36  ;;  %v3540_v15 = vmul.f32 -1.442695, %v2904_v16 }
 0x49a   : > { %v4086_v18 = vpop.eup %4085 }
 0x49b   : > { %v4088_v19 = vpop.eup %4087  ;;  %3230 = vst [vmem:[%s5179_s26 + $0xb8] sm:$0xff] %v4086_v18  ;;  %4097 = vpow2.f32 %v3540_v15 }
 0x49c   : > { %v3107_v26 = vadd.f32 1.0, %v4088_v19  ;;  %v2908_v28 = vpop.f32.mrb[228].mxu1 }
 0x49d   : > { %v4090_v30 = vpop.eup %4089  ;;  %v2909_v22 = vadd.f32 %v5165_v14, %v2908_v28  ;;  %v2910_v31 = vpop.f32.mrb[229].mxu1 }
 0x49e   : > { %4099 = vrcp.f32 %v3107_v26  ;;  %v3108_v32 = vadd.f32 1.0, %v4090_v30  ;;  %v2911_v33 = vpop.f32.mrb[230].mxu1 }
 0x49f   : > { %v3541_v34 = vmul.f32 -1.442695, %v2909_v22  ;;  %v2912_v35 = vadd.f32 %v5165_v14, %v2911_v33  ;;  %v2913_v10 = vpop.f32.mrb[231].mxu1 }
 0x4a0   : > { %v4092_v23 = vpop.eup %4091  ;;  %4101 = vrcp.f32 %v3108_v32 }
 0x4a1   : > { %3231 = vst [vmem:[%s5179_s26 + $0xc0] sm:$0xff] %v4092_v23  ;;  %4103 = vpow2.f32 %v3541_v34  ;;  %v3542_v37 = vmul.f32 -1.442695, %v2912_v35 }
 0x4a2   : > { %v4094_v45 = vpop.eup %4093 }
 0x4a3   : > { %v4096_v38 = vpop.eup %4095  ;;  %3232 = vst [vmem:[%s5179_s26 + $0xc8] sm:$0xff] %v4094_v45  ;;  %4105 = vpow2.f32 %v3542_v37 }
 0x4a4   : > { %v3109_v39 = vadd.f32 1.0, %v4096_v38  ;;  %v2916_v41 = vpop.f32.mrb[232].mxu1 }
 0x4a5   : > { %v4098_v42 = vpop.eup %4097  ;;  %v2917_v43 = vadd.f32 %v5165_v14, %v2916_v41  ;;  %v2918_v44 = vpop.f32.mrb[233].mxu1 }
 0x4a6   : > { %4107 = vrcp.f32 %v3109_v39  ;;  %v3110_v56 = vadd.f32 1.0, %v4098_v42  ;;  %v2919_v24 = vpop.f32.mrb[234].mxu1 }
 0x4a7   : > { %v3543_v46 = vmul.f32 -1.442695, %v2917_v43  ;;  %v2920_v51 = vadd.f32 %v5165_v14, %v2919_v24  ;;  %v2921_v4 = vpop.f32.mrb[235].mxu1 }
 0x4a8   : > { %v4100_v40 = vpop.eup %4099  ;;  %4109 = vrcp.f32 %v3110_v56 }
 0x4a9   : > { %3233 = vst [vmem:[%s5179_s26 + $0xd0] sm:$0xff] %v4100_v40  ;;  %4111 = vpow2.f32 %v3543_v46  ;;  %v3544_v47 = vmul.f32 -1.442695, %v2920_v51 }
 0x4aa   : > { %v4102_v48 = vpop.eup %4101 }
 0x4ab   : > { %v4104_v17 = vpop.eup %4103  ;;  %3234 = vst [vmem:[%s5179_s26 + $0xd8] sm:$0xff] %v4102_v48  ;;  %4113 = vpow2.f32 %v3544_v47 }
 0x4ac   : > { %v3111_v49 = vadd.f32 1.0, %v4104_v17  ;;  %v2924_v11 = vpop.f32.mrb[236].mxu1 }
 0x4ad   : > { %v4106_v25 = vpop.eup %4105  ;;  %v2925_v29 = vadd.f32 %v5165_v14, %v2924_v11  ;;  %v2926_v50 = vpop.f32.mrb[237].mxu1 }
 0x4ae   : > { %4115 = vrcp.f32 %v3111_v49  ;;  %v3112_v52 = vadd.f32 1.0, %v4106_v25  ;;  %v2927_v1 = vpop.f32.mrb[238].mxu1 }
 0x4af   : > { %v3545_v53 = vmul.f32 -1.442695, %v2925_v29  ;;  %v2928_v54 = vadd.f32 %v5165_v14, %v2927_v1  ;;  %v2929_v55 = vpop.f32.mrb[239].mxu1 }
 0x4b0   : > { %v4108_v57 = vpop.eup %4107  ;;  %4117 = vrcp.f32 %v3112_v52 }
 0x4b1   : > { %3235 = vst [vmem:[%s5179_s26 + $0xe0] sm:$0xff] %v4108_v57  ;;  %4119 = vpow2.f32 %v3545_v53  ;;  %v3546_v58 = vmul.f32 -1.442695, %v2928_v54 }
 0x4b2   : > { %v4110_v27 = vpop.eup %4109 }
 0x4b3   : > { %v4112_v20 = vpop.eup %4111  ;;  %3236 = vst [vmem:[%s5179_s26 + $0xe8] sm:$0xff] %v4110_v27  ;;  %4121 = vpow2.f32 %v3546_v58 }
 0x4b4   : > { %v3113_v5 = vadd.f32 1.0, %v4112_v20  ;;  %v2932_v6 = vpop.f32.mrb[240].mxu1 }
 0x4b5   : > { %v4114_v12 = vpop.eup %4113  ;;  %v2933_v59 = vadd.f32 %v5165_v14, %v2932_v6  ;;  %v2934_v7 = vpop.f32.mrb[241].mxu1 }
 0x4b6   : > { %4123 = vrcp.f32 %v3113_v5  ;;  %v3114_v60 = vadd.f32 1.0, %v4114_v12  ;;  %v2935_v3 = vpop.f32.mrb[242].mxu1 }
 0x4b7   : > { %v3547_v61 = vmul.f32 -1.442695, %v2933_v59  ;;  %v2936_v8 = vadd.f32 %v5165_v14, %v2935_v3  ;;  %v2937_v62 = vpop.f32.mrb[243].mxu1 }
 0x4b8   : > { %v4116_v63 = vpop.eup %4115  ;;  %4125 = vrcp.f32 %v3114_v60 }
 0x4b9   : > { %3237 = vst [vmem:[%s5179_s26 + $0xf0] sm:$0xff] %v4116_v63  ;;  %4127 = vpow2.f32 %v3547_v61  ;;  %v3548_v0 = vmul.f32 -1.442695, %v2936_v8 }
 0x4ba   : > { %v4118_v2 = vpop.eup %4117 }
 0x4bb   : > { %v4120_v21 = vpop.eup %4119  ;;  %3238 = vst [vmem:[%s5179_s26 + $0xf8] sm:$0xff] %v4118_v2  ;;  %4129 = vpow2.f32 %v3548_v0 }
 0x4bc   : > { %v3115_v36 = vadd.f32 1.0, %v4120_v21  ;;  %v2940_v16 = vpop.f32.mrb[244].mxu1 }
 0x4bd   : > { %v4122_v13 = vpop.eup %4121  ;;  %v2941_v9 = vadd.f32 %v5165_v14, %v2940_v16  ;;  %v2942_v15 = vpop.f32.mrb[245].mxu1 }
 0x4be   : > { %4131 = vrcp.f32 %v3115_v36  ;;  %v3116_v18 = vadd.f32 1.0, %v4122_v13  ;;  %v2943_v19 = vpop.f32.mrb[246].mxu1 }
 0x4bf   : > { %v3549_v26 = vmul.f32 -1.442695, %v2941_v9  ;;  %v2944_v28 = vadd.f32 %v5165_v14, %v2943_v19  ;;  %v2945_v30 = vpop.f32.mrb[247].mxu1 }
 0x4c0   : > { %v4124_v22 = vpop.eup %4123  ;;  %4133 = vrcp.f32 %v3116_v18 }
 0x4c1   : > { %3239 = vst [vmem:[%s5179_s26 + $0x100] sm:$0xff] %v4124_v22  ;;  %4135 = vpow2.f32 %v3549_v26  ;;  %v3550_v31 = vmul.f32 -1.442695, %v2944_v28 }
 0x4c2   : > { %v4126_v32 = vpop.eup %4125 }
 0x4c3   : > { %v4128_v33 = vpop.eup %4127  ;;  %3240 = vst [vmem:[%s5179_s26 + $0x108] sm:$0xff] %v4126_v32  ;;  %4137 = vpow2.f32 %v3550_v31 }
 0x4c4   : > { %v3117_v34 = vadd.f32 1.0, %v4128_v33  ;;  %v2948_v35 = vpop.f32.mrb[248].mxu1 }
 0x4c5   : > { %v4130_v10 = vpop.eup %4129  ;;  %v2949_v23 = vadd.f32 %v5165_v14, %v2948_v35  ;;  %v2950_v37 = vpop.f32.mrb[249].mxu1 }
 0x4c6   : > { %4139 = vrcp.f32 %v3117_v34  ;;  %v3118_v45 = vadd.f32 1.0, %v4130_v10  ;;  %v2951_v38 = vpop.f32.mrb[250].mxu1 }
 0x4c7   : > { %v3551_v39 = vmul.f32 -1.442695, %v2949_v23  ;;  %v2952_v41 = vadd.f32 %v5165_v14, %v2951_v38  ;;  %v2953_v42 = vpop.f32.mrb[251].mxu1 }
 0x4c8   : > { %v4132_v43 = vpop.eup %4131  ;;  %4141 = vrcp.f32 %v3118_v45 }
 0x4c9   : > { %3241 = vst [vmem:[%s5179_s26 + $0x110] sm:$0xff] %v4132_v43  ;;  %4143 = vpow2.f32 %v3551_v39  ;;  %v3552_v44 = vmul.f32 -1.442695, %v2952_v41 }
 0x4ca   : > { %v4134_v56 = vpop.eup %4133 }
 0x4cb   : > { %v4136_v24 = vpop.eup %4135  ;;  %3242 = vst [vmem:[%s5179_s26 + $0x118] sm:$0xff] %v4134_v56  ;;  %4145 = vpow2.f32 %v3552_v44 }
 0x4cc   : > { %v3119_v46 = vadd.f32 1.0, %v4136_v24 }
 0x4cd   : > { %v4138_v51 = vpop.eup %4137 }
 0x4ce   : > { %4147 = vrcp.f32 %v3119_v46  ;;  %v3120_v4 = vadd.f32 1.0, %v4138_v51 }
 0x4d0   : > { %v4140_v40 = vpop.eup %4139  ;;  %4149 = vrcp.f32 %v3120_v4 }
 0x4d1   : > { %3243 = vst [vmem:[%s5179_s26 + $0x120] sm:$0xff] %v4140_v40 }
 0x4d2   : > { %v4142_v14 = vpop.eup %4141 }
 0x4d3   : > { %v4144_v47 = vpop.eup %4143  ;;  %3244 = vst [vmem:[%s5179_s26 + $0x128] sm:$0xff] %v4142_v14 }
 0x4d4   : > { %v3121_v48 = vadd.f32 1.0, %v4144_v47 }
 0x4d5   : > { %v4146_v17 = vpop.eup %4145 }
 0x4d6   : > { %4151 = vrcp.f32 %v3121_v48  ;;  %v3122_v49 = vadd.f32 1.0, %v4146_v17 }
 0x4d8   : > { %v4148_v11 = vpop.eup %4147  ;;  %4153 = vrcp.f32 %v3122_v49 }
 0x4d9   : > { %3245 = vst [vmem:[%s5179_s26 + $0x130] sm:$0xff] %v4148_v11 }
 0x4da   : > { %v4150_v25 = vpop.eup %4149 }
 0x4db   : > { %3246 = vst [vmem:[%s5179_s26 + $0x138] sm:$0xff] %v4150_v25 }
 0x4e0   : > { %v4152_v29 = vpop.eup %4151 }
 0x4e1   : > { %3247 = vst [vmem:[%s5179_s26 + $0x140] sm:$0xff] %v4152_v29 }
 0x4e2   : > { %v4154_v50 = vpop.eup %4153 }
 0x4e3   : > { %3248 = vst [vmem:[%s5179_s26 + $0x148] sm:$0xff] %v4154_v50 }
 0x4e4 PF: > { %s25_s29 = sadd.s32 1, %s4162_s29  }
 0x4e5   : > { %p22_p4 = scmp.ge.s32.totalorder %s25_s29, 4  }
 0x4e7   :  { %24 = sbr.rel (!%p22_p4) target bundleno = 1 (0x1), region = 114 }

</bundles_post_ra>
